<compile_context>
chip_gen: v5e
topology: v5e:2x2
jax: 0.10.0
libtpu: 0.0.40
codegen_flags: <defaults>
</compile_context>

<pallas_src>
import functools

import jax
import jax.numpy as jnp
from jax.experimental import pallas as pl
from jax.experimental.pallas import tpu as pltpu


def _round_up(x, m):
    return ((x + m - 1) // m) * m


# Below this row count the whole batch is a single (N, C) block == full array:
# no padding, no (8,128) constraint, 1-step grid.  The kernel is overhead-
# bound at these sizes, so one step is the win on all generations.
_SINGLE_TILE_MAX = 512


def _instance_da_kernel(x_ref, w1_ref, b1_ref, w2_ref, b2_ref, w3_ref, b3_ref,
                        out_ref):
    """relu(x@W1+b1) -> relu(.@W2+b2) -> sigmoid(sum(.*w3,-1)+b3), row output."""
    # Hoist biases / classifier row once per invocation (JAX does not CSE
    # broadcast_in_dim).
    b1 = b1_ref[...]              # (1, H1) f32
    b2 = b2_ref[...]              # (1, H2) f32
    w3 = w3_ref[...]              # (1, H2) f32
    b3 = b3_ref[0]                # scalar f32 from SMEM

    # x arrives as f32 straight from HBM; bf16 cast on the VPU hides under the
    # MXU matmul (no wrapper-side convert kernel / extra HBM round trip).
    x = x_ref[...].astype(jnp.bfloat16)

    # dc_ip1 + dc_relu1 (+ eval-mode dropout = identity):
    # bf16 MXU matmul with f32 accumulation; bias/ReLU in f32 on the VPU.
    h1 = jnp.dot(x, w1_ref[...], preferred_element_type=jnp.float32)
    h1 = jnp.maximum(h1 + b1, 0.0)

    # dc_ip2 + dc_relu2 (+ eval-mode dropout = identity).
    h2 = jnp.dot(h1.astype(jnp.bfloat16), w2_ref[...],
                 preferred_element_type=jnp.float32)
    h2 = jnp.maximum(h2 + b2, 0.0)

    # clssifer (output width 1): a 1-wide MXU matmul would waste the systolic
    # array, so do it as a VPU multiply + XLU lane reduction and emit a
    # lane-dense (1, tile) row.
    s = jnp.sum(h2 * w3, axis=-1)              # (tile,)
    logits = s[None, :] + b3                   # (1, tile)
    # sigmoid = 1 / (1 + exp(-x)) with the divide on the EUP reciprocal slot.
    out_ref[...] = pl.reciprocal(1.0 + jnp.exp(-logits),
                                 approx=True).astype(out_ref.dtype)


def _vmem_limit_bytes(tile, c, h1, h2):
    """Actual VMEM footprint (+margin), clamped so it is v7x-friendly."""
    x_b = 2 * tile * c * 4                 # f32 x tile, double-buffered
    w_b = (c * h1 + h1 * h2) * 2           # bf16 weights, single-buffered
    bias_b = (h1 + 2 * h2 + 128) * 4       # biases + classifier row (f32)
    out_b = 2 * tile * 4                   # (1, tile) f32 out, double-buffered
    total = x_b + w_b + bias_b + out_b
    return int(min(max(2 * total + (4 << 20), 16 << 20), 48 << 20))


@functools.partial(jax.jit, static_argnames=("tile_n",))
def instance_da_forward(x, params, *, tile_n=256):
    """Pallas-backed forward of _InstanceDA (eval mode, grad_reverse identity).

    Args:
      x:      [N, C] float32 instance features (any N).
      params: dict with w1 [C,H1] bf16, b1 [1,H1] f32, w2 [H1,H2] bf16,
              b2 [1,H2] f32, w3 [1,H2] f32 (PyTorch row layout), b3 [1] f32.
              (matmul weights stored transposed vs PyTorch, bf16 at init).
    Returns:
      [N, 1] float32 sigmoid domain scores.
    """
    n, c = x.shape
    w1, b1 = params["w1"], params["b1"]
    w2, b2 = params["w2"], params["b2"]
    w3, b3 = params["w3"], params["b3"]
    h1 = w1.shape[1]
    h2 = w2.shape[1]

    if n <= _SINGLE_TILE_MAX:
        # One grid step; block == full array -> no pad op at all.
        tile, n_pad, x_in = n, n, x
    else:
        # Multi-tile path: 256-row tiles fill the v6e/v7x 256-wide MXU
        # (= 2x128 passes on v5e).  Pad N once (f32, no wrapper cast).
        # TODO(synk): on v7x pick tile ~= cdiv(N, 2) rounded to 256 so both
        # TensorCores get a "parallel" grid step.
        tile = _round_up(tile_n, 128)
        n_pad = _round_up(n, tile)
        x_in = jnp.pad(x, ((0, n_pad - n), (0, 0)))

    # Grid-invariant blocks: single-buffered (no useless resident copy).
    resident = dict(pipeline_mode=pl.Buffered(1))

    out_row = pl.pallas_call(
        _instance_da_kernel,
        out_shape=jax.ShapeDtypeStruct((1, n_pad), jnp.float32),
        grid_spec=pltpu.PrefetchScalarGridSpec(
            num_scalar_prefetch=0,
            grid=(n_pad // tile,),
            in_specs=[
                # x: tiled over rows, f32 in HBM, cast in-kernel.
                pl.BlockSpec((tile, c), lambda i: (i, 0)),
                # weights / biases: whole arrays, resident across the grid.
                pl.BlockSpec((c, h1), lambda i: (0, 0), **resident),
                pl.BlockSpec((1, h1), lambda i: (0, 0), **resident),
                pl.BlockSpec((h1, h2), lambda i: (0, 0), **resident),
                pl.BlockSpec((1, h2), lambda i: (0, 0), **resident),
                pl.BlockSpec((1, h2), lambda i: (0, 0), **resident),
                # b3: tiny scalar -> SMEM, no padded VMEM block / DMA buffers.
                pl.BlockSpec(memory_space=pltpu.SMEM),
            ],
            # Lane-dense output: one (1, tile) row per grid step.
            out_specs=pl.BlockSpec((1, tile), lambda i: (0, i)),
        ),
        compiler_params=pltpu.CompilerParams(
            dimension_semantics=("parallel",),
            vmem_limit_bytes=_vmem_limit_bytes(tile, c, h1, h2),
        ),
    )(x_in, w1, b1, w2, b2, w3, b3)

    return out_row.reshape(n_pad, 1)[:n]


def init_instance_da_params(key, in_channle, hidden1, hidden2):
    """torch.nn.Linear-style init (uniform +-1/sqrt(fan_in)).

    Matmul weights are stored transposed ([in, out]) relative to PyTorch's
    [out, in] and converted to bf16 ONCE here (so the jitted forward launches
    no per-call convert kernels).  The 1-wide classifier stays f32 and is kept
    in PyTorch's (1, H2) row layout.
    """
    ks = jax.random.split(key, 6)

    def linear(kw, kb, fan_in, fan_out):
        bound = 1.0 / jnp.sqrt(jnp.float32(fan_in))
        w = jax.random.uniform(kw, (fan_in, fan_out), jnp.float32, -bound, bound)
        b = jax.random.uniform(kb, (1, fan_out), jnp.float32, -bound, bound)
        return w, b

    w1, b1 = linear(ks[0], ks[1], in_channle, hidden1)
    w2, b2 = linear(ks[2], ks[3], hidden1, hidden2)
    w3, b3 = linear(ks[4], ks[5], hidden2, 1)
    return {
        "w1": w1.astype(jnp.bfloat16), "b1": b1,
        "w2": w2.astype(jnp.bfloat16), "b2": b2,
        "w3": w3.reshape(1, hidden2), "b3": b3.reshape(1),
    }


def _reference_forward(x, params):
    """Plain-JAX reference using the same bf16-operand / f32-accum math."""
    h1 = jnp.dot(x.astype(jnp.bfloat16), params["w1"],
                 preferred_element_type=jnp.float32) + params["b1"]
    h1 = jnp.maximum(h1, 0.0)
    h2 = jnp.dot(h1.astype(jnp.bfloat16), params["w2"],
                 preferred_element_type=jnp.float32) + params["b2"]
    h2 = jnp.maximum(h2, 0.0)
    logits = jnp.sum(h2 * params["w3"], axis=-1, keepdims=True) + params["b3"]
    return jax.nn.sigmoid(logits)


if __name__ == "__main__":
    # Scaled-down shapes consistent with the module (in_channle -> 1024 ->
    # 1024 -> 1): 200 instances, 512-d features, 256-d hidden layers.  N=200
    # exercises the single-block fast path (block == full array, no padding).
    N, IN_CH, H1, H2 = 200, 512, 256, 256

    key = jax.random.PRNGKey(0)
    k_x, k_p = jax.random.split(key)

    x = jax.random.normal(k_x, (N, IN_CH), jnp.float32)
    # need_backprop is only consumed by the (undefined) LabelResizeLayer.
    need_backprop = jnp.ones((1,), jnp.float32)  # unused, see TODO above
    params = init_instance_da_params(k_p, IN_CH, H1, H2)

    out = instance_da_forward(x, params)
    out = jax.block_until_ready(out)

    ref = _reference_forward(x, params)
    assert out.shape == (N, 1)
    assert bool(jnp.all(jnp.isfinite(out)))
    max_err = float(jnp.max(jnp.abs(out - ref)))
    assert jnp.allclose(out, ref, atol=3e-3, rtol=2e-2), (
        "mismatch vs reference, max abs diff = %f" % max_err)

    print("KERNEL_OK")
</pallas_src>

<mosaic_0001>
module attributes {stable_mosaic.version = 11 : i64} {
  func.func @_instance_da_kernel(%arg0: i32, %arg1: memref<200x512xf32, #tpu.memory_space<vmem>>, %arg2: memref<512x256xbf16, #tpu.memory_space<vmem>>, %arg3: memref<1x256xf32, #tpu.memory_space<vmem>>, %arg4: memref<256x256xbf16, #tpu.memory_space<vmem>>, %arg5: memref<1x256xf32, #tpu.memory_space<vmem>>, %arg6: memref<1x256xf32, #tpu.memory_space<vmem>>, %arg7: memref<1xf32, #tpu.memory_space<smem>>, %arg8: memref<1x200xf32, #tpu.memory_space<vmem>>) attributes {dimension_semantics = [#tpu.dimension_semantics<parallel>], iteration_bounds = array<i64: 1>, scalar_prefetch = 0 : i64, scratch_operands = 0 : i64, tpu.core_type = #tpu.core_type<tc>, window_params = [{transform_indices = @transform_0, window_bounds = array<i64: 200, 512>}, {pipeline_mode = #tpu.pipeline_mode<synchronous>, transform_indices = @transform_1, window_bounds = array<i64: 512, 256>}, {pipeline_mode = #tpu.pipeline_mode<synchronous>, transform_indices = @transform_2, window_bounds = array<i64: 1, 256>}, {pipeline_mode = #tpu.pipeline_mode<synchronous>, transform_indices = @transform_3, window_bounds = array<i64: 256, 256>}, {pipeline_mode = #tpu.pipeline_mode<synchronous>, transform_indices = @transform_4, window_bounds = array<i64: 1, 256>}, {pipeline_mode = #tpu.pipeline_mode<synchronous>, transform_indices = @transform_5, window_bounds = array<i64: 1, 256>}, {transform_indices = @transform_6, window_bounds = array<i64: 1>}, {transform_indices = @transform_7, window_bounds = array<i64: 1, 200>}]} {
    %c0 = arith.constant 0 : index
    %c0_0 = arith.constant 0 : index
    %0 = vector.load %arg3[%c0, %c0_0] : memref<1x256xf32, #tpu.memory_space<vmem>>, vector<1x256xf32>
    %c0_1 = arith.constant 0 : index
    %c0_2 = arith.constant 0 : index
    %1 = vector.load %arg5[%c0_1, %c0_2] : memref<1x256xf32, #tpu.memory_space<vmem>>, vector<1x256xf32>
    %c0_3 = arith.constant 0 : index
    %c0_4 = arith.constant 0 : index
    %2 = vector.load %arg6[%c0_3, %c0_4] : memref<1x256xf32, #tpu.memory_space<vmem>>, vector<1x256xf32>
    %c0_5 = arith.constant 0 : index
    %3 = memref.load %arg7[%c0_5] : memref<1xf32, #tpu.memory_space<smem>>
    %c0_6 = arith.constant 0 : index
    %c0_7 = arith.constant 0 : index
    %4 = vector.load %arg1[%c0_6, %c0_7] : memref<200x512xf32, #tpu.memory_space<vmem>>, vector<200x512xf32>
    %5 = arith.truncf %4 : vector<200x512xf32> to vector<200x512xbf16>
    %c0_8 = arith.constant 0 : index
    %c0_9 = arith.constant 0 : index
    %6 = vector.load %arg2[%c0_8, %c0_9] : memref<512x256xbf16, #tpu.memory_space<vmem>>, vector<512x256xbf16>
    %cst = arith.constant dense<0.000000e+00> : vector<200x256xf32>
    %7 = tpu.matmul %5, %6, %cst {dimension_numbers = #tpu.dot_dimension_numbers<[1], [0], [0], [1], [0, 0, 1, 1], [], []>} : vector<200x512xbf16>, vector<512x256xbf16>, vector<200x256xf32> -> vector<200x256xf32>
    %8 = vector.broadcast %0 : vector<1x256xf32> to vector<200x256xf32>
    %9 = arith.addf %7, %8 : vector<200x256xf32>
    %cst_10 = arith.constant 0.000000e+00 : f32
    %10 = vector.broadcast %cst_10 : f32 to vector<200x256xf32>
    %11 = arith.maximumf %9, %10 : vector<200x256xf32>
    %12 = arith.truncf %11 : vector<200x256xf32> to vector<200x256xbf16>
    %c0_11 = arith.constant 0 : index
    %c0_12 = arith.constant 0 : index
    %13 = vector.load %arg4[%c0_11, %c0_12] : memref<256x256xbf16, #tpu.memory_space<vmem>>, vector<256x256xbf16>
    %cst_13 = arith.constant dense<0.000000e+00> : vector<200x256xf32>
    %14 = tpu.matmul %12, %13, %cst_13 {dimension_numbers = #tpu.dot_dimension_numbers<[1], [0], [0], [1], [0, 0, 1, 1], [], []>} : vector<200x256xbf16>, vector<256x256xbf16>, vector<200x256xf32> -> vector<200x256xf32>
    %15 = vector.broadcast %1 : vector<1x256xf32> to vector<200x256xf32>
    %16 = arith.addf %14, %15 : vector<200x256xf32>
    %cst_14 = arith.constant 0.000000e+00 : f32
    %17 = vector.broadcast %cst_14 : f32 to vector<200x256xf32>
    %18 = arith.maximumf %16, %17 : vector<200x256xf32>
    %19 = vector.broadcast %2 : vector<1x256xf32> to vector<200x256xf32>
    %20 = arith.mulf %18, %19 : vector<200x256xf32>
    %cst_15 = arith.constant dense<0.000000e+00> : vector<200xf32>
    %21 = vector.multi_reduction <add>, %20, %cst_15 [1] : vector<200x256xf32> to vector<200xf32>
    %22 = vector.shape_cast %21 : vector<200xf32> to vector<1x200xf32>
    %23 = vector.broadcast %3 : f32 to vector<1x200xf32>
    %24 = arith.addf %22, %23 : vector<1x200xf32>
    %cst_16 = arith.constant 0.000000e+00 : f32
    %25 = vector.broadcast %cst_16 : f32 to vector<1x200xf32>
    %26 = arith.subf %25, %24 : vector<1x200xf32>
    %27 = math.exp %26 : vector<1x200xf32>
    %cst_17 = arith.constant 1.000000e+00 : f32
    %28 = vector.broadcast %cst_17 : f32 to vector<1x200xf32>
    %29 = arith.addf %28, %27 : vector<1x200xf32>
    %30 = tpu.reciprocal %29 {approx = true} : vector<1x200xf32> -> vector<1x200xf32>
    %c0_18 = arith.constant 0 : index
    %c0_19 = arith.constant 0 : index
    %31 = vector.load %arg8[%c0_18, %c0_19] : memref<1x200xf32, #tpu.memory_space<vmem>>, vector<1x200xf32>
    tpu.vector_store %arg8[%c0_18, %c0_19], %30 {strides = array<i32>} : memref<1x200xf32, #tpu.memory_space<vmem>>, vector<1x200xf32>,
    return
  }
  func.func @transform_0(%arg0: i32) -> (i32, i32) {
    %c0_i32 = arith.constant 0 : i32
    %c0_i32_0 = arith.constant 0 : i32
    return %arg0, %c0_i32 : i32, i32
  }
  func.func @transform_1(%arg0: i32) -> (i32, i32) {
    %c0_i32 = arith.constant 0 : i32
    %c0_i32_0 = arith.constant 0 : i32
    %c0_i32_1 = arith.constant 0 : i32
    return %c0_i32, %c0_i32_0 : i32, i32
  }
  func.func @transform_2(%arg0: i32) -> (i32, i32) {
    %c0_i32 = arith.constant 0 : i32
    %c0_i32_0 = arith.constant 0 : i32
    %c0_i32_1 = arith.constant 0 : i32
    return %c0_i32, %c0_i32_0 : i32, i32
  }
  func.func @transform_3(%arg0: i32) -> (i32, i32) {
    %c0_i32 = arith.constant 0 : i32
    %c0_i32_0 = arith.constant 0 : i32
    %c0_i32_1 = arith.constant 0 : i32
    return %c0_i32, %c0_i32_0 : i32, i32
  }
  func.func @transform_4(%arg0: i32) -> (i32, i32) {
    %c0_i32 = arith.constant 0 : i32
    %c0_i32_0 = arith.constant 0 : i32
    %c0_i32_1 = arith.constant 0 : i32
    return %c0_i32, %c0_i32_0 : i32, i32
  }
  func.func @transform_5(%arg0: i32) -> (i32, i32) {
    %c0_i32 = arith.constant 0 : i32
    %c0_i32_0 = arith.constant 0 : i32
    %c0_i32_1 = arith.constant 0 : i32
    return %c0_i32, %c0_i32_0 : i32, i32
  }
  func.func @transform_6(%arg0: i32) -> i32 {
    %c0_i32 = arith.constant 0 : i32
    %c0_i32_0 = arith.constant 0 : i32
    return %c0_i32 : i32
  }
  func.func @transform_7(%arg0: i32) -> (i32, i32) {
    %c0_i32 = arith.constant 0 : i32
    %c0_i32_0 = arith.constant 0 : i32
    return %c0_i32, %arg0 : i32, i32
  }
}

</mosaic_0001>

<bundles_post_ra>
// kernel: instance_da_forward.1
= control target key start
LH: loop header
LB: loop body
LE: loop exit
PB: predicated region body
PF: predicated region fallthrough
CT: control target
= control target key end

     0   :  { %13 = vsyncpa [#allocation4], 0  ;;  %s4180_s0 = inlined_call_operand.hbm [shape: f32[200,512], index: 0, kind: input, shape index: {}]   ;;  %s4181_s1 = inlined_call_operand.hbm [shape: bf16[512,256], index: 1, kind: input, shape index: {}]   ;;  %s4182_s2 = inlined_call_operand.vmem [shape: f32[1,256], index: 2, kind: input, shape index: {}]   ;;  %s4183_s3 = inlined_call_operand.hbm [shape: bf16[256,256], index: 3, kind: input, shape index: {}]   ;;  %s4184_s4 = inlined_call_operand.hbm [shape: f32[1,256], index: 4, kind: input, shape index: {}]   ;;  %s4185_s5 = inlined_call_operand.vmem [shape: f32[1,256], index: 5, kind: input, shape index: {}]   ;;  %s4186_s6 = inlined_call_operand.<no memory space> [shape: f32[1], index: 6, kind: input, shape index: {}]   ;;  %s4187_s7 = inlined_call_operand.hbm [shape: f32[1,200], index: 7, kind: output, shape index: {}]  }
   0x1   :  { %14 = vsyncpa [#allocation7], 0 }
   0x2   :  { %15 = vsyncpa [#allocation10], 0  ;;  %s34_s26 = sshll.u32 %s4181_s1, 4  ;;  %s35_s26 = int_to_ptr.hbm [resolvable:$true] %s34_s26 }
   0x3   :  { %16 = vsyncpa [#allocation5], 0  ;;  %s3475_s27 = smov [#allocation6]   ;;  %s21_s8 = sshll.u32 %s4180_s0, 4  ;;  %s22_s8 = int_to_ptr.hbm [resolvable:$true] %s21_s8 }
   0x4   :  { %s36_s28 = sshll.u32 %s3475_s27, 4  ;;  %s3476_s9 = smov 128   ;;  %s37_s28 = int_to_ptr.vmem [resolvable:$true] %s36_s28 }
   0x5   :  { %s3477_s10 = smov 8   ;;  %s3478_s11 = smov [#allocation3]  }
   0x6   :  { %42 = dma.hbm_to_vmem [thread:$0]  %s35_s26, 8192, %s37_s28, [#allocation7], %s3476_s9, %s3476_s9, %s3477_s10  }
   0x7   :  { %s23_s12 = sshll.u32 %s3478_s11, 4  ;;  %s3479_s13 = smov 512   ;;  %s24_s12 = int_to_ptr.vmem [resolvable:$true] %s23_s12 }
   0x8   :  { %s3480_s14 = smov 32   ;;  %s49_s16 = sshll.u32 %s4183_s3, 4  ;;  %s50_s16 = int_to_ptr.hbm [resolvable:$true] %s49_s16 }
   0x9   :  { %29 = dma.hbm_to_vmem [thread:$0]  %s22_s8, 12800, %s24_s12, [#allocation4], %s3479_s13, %s3479_s13, %s3480_s14  }
   0xa   :  { %s3481_s17 = smov [#allocation8]   ;;  %s63_s20 = sshll.u32 %s4184_s4, 4  ;;  %s64_s20 = int_to_ptr.hbm [resolvable:$true] %s63_s20 }
   0xb   :  { %s51_s18 = sshll.u32 %s3481_s17, 4  ;;  %s3482_s21 = smov [#allocation9]   ;;  %s52_s18 = int_to_ptr.vmem [resolvable:$true] %s51_s18 }
   0xc   :  { %57 = dma.hbm_to_vmem [thread:$0]  %s50_s16, 4096, %s52_s18, [#allocation7], %s3476_s9, %s3476_s9, %s3477_s10  }
   0xd   :  { %s65_s22 = sshll.u32 %s3482_s21, 4  ;;  %s66_s22 = int_to_ptr.vmem [resolvable:$true] %s65_s22 }
   0xe   :  { %68 = dma.hbm_to_vmem [thread:$0]  %s64_s20, 32, %s66_s22, [#allocation10]  }
   0xf   :  { %3467 = dma.done.wait [#allocation4], 12800  }
  0x10   :  { %3468 = vsyncadd [#allocation4], 4294954496 }
  0x11   :  { %3469 = dma.done.wait [#allocation7], 12288  }
  0x12   :  { %3470 = vsyncadd [#allocation7], 4294955008 }
  0x13   :  { %3471 = dma.done.wait [#allocation10], 32  }
  0x14   :  { %3472 = vsyncadd [#allocation10], 4294967264  ;;  %v2812_v0 = vld [vmem:[#allocation6 + $0x70] sm:$0xf]  ;;  %v3153_v1 = vld [vmem:[#allocation6 + $0x74] sm:$0xf0] }
  0x15   :  { %v2876_v2 = vld [vmem:[#allocation6 + $0xf0] sm:$0xf]  ;;  %v2813_v3 = vor.u32 %v3153_v1, %v2812_v0  ;;  %v3169_v4 = vld [vmem:[#allocation6 + $0xf4] sm:$0xf0]  ;;  %v2804_v11 = vld [vmem:[#allocation6 + $0x60] sm:$0xf] }
  0x16   :  { %v2940_v5 = vld [vmem:[#allocation6 + $0x170] sm:$0xf]  ;;  %v3185_v6 = vld [vmem:[#allocation6 + $0x174] sm:$0xf0]  ;;  %v2877_v7 = vor.u32 %v3169_v4, %v2876_v2  ;;  %v3151_v13 = vld [vmem:[#allocation6 + $0x64] sm:$0xf0] }
  0x17   :  { %v2941_v8 = vor.u32 %v3185_v6, %v2940_v5  ;;  %v3004_v9 = vld [vmem:[#allocation6 + $0x1f0] sm:$0xf]  ;;  %v3201_v10 = vld [vmem:[#allocation6 + $0x1f4] sm:$0xf0]  ;;  %634 = vmatpush.bf16.msra.mxu0 %v2813_v3  ;;  %v2868_v14 = vld [vmem:[#allocation6 + $0xe0] sm:$0xf]  ;;  %v2805_v16 = vor.u32 %v3151_v13, %v2804_v11 }
  0x18   :  { %v3005_v12 = vor.u32 %v3201_v10, %v3004_v9  ;;  %v3167_v15 = vld [vmem:[#allocation6 + $0xe4] sm:$0xf0]  ;;  %707 = vmatpush.bf16.msra.mxu1 %v2877_v7  ;;  %v2932_v18 = vld [vmem:[#allocation6 + $0x160] sm:$0xf]  ;;  %v2796_v23 = vld [vmem:[#allocation6 + $0x50] sm:$0xf] }
  0x19   :  { %780 = vmatpush.bf16.msra.mxu2 %v2941_v8  ;;  %v2869_v17 = vor.u32 %v3167_v15, %v2868_v14  ;;  %v3183_v19 = vld [vmem:[#allocation6 + $0x164] sm:$0xf0]  ;;  %v2996_v20 = vld [vmem:[#allocation6 + $0x1e0] sm:$0xf]  ;;  %v3149_v24 = vld [vmem:[#allocation6 + $0x54] sm:$0xf0] }
  0x1a   :  { %853 = vmatpush.bf16.msra.mxu3 %v3005_v12  ;;  %v2933_v21 = vor.u32 %v3183_v19, %v2932_v18  ;;  %v3199_v22 = vld [vmem:[#allocation6 + $0x1e4] sm:$0xf0]  ;;  %v2860_v26 = vld [vmem:[#allocation6 + $0xd0] sm:$0xf]  ;;  %v3165_v27 = vld [vmem:[#allocation6 + $0xd4] sm:$0xf0]  ;;  %v2797_v29 = vor.u32 %v3149_v24, %v2796_v23 }
  0x1b   :  { %v2997_v25 = vor.u32 %v3199_v22, %v2996_v20  ;;  %v2924_v28 = vld [vmem:[#allocation6 + $0x150] sm:$0xf]  ;;  %635 = vmatpush.bf16.msra.mxu0 %v2805_v16  ;;  %v3181_v30 = vld [vmem:[#allocation6 + $0x154] sm:$0xf0]  ;;  %v2861_v33 = vor.u32 %v3165_v27, %v2860_v26  ;;  %v2788_v35 = vld [vmem:[#allocation6 + $0x40] sm:$0xf] }
  0x1c   :  { %v2988_v31 = vld [vmem:[#allocation6 + $0x1d0] sm:$0xf]  ;;  %v3197_v32 = vld [vmem:[#allocation6 + $0x1d4] sm:$0xf0]  ;;  %708 = vmatpush.bf16.msra.mxu1 %v2869_v17  ;;  %v2925_v34 = vor.u32 %v3181_v30, %v2924_v28  ;;  %v3147_v36 = vld [vmem:[#allocation6 + $0x44] sm:$0xf0] }
  0x1d   :  { %781 = vmatpush.bf16.msra.mxu2 %v2933_v21  ;;  %v2852_v37 = vld [vmem:[#allocation6 + $0xc0] sm:$0xf]  ;;  %v2989_v38 = vor.u32 %v3197_v32, %v2988_v31  ;;  %v3163_v39 = vld [vmem:[#allocation6 + $0xc4] sm:$0xf0]  ;;  %v2789_v44 = vor.u32 %v3147_v36, %v2788_v35  ;;  %v2780_v47 = vld [vmem:[#allocation6 + $0x30] sm:$0xf] }
  0x1e   :  { %854 = vmatpush.bf16.msra.mxu3 %v2997_v25  ;;  %v2916_v40 = vld [vmem:[#allocation6 + $0x140] sm:$0xf]  ;;  %v3179_v41 = vld [vmem:[#allocation6 + $0x144] sm:$0xf0]  ;;  %v2853_v45 = vor.u32 %v3163_v39, %v2852_v37  ;;  %v3145_v48 = vld [vmem:[#allocation6 + $0x34] sm:$0xf0] }
  0x1f   :  { %v2980_v42 = vld [vmem:[#allocation6 + $0x1c0] sm:$0xf]  ;;  %v3195_v43 = vld [vmem:[#allocation6 + $0x1c4] sm:$0xf0]  ;;  %636 = vmatpush.bf16.msra.mxu0 %v2797_v29  ;;  %v2917_v46 = vor.u32 %v3179_v41, %v2916_v40  ;;  %v2844_v49 = vld [vmem:[#allocation6 + $0xb0] sm:$0xf]  ;;  %v2781_v56 = vor.u32 %v3145_v48, %v2780_v47 }
  0x20   :  { %709 = vmatpush.bf16.msra.mxu1 %v2861_v33  ;;  %v2981_v50 = vor.u32 %v3195_v43, %v2980_v42  ;;  %v3161_v51 = vld [vmem:[#allocation6 + $0xb4] sm:$0xf0]  ;;  %v2908_v52 = vld [vmem:[#allocation6 + $0x130] sm:$0xf]  ;;  %v2772_v59 = vld [vmem:[#allocation6 + $0x20] sm:$0xf] }
  0x21   :  { %782 = vmatpush.bf16.msra.mxu2 %v2925_v34  ;;  %v3177_v53 = vld [vmem:[#allocation6 + $0x134] sm:$0xf0]  ;;  %v2972_v54 = vld [vmem:[#allocation6 + $0x1b0] sm:$0xf]  ;;  %v2845_v57 = vor.u32 %v3161_v51, %v2844_v49  ;;  %v3143_v60 = vld [vmem:[#allocation6 + $0x24] sm:$0xf0] }
  0x22   :  { %855 = vmatpush.bf16.msra.mxu3 %v2989_v38  ;;  %v3193_v55 = vld [vmem:[#allocation6 + $0x1b4] sm:$0xf0]  ;;  %v2909_v58 = vor.u32 %v3177_v53, %v2908_v52  ;;  %v2836_v61 = vld [vmem:[#allocation6 + $0xa0] sm:$0xf]  ;;  %v3159_v63 = vld [vmem:[#allocation6 + $0xa4] sm:$0xf0]  ;;  %v2773_v4 = vor.u32 %v3143_v60, %v2772_v59 }
  0x23   :  { %637 = vmatpush.bf16.msra.mxu0 %v2789_v44  ;;  %v2973_v62 = vor.u32 %v3193_v55, %v2972_v54  ;;  %v2900_v0 = vld [vmem:[#allocation6 + $0x120] sm:$0xf]  ;;  %v3175_v1 = vld [vmem:[#allocation6 + $0x124] sm:$0xf0]  ;;  %v2837_v5 = vor.u32 %v3159_v63, %v2836_v61  ;;  %v2764_v7 = vld [vmem:[#allocation6 + $0x10] sm:$0xf] }
  0x24   :  { %710 = vmatpush.bf16.msra.mxu1 %v2853_v45  ;;  %v2964_v2 = vld [vmem:[#allocation6 + $0x1a0] sm:$0xf]  ;;  %v3191_v3 = vld [vmem:[#allocation6 + $0x1a4] sm:$0xf0]  ;;  %v2901_v6 = vor.u32 %v3175_v1, %v2900_v0  ;;  %v3141_v8 = vld [vmem:[#allocation6 + $0x14] sm:$0xf0] }
  0x25   :  { %783 = vmatpush.bf16.msra.mxu2 %v2917_v46  ;;  %v2828_v9 = vld [vmem:[#allocation6 + $0x90] sm:$0xf]  ;;  %v2965_v10 = vor.u32 %v3191_v3, %v2964_v2  ;;  %v3157_v11 = vld [vmem:[#allocation6 + $0x94] sm:$0xf0]  ;;  %v2756_v16 = vld [vmem:[#allocation6] sm:$0xf]  ;;  %v2765_v17 = vor.u32 %v3141_v8, %v2764_v7 }
  0x26   :  { %856 = vmatpush.bf16.msra.mxu3 %v2981_v50  ;;  %v2892_v12 = vld [vmem:[#allocation6 + $0x110] sm:$0xf]  ;;  %v3173_v13 = vld [vmem:[#allocation6 + $0x114] sm:$0xf0]  ;;  %v3139_v18 = vld [vmem:[#allocation6 + $0x4] sm:$0xf0]  ;;  %v2829_v21 = vor.u32 %v3157_v11, %v2828_v9 }
  0x27   :  { %638 = vmatpush.bf16.msra.mxu0 %v2781_v56  ;;  %v2956_v14 = vld [vmem:[#allocation6 + $0x190] sm:$0xf]  ;;  %v3189_v15 = vld [vmem:[#allocation6 + $0x194] sm:$0xf0]  ;;  %v2820_v19 = vld [vmem:[#allocation6 + $0x80] sm:$0xf]  ;;  %v2893_v22 = vor.u32 %v3173_v13, %v2892_v12  ;;  %v2757_v34 = vor.u32 %v3139_v18, %v2756_v16 }
  0x28   :  { %711 = vmatpush.bf16.msra.mxu1 %v2845_v57  ;;  %v3155_v20 = vld [vmem:[#allocation6 + $0x84] sm:$0xf0]  ;;  %v2884_v23 = vld [vmem:[#allocation6 + $0x100] sm:$0xf]  ;;  %v2957_v26 = vor.u32 %v3189_v15, %v2956_v14  ;;  %v3184_v32 = vld [vmem:[#allocation6 + $0x174] sm:$0xf] }
  0x29   :  { %784 = vmatpush.bf16.msra.mxu2 %v2909_v58  ;;  %v3171_v24 = vld [vmem:[#allocation6 + $0x104] sm:$0xf0]  ;;  %v2948_v25 = vld [vmem:[#allocation6 + $0x180] sm:$0xf]  ;;  %v2942_v33 = vld [vmem:[#allocation6 + $0x178] sm:$0xf0]  ;;  %v2821_v38 = vor.u32 %v3155_v20, %v2820_v19 }
  0x2a   :  { %857 = vmatpush.bf16.msra.mxu3 %v2973_v62  ;;  %v3187_v27 = vld [vmem:[#allocation6 + $0x184] sm:$0xf0]  ;;  %v93_v28 = vld [vmem:[#allocation3] sm:$0xff]  ;;  %v95_v35 = vld [vmem:[#allocation3 + $0x10] sm:$0xff]  ;;  %v2885_v39 = vor.u32 %v3171_v24, %v2884_v23  ;;  %v2945_v44 = vor.u32 %v3184_v32, %v2942_v33  ;;  %vm2651_vm0 = vcmask 130112   ;;  %vm2655_vm1 = vcmask 195712  }
  0x2b   :  { %639 = vmatpush.bf16.msra.mxu0 %v2773_v4  ;;  %v97_v29 = vld [vmem:[#allocation3 + $0x20] sm:$0xff]  ;;  %v94_v30 = vld [vmem:[#allocation3 + $0x8] sm:$0xff]  ;;  %v3200_v36 = vld [vmem:[#allocation6 + $0x1f4] sm:$0xf]  ;;  %v2949_v43 = vor.u32 %v3187_v27, %v2948_v25  ;;  %vm2659_vm2 = vcmask 261312   ;;  %vm2663_vm3 = vcmask 326912  }
  0x2c   :  { %712 = vmatpush.bf16.msra.mxu1 %v2837_v5  ;;  %v98_v31 = vld [vmem:[#allocation3 + $0x28] sm:$0xff]  ;;  %v3006_v37 = vld [vmem:[#allocation6 + $0x1f8] sm:$0xf0]  ;;  %v99_v40 = vld [vmem:[#allocation3 + $0x30] sm:$0xff]  ;;  %v3537_v48 = vpack.c.bf16 %v97_v29, %v93_v28  ;;  %vm2667_vm4 = vcmask 392512   ;;  %vm2671_vm5 = vcmask 458112  }
  0x2d   :  { %785 = vmatpush.bf16.msra.mxu2 %v2901_v6  ;;  %v96_v41 = vld [vmem:[#allocation3 + $0x18] sm:$0xff]  ;;  %v3152_v45 = vld [vmem:[#allocation6 + $0x74] sm:$0xf]  ;;  %v3009_v49 = vor.u32 %v3200_v36, %v3006_v37  ;;  %v3182_v51 = vld [vmem:[#allocation6 + $0x164] sm:$0xf]  ;;  %v3539_v53 = vpack.c.bf16 %v98_v31, %v94_v30  ;;  %v3541_v54 = vpack.c.bf16 %v99_v40, %v95_v35  ;;  %vm2675_vm6 = vcmask 523712  }
  0x2e   :  { %858 = vmatpush.bf16.msra.mxu3 %v2965_v10  ;;  %v100_v42 = vld [vmem:[#allocation3 + $0x38] sm:$0xff]  ;;  %v3168_v47 = vld [vmem:[#allocation6 + $0xf4] sm:$0xf]  ;;  %v2934_v52 = vld [vmem:[#allocation6 + $0x168] sm:$0xf0]  ;;  %vm2679_vm7 = vcmask 589312  }
  0x2f   :  { %640 = vmatpush.bf16.msra.mxu0 %v2765_v17  ;;  %v2814_v46 = vld [vmem:[#allocation6 + $0x78] sm:$0xf0]  ;;  %v3198_v55 = vld [vmem:[#allocation6 + $0x1e4] sm:$0xf]  ;;  %v2998_v56 = vld [vmem:[#allocation6 + $0x1e8] sm:$0xf0]  ;;  %v3543_v57 = vpack.c.bf16 %v100_v42, %v96_v41  ;;  %v2937_v60 = vor.u32 %v3182_v51, %v2934_v52 }
  0x30   :  { %713 = vmatpush.bf16.msra.mxu1 %v2829_v21  ;;  %v2878_v50 = vld [vmem:[#allocation6 + $0xf8] sm:$0xf0]  ;;  %v2817_v58 = vor.u32 %v3152_v45, %v2814_v46  ;;  %v3001_v61 = vor.u32 %v3198_v55, %v2998_v56  ;;  %v3150_v62 = vld [vmem:[#allocation6 + $0x64] sm:$0xf]  ;;  %v2806_v63 = vld [vmem:[#allocation6 + $0x68] sm:$0xf0] }
  0x31   :  { %786 = vmatpush.bf16.msra.mxu2 %v2893_v22  ;;  %v2881_v59 = vor.u32 %v3168_v47, %v2878_v50  ;;  %v3166_v0 = vld [vmem:[#allocation6 + $0xe4] sm:$0xf]  ;;  %v2809_v1 = vor.u32 %v3150_v62, %v2806_v63  ;;  %v2870_v2 = vld [vmem:[#allocation6 + $0xe8] sm:$0xf0]  ;;  %v103_v8 = vld [vmem:[#allocation3 + $0x50] sm:$0xff]  ;;  %vm2683_vm8 = vcmask 654912  }
  0x32   :  { %859 = vmatpush.bf16.msra.mxu3 %v2957_v26  ;;  %v2873_v3 = vor.u32 %v3166_v0, %v2870_v2  ;;  %v101_v4 = vld [vmem:[#allocation3 + $0x40] sm:$0xff]  ;;  %v102_v6 = vld [vmem:[#allocation3 + $0x48] sm:$0xff]  ;;  %v107_v9 = vld [vmem:[#allocation3 + $0x70] sm:$0xff]  ;;  %vm2687_vm9 = vcmask 720512   ;;  %vm2691_vm10 = vcmask 786112   ;;  %vm2695_vm11 = vcmask 851712  }
  0x33   :  { %641 = vmatpush.bf16.msra.mxu0 %v2757_v34  ;;  %v105_v5 = vld [vmem:[#allocation3 + $0x60] sm:$0xff]  ;;  %v106_v7 = vld [vmem:[#allocation3 + $0x68] sm:$0xff]  ;;  %v104_v10 = vld [vmem:[#allocation3 + $0x58] sm:$0xff]  ;;  %v3553_v14 = vpack.c.bf16 %v107_v9, %v103_v8  ;;  %vm2699_vm12 = vcmask 917312   ;;  %vm2703_vm13 = vcmask 982912   ;;  %vm2707_vm14 = vcmask 1048512  }
  0x34   :  { %714 = vmatpush.bf16.msra.mxu1 %v2821_v38  ;;  %v108_v11 = vld [vmem:[#allocation3 + $0x78] sm:$0xff]  ;;  %v3549_v12 = vpack.c.bf16 %v105_v5, %v101_v4  ;;  %v3551_v13 = vpack.c.bf16 %v106_v7, %v102_v6  ;;  %v3180_v16 = vld [vmem:[#allocation6 + $0x154] sm:$0xf]  ;;  %v109_v28 = vld [vmem:[#allocation3 + $0x80] sm:$0xff]  ;;  %s2742_s28 = sshll.u32 %s4187_s7, 4  ;;  %vm2727_vm15 = vcmask 1040384   ;;  %s2743_s28 = int_to_ptr.hbm [resolvable:$true] %s2742_s28 }
  0x35   :  { %787 = vmatpush.bf16.msra.mxu2 %v2885_v39  ;;  %v3555_v15 = vpack.c.bf16 %v108_v11, %v104_v10  ;;  %v2926_v17 = vld [vmem:[#allocation6 + $0x158] sm:$0xf0]  ;;  %v3196_v18 = vld [vmem:[#allocation6 + $0x1d4] sm:$0xf]  ;;  %v113_v29 = vld [vmem:[#allocation3 + $0xa0] sm:$0xff] }
  0x36   :  { %860 = vmatpush.bf16.msra.mxu3 %v2949_v43  ;;  %642 = vmatmul.bf16.vlgmr.msra.gmra.mxu0 %v3537_v48  ;;  %v2929_v19 = vor.u32 %v3180_v16, %v2926_v17  ;;  %v2990_v20 = vld [vmem:[#allocation6 + $0x1d8] sm:$0xf0]  ;;  %v3148_v21 = vld [vmem:[#allocation6 + $0x54] sm:$0xf]  ;;  %v110_v30 = vld [vmem:[#allocation3 + $0x88] sm:$0xff]  ;;  %v3561_v36 = vpack.c.bf16 %v113_v29, %v109_v28 }
  0x37   :  { %715 = vmatmul.bf16.vlgmr.msra.gmra.mxu1 %v3539_v53  ;;  %926 = vmatpush.bf16.msrb.mxu0 %v2817_v58  ;;  %v2798_v22 = vld [vmem:[#allocation6 + $0x58] sm:$0xf0]  ;;  %v2993_v23 = vor.u32 %v3196_v18, %v2990_v20  ;;  %v3164_v25 = vld [vmem:[#allocation6 + $0xd4] sm:$0xf]  ;;  %v114_v31 = vld [vmem:[#allocation3 + $0xa8] sm:$0xff] }
  0x38   :  { %788 = vmatmul.bf16.vlgmr.msra.gmra.mxu2 %v3541_v54  ;;  %999 = vmatpush.bf16.msrb.mxu1 %v2881_v59  ;;  %v2801_v24 = vor.u32 %v3148_v21, %v2798_v22  ;;  %v2862_v26 = vld [vmem:[#allocation6 + $0xd8] sm:$0xf0]  ;;  %v111_v32 = vld [vmem:[#allocation3 + $0x90] sm:$0xff]  ;;  %v3563_v37 = vpack.c.bf16 %v114_v31, %v110_v30  ;;  %v3178_v40 = vld [vmem:[#allocation6 + $0x144] sm:$0xf] }
  0x39   :  { %1072 = vmatpush.bf16.msrb.mxu2 %v2945_v44  ;;  %861 = vmatmul.bf16.vlgmr.msra.gmra.mxu3 %v3543_v57  ;;  %v2865_v27 = vor.u32 %v3164_v25, %v2862_v26  ;;  %v115_v33 = vld [vmem:[#allocation3 + $0xb0] sm:$0xff]  ;;  %v112_v34 = vld [vmem:[#allocation3 + $0x98] sm:$0xff]  ;;  %v2918_v41 = vld [vmem:[#allocation6 + $0x148] sm:$0xf0] }
  0x3a   :  { %1145 = vmatpush.bf16.msrb.mxu3 %v3009_v49  ;;  %v116_v35 = vld [vmem:[#allocation3 + $0xb8] sm:$0xff]  ;;  %v3565_v38 = vpack.c.bf16 %v115_v33, %v111_v32  ;;  %v2921_v42 = vor.u32 %v3178_v40, %v2918_v41  ;;  %v117_v43 = vld [vmem:[#allocation3 + $0xc0] sm:$0xff]  ;;  %v118_v45 = vld [vmem:[#allocation3 + $0xc8] sm:$0xff] }
  0x3b   :  { %927 = vmatpush.bf16.msrb.mxu0 %v2809_v1  ;;  %v3567_v39 = vpack.c.bf16 %v116_v35, %v112_v34  ;;  %v121_v44 = vld [vmem:[#allocation3 + $0xe0] sm:$0xff]  ;;  %v122_v46 = vld [vmem:[#allocation3 + $0xe8] sm:$0xff]  ;;  %v119_v47 = vld [vmem:[#allocation3 + $0xd0] sm:$0xff] }
  0x3c   :  { %1000 = vmatpush.bf16.msrb.mxu1 %v2873_v3  ;;  %v123_v49 = vld [vmem:[#allocation3 + $0xf0] sm:$0xff]  ;;  %v120_v50 = vld [vmem:[#allocation3 + $0xd8] sm:$0xff]  ;;  %v3573_v52 = vpack.c.bf16 %v121_v44, %v117_v43  ;;  %v3575_v55 = vpack.c.bf16 %v122_v46, %v118_v45  ;;  %v3194_v59 = vld [vmem:[#allocation6 + $0x1c4] sm:$0xf] }
  0x3d   :  { %1073 = vmatpush.bf16.msrb.mxu2 %v2937_v60  ;;  %v124_v51 = vld [vmem:[#allocation3 + $0xf8] sm:$0xff]  ;;  %v3577_v56 = vpack.c.bf16 %v123_v49, %v119_v47  ;;  %v2982_v60 = vld [vmem:[#allocation6 + $0x1c8] sm:$0xf0]  ;;  %v3162_v0 = vld [vmem:[#allocation6 + $0xc4] sm:$0xf] }
  0x3e   :  { %1146 = vmatpush.bf16.msrb.mxu3 %v3001_v61  ;;  %v3579_v58 = vpack.c.bf16 %v124_v51, %v120_v50  ;;  %v3146_v61 = vld [vmem:[#allocation6 + $0x44] sm:$0xf]  ;;  %v2985_v62 = vor.u32 %v3194_v59, %v2982_v60  ;;  %v2790_v63 = vld [vmem:[#allocation6 + $0x48] sm:$0xf0]  ;;  %v127_v8 = vld [vmem:[#allocation3 + $0x110] sm:$0xff] }
  0x3f   :  { %928 = vmatpush.bf16.msrb.mxu0 %v2801_v24  ;;  %v2854_v1 = vld [vmem:[#allocation6 + $0xc8] sm:$0xf0]  ;;  %v2793_v2 = vor.u32 %v3146_v61, %v2790_v63  ;;  %v125_v4 = vld [vmem:[#allocation3 + $0x100] sm:$0xff]  ;;  %v131_v9 = vld [vmem:[#allocation3 + $0x130] sm:$0xff] }
  0x40   :  { %1001 = vmatpush.bf16.msrb.mxu1 %v2865_v27  ;;  %v2857_v3 = vor.u32 %v3162_v0, %v2854_v1  ;;  %v129_v5 = vld [vmem:[#allocation3 + $0x120] sm:$0xff]  ;;  %v126_v6 = vld [vmem:[#allocation3 + $0x108] sm:$0xff]  ;;  %v128_v10 = vld [vmem:[#allocation3 + $0x118] sm:$0xff]  ;;  %v3589_v18 = vpack.c.bf16 %v131_v9, %v127_v8 }
  0x41   :  { %1074 = vmatpush.bf16.msrb.mxu2 %v2929_v19  ;;  %v130_v7 = vld [vmem:[#allocation3 + $0x128] sm:$0xff]  ;;  %v132_v11 = vld [vmem:[#allocation3 + $0x138] sm:$0xff]  ;;  %v3585_v16 = vpack.c.bf16 %v129_v5, %v125_v4  ;;  %v3176_v20 = vld [vmem:[#allocation6 + $0x134] sm:$0xf] }
  0x42   :  { %1147 = vmatpush.bf16.msrb.mxu3 %v2993_v23  ;;  %v3587_v17 = vpack.c.bf16 %v130_v7, %v126_v6  ;;  %v3591_v19 = vpack.c.bf16 %v132_v11, %v128_v10  ;;  %v2910_v21 = vld [vmem:[#allocation6 + $0x138] sm:$0xf0]  ;;  %v3192_v22 = vld [vmem:[#allocation6 + $0x1b4] sm:$0xf]  ;;  %v133_v29 = vld [vmem:[#allocation3 + $0x140] sm:$0xff] }
  0x43   :  { %929 = vmatpush.bf16.msrb.mxu0 %v2793_v2  ;;  %v2913_v23 = vor.u32 %v3176_v20, %v2910_v21  ;;  %v2974_v24 = vld [vmem:[#allocation6 + $0x1b8] sm:$0xf0]  ;;  %v3144_v25 = vld [vmem:[#allocation6 + $0x34] sm:$0xf]  ;;  %v137_v30 = vld [vmem:[#allocation3 + $0x160] sm:$0xff] }
  0x44   :  { %1002 = vmatpush.bf16.msrb.mxu1 %v2857_v3  ;;  %v2782_v26 = vld [vmem:[#allocation6 + $0x38] sm:$0xf0]  ;;  %v2977_v27 = vor.u32 %v3192_v22, %v2974_v24  ;;  %v134_v31 = vld [vmem:[#allocation3 + $0x148] sm:$0xff]  ;;  %v135_v33 = vld [vmem:[#allocation3 + $0x150] sm:$0xff]  ;;  %v3597_v41 = vpack.c.bf16 %v137_v30, %v133_v29 }
  0x45   :  { %1075 = vmatpush.bf16.msrb.mxu2 %v2921_v42  ;;  %v2785_v28 = vor.u32 %v3144_v25, %v2782_v26  ;;  %v138_v32 = vld [vmem:[#allocation3 + $0x168] sm:$0xff]  ;;  %v139_v34 = vld [vmem:[#allocation3 + $0x170] sm:$0xff]  ;;  %v136_v35 = vld [vmem:[#allocation3 + $0x158] sm:$0xff] }
  0x46   :  { %647 = vmatmul.bf16.gmra.mxu0 %v3549_v12  ;;  %1148 = vmatpush.bf16.msrb.mxu3 %v2985_v62  ;;  %v140_v40 = vld [vmem:[#allocation3 + $0x178] sm:$0xff]  ;;  %v3599_v42 = vpack.c.bf16 %v138_v32, %v134_v31  ;;  %v3601_v43 = vpack.c.bf16 %v139_v34, %v135_v33  ;;  %v3160_v45 = vld [vmem:[#allocation6 + $0xb4] sm:$0xf]  ;;  %v141_v49 = vld [vmem:[#allocation3 + $0x180] sm:$0xff] }
  0x47   :  { %720 = vmatmul.bf16.gmra.mxu1 %v3551_v13  ;;  %930 = vmatpush.bf16.msrb.mxu0 %v2785_v28  ;;  %v3603_v44 = vpack.c.bf16 %v140_v40, %v136_v35  ;;  %v2846_v46 = vld [vmem:[#allocation6 + $0xb8] sm:$0xf0]  ;;  %v145_v50 = vld [vmem:[#allocation3 + $0x1a0] sm:$0xff]  ;;  %v142_v51 = vld [vmem:[#allocation3 + $0x188] sm:$0xff] }
  0x48   :  { %793 = vmatmul.bf16.gmra.mxu2 %v3553_v14  ;;  %v2849_v47 = vor.u32 %v3160_v45, %v2846_v46  ;;  %v146_v59 = vld [vmem:[#allocation3 + $0x1a8] sm:$0xff]  ;;  %v143_v60 = vld [vmem:[#allocation3 + $0x190] sm:$0xff]  ;;  %v144_v62 = vld [vmem:[#allocation3 + $0x198] sm:$0xff]  ;;  %v3609_v0 = vpack.c.bf16 %v145_v50, %v141_v49 }
  0x49   :  { %866 = vmatmul.bf16.gmra.mxu3 %v3555_v15  ;;  %1076 = vmatpush.bf16.msrb.mxu2 %v2913_v23  ;;  %v147_v61 = vld [vmem:[#allocation3 + $0x1b0] sm:$0xff]  ;;  %v148_v63 = vld [vmem:[#allocation3 + $0x1b8] sm:$0xff]  ;;  %v3611_v1 = vpack.c.bf16 %v146_v59, %v142_v51  ;;  %v3174_v4 = vld [vmem:[#allocation6 + $0x124] sm:$0xf] }
  0x4a   :  { %1149 = vmatpush.bf16.msrb.mxu3 %v2977_v27  ;;  %1003 = vmatpush.bf16.msrb.mxu1 %v2849_v47  ;;  %v3613_v2 = vpack.c.bf16 %v147_v61, %v143_v60  ;;  %v3615_v3 = vpack.c.bf16 %v148_v63, %v144_v62  ;;  %v2902_v5 = vld [vmem:[#allocation6 + $0x128] sm:$0xf0]  ;;  %v149_v7 = vld [vmem:[#allocation3 + $0x1c0] sm:$0xff]  ;;  %v151_v11 = vld [vmem:[#allocation3 + $0x1d0] sm:$0xff] }
  0x4b   :  { %v2905_v6 = vor.u32 %v3174_v4, %v2902_v5  ;;  %v153_v8 = vld [vmem:[#allocation3 + $0x1e0] sm:$0xff]  ;;  %v150_v9 = vld [vmem:[#allocation3 + $0x1c8] sm:$0xff]  ;;  %v155_v20 = vld [vmem:[#allocation3 + $0x1f0] sm:$0xff] }
  0x4c   :  { %v154_v10 = vld [vmem:[#allocation3 + $0x1e8] sm:$0xff]  ;;  %v3190_v21 = vld [vmem:[#allocation6 + $0x1a4] sm:$0xf]  ;;  %v152_v28 = vld [vmem:[#allocation3 + $0x1d8] sm:$0xff]  ;;  %v3621_v32 = vpack.c.bf16 %v153_v8, %v149_v7  ;;  %v3625_v34 = vpack.c.bf16 %v155_v20, %v151_v11 }
  0x4d   :  { %1077 = vmatpush.bf16.msrb.mxu2 %v2905_v6  ;;  %v2966_v22 = vld [vmem:[#allocation6 + $0x1a8] sm:$0xf0]  ;;  %v3142_v23 = vld [vmem:[#allocation6 + $0x24] sm:$0xf]  ;;  %v156_v29 = vld [vmem:[#allocation3 + $0x1f8] sm:$0xff]  ;;  %v3623_v33 = vpack.c.bf16 %v154_v10, %v150_v9 }
  0x4e   :  { %v2969_v24 = vor.u32 %v3190_v21, %v2966_v22  ;;  %v2774_v25 = vld [vmem:[#allocation6 + $0x28] sm:$0xf0]  ;;  %v3158_v26 = vld [vmem:[#allocation6 + $0xa4] sm:$0xf]  ;;  %v3627_v35 = vpack.c.bf16 %v156_v29, %v152_v28  ;;  %v3636_v40 = vld [vmem:[%s4182_s2] sm:$0x3] }
  0x4f   :  { %v2838_v27 = vld [vmem:[#allocation6 + $0xa8] sm:$0xf0]  ;;  %v2777_v30 = vor.u32 %v3142_v23, %v2774_v25  ;;  %v157_v45 = vld [vmem:[#allocation3 + $0x200] sm:$0xff]  ;;  %v3639_v49 = vperm.slane %v3636_v40, 0  ;;  %v159_v51 = vld [vmem:[#allocation3 + $0x210] sm:$0xff] }
  0x50   :  { %v2841_v31 = vor.u32 %v3158_v26, %v2838_v27  ;;  %1150 = vmatpush.bf16.msrb.mxu3 %v2969_v24  ;;  %v161_v46 = vld [vmem:[#allocation3 + $0x220] sm:$0xff]  ;;  %v158_v47 = vld [vmem:[#allocation3 + $0x208] sm:$0xff]  ;;  %v163_v59 = vld [vmem:[#allocation3 + $0x230] sm:$0xff] }
  0x51   :  { %931 = vmatpush.bf16.msrb.mxu0 %v2777_v30  ;;  %v162_v50 = vld [vmem:[#allocation3 + $0x228] sm:$0xff]  ;;  %v160_v60 = vld [vmem:[#allocation3 + $0x218] sm:$0xff]  ;;  %v3641_v62 = vpack.c.bf16 %v161_v46, %v157_v45  ;;  %v3645_v5 = vpack.c.bf16 %v163_v59, %v159_v51  ;;  %v3172_v10 = vld [vmem:[#allocation6 + $0x114] sm:$0xf] }
  0x52   :  { %1004 = vmatpush.bf16.msrb.mxu1 %v2841_v31  ;;  %v164_v61 = vld [vmem:[#allocation3 + $0x238] sm:$0xff]  ;;  %v3643_v4 = vpack.c.bf16 %v162_v50, %v158_v47  ;;  %v3188_v20 = vld [vmem:[#allocation6 + $0x194] sm:$0xf]  ;;  %v165_v50 = vld [vmem:[#allocation3 + $0x240] sm:$0xff] }
  0x53   :  { %v3648_v8 = vpack.c.bf16 %v164_v61, %v160_v60  ;;  %v2894_v11 = vld [vmem:[#allocation6 + $0x118] sm:$0xf0]  ;;  %v3140_v24 = vld [vmem:[#allocation6 + $0x14] sm:$0xf]  ;;  %v169_v51 = vld [vmem:[#allocation3 + $0x260] sm:$0xff] }
  0x54   :  { %v2897_v21 = vor.u32 %v3172_v10, %v2894_v11  ;;  %v2958_v22 = vld [vmem:[#allocation6 + $0x198] sm:$0xf0]  ;;  %v166_v59 = vld [vmem:[#allocation3 + $0x248] sm:$0xff]  ;;  %v3156_v60 = vld [vmem:[#allocation6 + $0x94] sm:$0xf] }
  0x55   :  { %v2961_v23 = vor.u32 %v3188_v20, %v2958_v22  ;;  %v2766_v25 = vld [vmem:[#allocation6 + $0x18] sm:$0xf0] }
  0x56   :  { %652 = vmatmul.bf16.gmra.mxu0 %v3561_v36  ;;  %1078 = vmatpush.bf16.msrb.mxu2 %v2897_v21  ;;  %v2769_v27 = vor.u32 %v3140_v24, %v2766_v25  ;;  %v2830_v61 = vld [vmem:[#allocation6 + $0x98] sm:$0xf0]  ;;  %v3655_v21 = vpack.c.bf16 %v169_v51, %v165_v50 }
  0x57   :  { %725 = vmatmul.bf16.gmra.mxu1 %v3563_v37  ;;  %1151 = vmatpush.bf16.msrb.mxu3 %v2961_v23  ;;  %v2833_v10 = vor.u32 %v3156_v60, %v2830_v61  ;;  %v168_v11 = vld [vmem:[#allocation3 + $0x258] sm:$0xff] }
  0x58   :  { %798 = vmatmul.bf16.gmra.mxu2 %v3565_v38  ;;  %932 = vmatpush.bf16.msrb.mxu0 %v2769_v27  ;;  %4201 = vst [vmem:[#allocation16_spill] sm:$0xff] %v3655_v21 }
  0x59   :  { %871 = vmatmul.bf16.gmra.mxu3 %v3567_v39  ;;  %1005 = vmatpush.bf16.msrb.mxu1 %v2833_v10  ;;  %v173_v10 = vld [vmem:[#allocation3 + $0x280] sm:$0xff] }
  0x66   :  { %657 = vmatmul.bf16.gmra.mxu0 %v3573_v52 }
  0x67   :  { %730 = vmatmul.bf16.gmra.mxu1 %v3575_v55 }
  0x68   :  { %803 = vmatmul.bf16.gmra.mxu2 %v3577_v56 }
  0x69   :  { %876 = vmatmul.bf16.gmra.mxu3 %v3579_v58 }
  0x76   :  { %662 = vmatmul.bf16.gmra.mxu0 %v3585_v16 }
  0x77   :  { %735 = vmatmul.bf16.gmra.mxu1 %v3587_v17 }
  0x78   :  { %808 = vmatmul.bf16.gmra.mxu2 %v3589_v18 }
  0x79   :  { %881 = vmatmul.bf16.gmra.mxu3 %v3591_v19 }
  0x86   :  { %667 = vmatmul.bf16.gmra.mxu0 %v3597_v41 }
  0x87   :  { %740 = vmatmul.bf16.gmra.mxu1 %v3599_v42 }
  0x88   :  { %813 = vmatmul.bf16.gmra.mxu2 %v3601_v43 }
  0x89   :  { %886 = vmatmul.bf16.gmra.mxu3 %v3603_v44 }
  0x96   :  { %672 = vmatmul.bf16.gmra.mxu0 %v3609_v0 }
  0x97   :  { %745 = vmatmul.bf16.gmra.mxu1 %v3611_v1 }
  0x98   :  { %818 = vmatmul.bf16.gmra.mxu2 %v3613_v2 }
  0x99   :  { %891 = vmatmul.bf16.gmra.mxu3 %v3615_v3 }
  0xa6   :  { %677 = vmatmul.bf16.gmra.mxu0 %v3621_v32 }
  0xa7   :  { %750 = vmatmul.bf16.gmra.mxu1 %v3623_v33 }
  0xa8   :  { %823 = vmatmul.bf16.gmra.mxu2 %v3625_v34 }
  0xa9   :  { %896 = vmatmul.bf16.gmra.mxu3 %v3627_v35 }
  0xb3   :  { %v643_v63 = vpop.f32.mrf.mxu0 }
  0xb4   :  { %v644_v6 = vadd.f32 %v643_v63, %v3639_v49  ;;  %v716_v7 = vpop.f32.mrf.mxu1  ;;  %v170_v63 = vld [vmem:[#allocation3 + $0x268] sm:$0xff] }
  0xb5   :  { %v3657_v25 = vpack.c.bf16 %v170_v63, %v166_v59 }
  0xb6   :  { %v717_v9 = vadd.f32 %v716_v7, %v644_v6  ;;  %682 = vmatmul.bf16.gmra.mxu0 %v3641_v62  ;;  %v167_v6 = vld [vmem:[#allocation3 + $0x250] sm:$0xff] }
  0xb7   :  { %755 = vmatmul.bf16.gmra.mxu1 %v3643_v4  ;;  %v171_v7 = vld [vmem:[#allocation3 + $0x270] sm:$0xff]  ;;  %4202 = vst [vmem:[#allocation17_spill] sm:$0xff] %v3657_v25 }
  0xb8   :  { %828 = vmatmul.bf16.gmra.mxu2 %v3645_v5 }
  0xb9   :  { %901 = vmatmul.bf16.gmra.mxu3 %v3648_v8 }
  0xbb   :  { %v789_v26 = vpop.f32.mrf.mxu2  ;;  %v645_v30 = vpop.f32.mrf.mxu0 }
  0xbc   :  { %v790_v28 = vadd.f32 %v789_v26, %v717_v9  ;;  %v862_v29 = vpop.f32.mrf.mxu3  ;;  %v646_v31 = vadd.f32 %v645_v30, %v3639_v49  ;;  %v718_v45 = vpop.f32.mrf.mxu1  ;;  %v172_v9 = vld [vmem:[#allocation3 + $0x278] sm:$0xff]  ;;  %v3659_v26 = vpack.c.bf16 %v171_v7, %v167_v6 }
  0xbe   :  { %v863_v46 = vadd.f32 %v862_v29, %v790_v28  ;;  %v719_v47 = vadd.f32 %v718_v45, %v646_v31  ;;  %4203 = vst [vmem:[#allocation18_spill] sm:$0xff] %v3659_v26  ;;  %v3662_v29 = vpack.c.bf16 %v172_v9, %v168_v11  ;;  %v174_v9 = vld [vmem:[#allocation3 + $0x288] sm:$0xff] }
  0xc0   :  { %4204 = vst [vmem:[#allocation19_spill] sm:$0xff] %v3662_v29  ;;  %v1218_v45 = vmax.f32 %v863_v46, 0.0  ;;  %v177_v46 = vld [vmem:[#allocation3 + $0x2a0] sm:$0xff] }
  0xc3   :  { %v791_v20 = vpop.f32.mrf.mxu2  ;;  %v648_v24 = vpop.f32.mrf.mxu0 }
  0xc4   :  { %v792_v22 = vadd.f32 %v791_v20, %v719_v47  ;;  %v864_v23 = vpop.f32.mrf.mxu3  ;;  %v649_v27 = vadd.f32 %v648_v24, %v3639_v49  ;;  %v721_v28 = vpop.f32.mrf.mxu1  ;;  %v178_v20 = vld [vmem:[#allocation3 + $0x2a8] sm:$0xff] }
  0xc5   :  { %v2886_v24 = vld [vmem:[#allocation6 + $0x108] sm:$0xf0] }
  0xc6   :  { %v865_v30 = vadd.f32 %v864_v23, %v792_v22  ;;  %v722_v31 = vadd.f32 %v721_v28, %v649_v27  ;;  %687 = vmatmul.bf16.gmra.mxu0 %v3655_v21  ;;  %v175_v22 = vld [vmem:[#allocation3 + $0x290] sm:$0xff]  ;;  %v3170_v23 = vld [vmem:[#allocation6 + $0x104] sm:$0xf] }
  0xc7   :  { %760 = vmatmul.bf16.gmra.mxu1 %v3657_v25  ;;  %v179_v27 = vld [vmem:[#allocation3 + $0x2b0] sm:$0xff]  ;;  %v2889_v28 = vor.u32 %v3170_v23, %v2886_v24 }
  0xc8   :  { %v1220_v50 = vmax.f32 %v865_v30, 0.0  ;;  %833 = vmatmul.bf16.gmra.mxu2 %v3659_v26  ;;  %v3186_v30 = vld [vmem:[#allocation6 + $0x184] sm:$0xf] }
  0xc9   :  { %906 = vmatmul.bf16.gmra.mxu3 %v3662_v29  ;;  %v3671_v29 = vpack.c.bf16 %v177_v46, %v173_v10  ;;  %1079 = vmatpush.bf16.msrb.mxu2 %v2889_v28 }
  0xca   :  { %v3668_v47 = vpack.c.bf16 %v1220_v50, %v1218_v45  ;;  %v2950_v45 = vld [vmem:[#allocation6 + $0x188] sm:$0xf0]  ;;  %v176_v50 = vld [vmem:[#allocation3 + $0x298] sm:$0xff] }
  0xcb   :  { %v794_v51 = vpop.f32.mrf.mxu2  ;;  %v650_v61 = vpop.f32.mrf.mxu0 }
  0xcc   :  { %4205 = vst [vmem:[#allocation20_spill] sm:$0xff] %v3668_v47  ;;  %v795_v59 = vadd.f32 %v794_v51, %v722_v31  ;;  %v867_v60 = vpop.f32.mrf.mxu3  ;;  %v651_v63 = vadd.f32 %v650_v61, %v3639_v49  ;;  %v723_v6 = vpop.f32.mrf.mxu1  ;;  %v180_v31 = vld [vmem:[#allocation3 + $0x2b8] sm:$0xff]  ;;  %v2953_v51 = vor.u32 %v3186_v30, %v2950_v45 }
  0xcd   :  { %v3678_v24 = vpack.c.bf16 %v180_v31, %v176_v50 }
  0xce   :  { %v868_v7 = vadd.f32 %v867_v60, %v795_v59  ;;  %v724_v11 = vadd.f32 %v723_v6, %v651_v63  ;;  %v3673_v63 = vpack.c.bf16 %v178_v20, %v174_v9  ;;  %v3675_v6 = vpack.c.bf16 %v179_v27, %v175_v22  ;;  %1152 = vmatpush.bf16.msrb.mxu3 %v2953_v51  ;;  %v3154_v20 = vld [vmem:[#allocation6 + $0x84] sm:$0xf]  ;;  %v2822_v22 = vld [vmem:[#allocation6 + $0x88] sm:$0xf0] }
  0xcf   :  { %4207 = vst [vmem:[#allocation22_spill] sm:$0xff] %v3678_v24  ;;  %v2825_v27 = vor.u32 %v3154_v20, %v2822_v22  ;;  %v184_v20 = vld [vmem:[#allocation3 + $0x2d8] sm:$0xff] }
  0xd0   :  { %4206 = vst [vmem:[#allocation21_spill] sm:$0xff] %v3675_v6  ;;  %v1222_v10 = vmax.f32 %v868_v7, 0.0 }
  0xd1   :  { %1006 = vmatpush.bf16.msrb.mxu1 %v2825_v27 }
  0xd3   :  { %v796_v47 = vpop.f32.mrf.mxu2  ;;  %v653_v61 = vpop.f32.mrf.mxu0 }
  0xd4   :  { %v797_v59 = vadd.f32 %v796_v47, %v724_v11  ;;  %v869_v60 = vpop.f32.mrf.mxu3  ;;  %v654_v26 = vadd.f32 %v653_v61, %v3639_v49  ;;  %v726_v23 = vpop.f32.mrf.mxu1  ;;  %v3138_v47 = vld [vmem:[#allocation6 + $0x4] sm:$0xf]  ;;  %v2758_v11 = vld [vmem:[#allocation6 + $0x8] sm:$0xf0] }
  0xd5   :  { %v2761_v9 = vor.u32 %v3138_v47, %v2758_v11  ;;  %v182_v61 = vld [vmem:[#allocation3 + $0x2c8] sm:$0xff]  ;;  %v183_v47 = vld [vmem:[#allocation3 + $0x2d0] sm:$0xff] }
  0xd6   :  { %v870_v25 = vadd.f32 %v869_v60, %v797_v59  ;;  %v727_v21 = vadd.f32 %v726_v23, %v654_v26  ;;  %692 = vmatmul.bf16.gmra.mxu0 %v3671_v29  ;;  %v181_v59 = vld [vmem:[#allocation3 + $0x2c0] sm:$0xff]  ;;  %v186_v23 = vld [vmem:[#allocation3 + $0x2e8] sm:$0xff]  ;;  %v187_v11 = vld [vmem:[#allocation3 + $0x2f0] sm:$0xff] }
  0xd7   :  { %765 = vmatmul.bf16.gmra.mxu1 %v3673_v63  ;;  %933 = vmatpush.bf16.msrb.mxu0 %v2761_v9  ;;  %v185_v60 = vld [vmem:[#allocation3 + $0x2e0] sm:$0xff]  ;;  %v3689_v27 = vpack.c.bf16 %v186_v23, %v182_v61  ;;  %v3134_v23 = vld [vmem:[#allocation8 + $0xf8] sm:$0xf0] }
  0xd8   :  { %v1224_v46 = vmax.f32 %v870_v25, 0.0  ;;  %838 = vmatmul.bf16.gmra.mxu2 %v3675_v6  ;;  %v3687_v22 = vpack.c.bf16 %v185_v60, %v181_v59  ;;  %v3070_v59 = vld [vmem:[#allocation8 + $0x78] sm:$0xf0]  ;;  %v3232_v60 = vld [vmem:[#allocation8 + $0xf4] sm:$0xf] }
  0xd9   :  { %911 = vmatmul.bf16.gmra.mxu3 %v3678_v24 }
  0xda   :  { %v3684_v28 = vpack.c.bf16 %v1224_v46, %v1222_v10  ;;  %v188_v10 = vld [vmem:[#allocation3 + $0x2f8] sm:$0xff] }
  0xdb   :  { %v799_v30 = vpop.f32.mrf.mxu2  ;;  %v655_v7 = vpop.f32.mrf.mxu0 }
  0xdc   :  { %4208 = vst [vmem:[#allocation23_spill] sm:$0xff] %v3684_v28  ;;  %v800_v26 = vadd.f32 %v799_v30, %v727_v21  ;;  %v872_v45 = vpop.f32.mrf.mxu3  ;;  %v656_v25 = vadd.f32 %v655_v7, %v3639_v49  ;;  %v728_v50 = vpop.f32.mrf.mxu1  ;;  %v3691_v7 = vpack.c.bf16 %v187_v11, %v183_v47 }
  0xde   :  { %v873_v31 = vadd.f32 %v872_v45, %v800_v26  ;;  %v729_v51 = vadd.f32 %v728_v50, %v656_v25  ;;  %4209 = vst [vmem:[#allocation24_spill] sm:$0xff] %v3691_v7  ;;  %v3694_v25 = vpack.c.bf16 %v188_v10, %v184_v20  ;;  %v3137_v20 = vor.u32 %v3232_v60, %v3134_v23 }
  0xe0   :  { %4210 = vst [vmem:[#allocation25_spill] sm:$0xff] %v3694_v25  ;;  %v1226_v24 = vmax.f32 %v873_v31, 0.0  ;;  %1710 = vmatpush.bf16.msra.mxu3 %v3137_v20 }
  0xe3   :  { %v801_v46 = vpop.f32.mrf.mxu2  ;;  %v658_v30 = vpop.f32.mrf.mxu0 }
  0xe4   :  { %v802_v21 = vadd.f32 %v801_v46, %v729_v51  ;;  %v874_v9 = vpop.f32.mrf.mxu3  ;;  %v659_v26 = vadd.f32 %v658_v30, %v3639_v49  ;;  %v731_v45 = vpop.f32.mrf.mxu1  ;;  %v3216_v51 = vld [vmem:[#allocation8 + $0x74] sm:$0xf] }
  0xe5   :  { %v3073_v61 = vor.u32 %v3216_v51, %v3070_v59  ;;  %v191_v51 = vld [vmem:[#allocation3 + $0x310] sm:$0xff] }
  0xe6   :  { %v875_v50 = vadd.f32 %v874_v9, %v802_v21  ;;  %v732_v28 = vadd.f32 %v731_v45, %v659_v26  ;;  %697 = vmatmul.bf16.gmra.mxu0 %v3687_v22  ;;  %v189_v45 = vld [vmem:[#allocation3 + $0x300] sm:$0xff] }
  0xe7   :  { %770 = vmatmul.bf16.gmra.mxu1 %v3689_v27  ;;  %1637 = vmatpush.bf16.msra.mxu2 %v3073_v61  ;;  %v3703_v23 = vpack.c.bf16 %v189_v45, %v189_v45 }
  0xe8   :  { %v1228_v6 = vmax.f32 %v875_v50, 0.0  ;;  %843 = vmatmul.bf16.gmra.mxu2 %v3691_v7  ;;  %v190_v50 = vld [vmem:[#allocation3 + $0x308] sm:$0xff]  ;;  %v3217_v7 = vld [vmem:[#allocation8 + $0x74] sm:$0xf0] }
  0xe9   :  { %916 = vmatmul.bf16.gmra.mxu3 %v3694_v25  ;;  %v3068_v25 = vld [vmem:[#allocation8 + $0x70] sm:$0xf]  ;;  %v3705_v20 = vpack.c.bf16 %v190_v50, %v190_v50 }
  0xea   :  { %v3700_v47 = vpack.c.bf16 %v1228_v6, %v1226_v24  ;;  %v3069_v59 = vor.u32 %v3217_v7, %v3068_v25  ;;  %v3132_v6 = vld [vmem:[#allocation8 + $0xf0] sm:$0xf]  ;;  %v3233_v24 = vld [vmem:[#allocation8 + $0xf4] sm:$0xf0] }
  0xeb   :  { %v804_v11 = vpop.f32.mrf.mxu2  ;;  %v660_v21 = vpop.f32.mrf.mxu0  ;;  %v3133_v60 = vor.u32 %v3233_v24, %v3132_v6 }
  0xec   :  { %4211 = vst [vmem:[#allocation26_spill] sm:$0xff] %v3700_v47  ;;  %v805_v10 = vadd.f32 %v804_v11, %v732_v28  ;;  %v877_v46 = vpop.f32.mrf.mxu3  ;;  %v661_v31 = vadd.f32 %v660_v21, %v3639_v49  ;;  %v733_v9 = vpop.f32.mrf.mxu1  ;;  %v192_v47 = vld [vmem:[#allocation3 + $0x318] sm:$0xff]  ;;  %1491 = vmatpush.bf16.msra.mxu0 %v3069_v59 }
  0xed   :  { %1564 = vmatpush.bf16.msra.mxu1 %v3133_v60  ;;  %v3710_v7 = vpack.c.bf16 %v192_v47, %v192_v47 }
  0xee   :  { %v878_v30 = vadd.f32 %v877_v46, %v805_v10  ;;  %v734_v26 = vadd.f32 %v733_v9, %v661_v31  ;;  %v3707_v10 = vpack.c.bf16 %v191_v51, %v191_v51 }
  0xf0   :  { %4212 = vst [vmem:[#allocation27_spill] sm:$0xff] %v3707_v10  ;;  %v1230_v45 = vmax.f32 %v878_v30, 0.0  ;;  %v3062_v30 = vld [vmem:[#allocation8 + $0x68] sm:$0xf0] }
  0xf3   :  { %v806_v28 = vpop.f32.mrf.mxu2  ;;  %v663_v21 = vpop.f32.mrf.mxu0 }
  0xf4   :  { %v807_v61 = vadd.f32 %v806_v28, %v734_v26  ;;  %v879_v11 = vpop.f32.mrf.mxu3  ;;  %v664_v46 = vadd.f32 %v663_v21, %v3639_v49  ;;  %v736_v31 = vpop.f32.mrf.mxu1 }
  0xf6   :  { %v880_v25 = vadd.f32 %v879_v11, %v807_v61  ;;  %v737_v9 = vadd.f32 %v736_v31, %v664_v46  ;;  %702 = vmatmul.bf16.gmra.mxu0 %v3703_v23  ;;  %v3214_v11 = vld [vmem:[#allocation8 + $0x64] sm:$0xf] }
  0xf7   :  { %775 = vmatmul.bf16.gmra.mxu1 %v3705_v20  ;;  %v3065_v21 = vor.u32 %v3214_v11, %v3062_v30  ;;  %v3124_v11 = vld [vmem:[#allocation8 + $0xe0] sm:$0xf]  ;;  %v3231_v30 = vld [vmem:[#allocation8 + $0xe4] sm:$0xf0] }
  0xf8   :  { %v1232_v6 = vmax.f32 %v880_v25, 0.0  ;;  %848 = vmatmul.bf16.gmra.mxu2 %v3707_v10 }
  0xf9   :  { %921 = vmatmul.bf16.gmra.mxu3 %v3710_v7  ;;  %1638 = vmatpush.bf16.msra.mxu2 %v3065_v21 }
  0xfa   :  { %v3716_v26 = vpack.c.bf16 %v1232_v6, %v1230_v45 }
  0xfb   :  { %v809_v50 = vpop.f32.mrf.mxu2  ;;  %v665_v24 = vpop.f32.mrf.mxu0 }
  0xfc   :  { %4213 = vst [vmem:[#allocation28_spill] sm:$0xff] %v3716_v26  ;;  %v810_v51 = vadd.f32 %v809_v50, %v737_v9  ;;  %v882_v59 = vpop.f32.mrf.mxu3  ;;  %v666_v47 = vadd.f32 %v665_v24, %v3639_v49  ;;  %v738_v60 = vpop.f32.mrf.mxu1 }
  0xfe   :  { %v883_v28 = vadd.f32 %v882_v59, %v810_v51  ;;  %v739_v61 = vadd.f32 %v738_v60, %v666_v47  ;;  %v3230_v51 = vld [vmem:[#allocation8 + $0xe4] sm:$0xf]  ;;  %v3126_v59 = vld [vmem:[#allocation8 + $0xe8] sm:$0xf0]  ;;  %v3060_v60 = vld [vmem:[#allocation8 + $0x60] sm:$0xf] }
  0xff   :  { %v3129_v47 = vor.u32 %v3230_v51, %v3126_v59 }
 0x100   :  { %v1234_v50 = vmax.f32 %v883_v28, 0.0 }
 0x101   :  { %1711 = vmatpush.bf16.msra.mxu3 %v3129_v47 }
 0x103   :  { %v811_v46 = vpop.f32.mrf.mxu2  ;;  %v668_v10 = vpop.f32.mrf.mxu0 }
 0x104   :  { %v812_v31 = vadd.f32 %v811_v46, %v739_v61  ;;  %v884_v25 = vpop.f32.mrf.mxu3  ;;  %v669_v45 = vadd.f32 %v668_v10, %v3639_v49  ;;  %v741_v6 = vpop.f32.mrf.mxu1  ;;  %v3215_v61 = vld [vmem:[#allocation8 + $0x64] sm:$0xf0] }
 0x105   :  { %v3061_v10 = vor.u32 %v3215_v61, %v3060_v60 }
 0x106   :  { %v885_v26 = vadd.f32 %v884_v25, %v812_v31  ;;  %v742_v9 = vadd.f32 %v741_v6, %v669_v45  ;;  %934 = vmatmul.bf16.vlgmr.msrb.gmra.mxu0 %v3537_v48  ;;  %v3125_v48 = vor.u32 %v3231_v30, %v3124_v11 }
 0x107   :  { %1007 = vmatmul.bf16.vlgmr.msrb.gmra.mxu1 %v3539_v53  ;;  %1492 = vmatpush.bf16.msra.mxu0 %v3061_v10 }
 0x108   :  { %v1236_v24 = vmax.f32 %v885_v26, 0.0  ;;  %1080 = vmatmul.bf16.vlgmr.msrb.gmra.mxu2 %v3541_v54  ;;  %1565 = vmatpush.bf16.msra.mxu1 %v3125_v48 }
 0x109   :  { %1153 = vmatmul.bf16.vlgmr.msrb.gmra.mxu3 %v3543_v57 }
 0x10a   :  { %v3724_v21 = vpack.c.bf16 %v1236_v24, %v1234_v50 }
 0x10b   :  { %v814_v46 = vpop.f32.mrf.mxu2  ;;  %v670_v53 = vpop.f32.mrf.mxu0 }
 0x10c   :  { %v815_v26 = vadd.f32 %v814_v46, %v742_v9  ;;  %v887_v28 = vpop.f32.mrf.mxu3  ;;  %v671_v54 = vadd.f32 %v670_v53, %v3639_v49  ;;  %v743_v31 = vpop.f32.mrf.mxu1 }
 0x10e   :  { %v888_v57 = vadd.f32 %v887_v28, %v815_v26  ;;  %v744_v25 = vadd.f32 %v743_v31, %v671_v54  ;;  %v3054_v31 = vld [vmem:[#allocation8 + $0x58] sm:$0xf0] }
 0x110   :  { %v1238_v9 = vmax.f32 %v888_v57, 0.0 }
 0x113   :  { %v816_v45 = vpop.f32.mrf.mxu2  ;;  %v673_v59 = vpop.f32.mrf.mxu0 }
 0x114   :  { %v817_v6 = vadd.f32 %v816_v45, %v744_v25  ;;  %v889_v51 = vpop.f32.mrf.mxu3  ;;  %v674_v50 = vadd.f32 %v673_v59, %v3639_v49  ;;  %v746_v24 = vpop.f32.mrf.mxu1  ;;  %v3228_v25 = vld [vmem:[#allocation8 + $0xd4] sm:$0xf]  ;;  %v3052_v45 = vld [vmem:[#allocation8 + $0x50] sm:$0xf] }
 0x116   :  { %v890_v60 = vadd.f32 %v889_v51, %v817_v6  ;;  %v747_v47 = vadd.f32 %v746_v24, %v674_v50  ;;  %939 = vmatmul.bf16.gmra.mxu0 %v3549_v12  ;;  %v3212_v12 = vld [vmem:[#allocation8 + $0x54] sm:$0xf]  ;;  %v3213_v6 = vld [vmem:[#allocation8 + $0x54] sm:$0xf0] }
 0x117   :  { %1012 = vmatmul.bf16.gmra.mxu1 %v3551_v13  ;;  %v3057_v57 = vor.u32 %v3212_v12, %v3054_v31  ;;  %v3118_v13 = vld [vmem:[#allocation8 + $0xd8] sm:$0xf0]  ;;  %v3053_v51 = vor.u32 %v3213_v6, %v3052_v45 }
 0x118   :  { %v1240_v61 = vmax.f32 %v890_v60, 0.0  ;;  %1085 = vmatmul.bf16.gmra.mxu2 %v3553_v14  ;;  %v3121_v14 = vor.u32 %v3228_v25, %v3118_v13 }
 0x119   :  { %1158 = vmatmul.bf16.gmra.mxu3 %v3555_v15  ;;  %1639 = vmatpush.bf16.msra.mxu2 %v3057_v57 }
 0x11a   :  { %v3732_v11 = vpack.c.bf16 %v1240_v61, %v1238_v9  ;;  %1712 = vmatpush.bf16.msra.mxu3 %v3121_v14  ;;  %1493 = vmatpush.bf16.msra.mxu0 %v3053_v51 }
 0x11b   :  { %v819_v10 = vpop.f32.mrf.mxu2  ;;  %v675_v48 = vpop.f32.mrf.mxu0 }
 0x11c   :  { %v820_v30 = vadd.f32 %v819_v10, %v747_v47  ;;  %v892_v46 = vpop.f32.mrf.mxu3  ;;  %v676_v26 = vadd.f32 %v675_v48, %v3639_v49  ;;  %v748_v28 = vpop.f32.mrf.mxu1  ;;  %v3229_v48 = vld [vmem:[#allocation8 + $0xd4] sm:$0xf0] }
 0x11e   :  { %v893_v53 = vadd.f32 %v892_v46, %v820_v30  ;;  %v749_v54 = vadd.f32 %v748_v28, %v676_v26  ;;  %v3116_v46 = vld [vmem:[#allocation8 + $0xd0] sm:$0xf] }
 0x11f   :  { %v3117_v26 = vor.u32 %v3229_v48, %v3116_v46 }
 0x120   :  { %v1242_v10 = vmax.f32 %v893_v53, 0.0 }
 0x121   :  { %1566 = vmatpush.bf16.msra.mxu1 %v3117_v26 }
 0x123   :  { %v821_v15 = vpop.f32.mrf.mxu2  ;;  %v678_v24 = vpop.f32.mrf.mxu0 }
 0x124   :  { %v822_v59 = vadd.f32 %v821_v15, %v749_v54  ;;  %v894_v50 = vpop.f32.mrf.mxu3  ;;  %v679_v60 = vadd.f32 %v678_v24, %v3639_v49  ;;  %v751_v47 = vpop.f32.mrf.mxu1  ;;  %v3210_v24 = vld [vmem:[#allocation8 + $0x44] sm:$0xf] }
 0x126   :  { %v895_v9 = vadd.f32 %v894_v50, %v822_v59  ;;  %v752_v61 = vadd.f32 %v751_v47, %v679_v60  ;;  %944 = vmatmul.bf16.gmra.mxu0 %v3561_v36  ;;  %v3046_v60 = vld [vmem:[#allocation8 + $0x48] sm:$0xf0] }
 0x127   :  { %1017 = vmatmul.bf16.gmra.mxu1 %v3563_v37  ;;  %v3049_v47 = vor.u32 %v3210_v24, %v3046_v60 }
 0x128   :  { %v1244_v30 = vmax.f32 %v895_v9, 0.0  ;;  %1090 = vmatmul.bf16.gmra.mxu2 %v3565_v38  ;;  %v3226_v9 = vld [vmem:[#allocation8 + $0xc4] sm:$0xf] }
 0x129   :  { %1163 = vmatmul.bf16.gmra.mxu3 %v3567_v39  ;;  %1640 = vmatpush.bf16.msra.mxu2 %v3049_v47 }
 0x12a   :  { %v3740_v28 = vpack.c.bf16 %v1244_v30, %v1242_v10 }
 0x12b   :  { %v824_v54 = vpop.f32.mrf.mxu2  ;;  %v680_v57 = vpop.f32.mrf.mxu0 }
 0x12c   :  { %v825_v12 = vadd.f32 %v824_v54, %v752_v61  ;;  %v897_v31 = vpop.f32.mrf.mxu3  ;;  %v681_v36 = vadd.f32 %v680_v57, %v3639_v49  ;;  %v753_v53 = vpop.f32.mrf.mxu1  ;;  %v3110_v61 = vld [vmem:[#allocation8 + $0xc8] sm:$0xf0]  ;;  %v3211_v57 = vld [vmem:[#allocation8 + $0x44] sm:$0xf0] }
 0x12d   :  { %v3113_v10 = vor.u32 %v3226_v9, %v3110_v61 }
 0x12e   :  { %v898_v25 = vadd.f32 %v897_v31, %v825_v12  ;;  %v754_v13 = vadd.f32 %v753_v53, %v681_v36  ;;  %v3044_v31 = vld [vmem:[#allocation8 + $0x40] sm:$0xf]  ;;  %v3227_v53 = vld [vmem:[#allocation8 + $0xc4] sm:$0xf0] }
 0x12f   :  { %1713 = vmatpush.bf16.msra.mxu3 %v3113_v10  ;;  %v3108_v36 = vld [vmem:[#allocation8 + $0xc0] sm:$0xf] }
 0x130   :  { %v1246_v59 = vmax.f32 %v898_v25, 0.0  ;;  %v3109_v25 = vor.u32 %v3227_v53, %v3108_v36 }
 0x132   :  { %1567 = vmatpush.bf16.msra.mxu1 %v3109_v25 }
 0x133   :  { %v826_v37 = vpop.f32.mrf.mxu2  ;;  %v683_v14 = vpop.f32.mrf.mxu0 }
 0x134   :  { %v827_v45 = vadd.f32 %v826_v37, %v754_v13  ;;  %v899_v38 = vpop.f32.mrf.mxu3  ;;  %v684_v6 = vadd.f32 %v683_v14, %v3639_v49  ;;  %v756_v39 = vpop.f32.mrf.mxu1 }
 0x136   :  { %v900_v15 = vadd.f32 %v899_v38, %v827_v45  ;;  %v757_v51 = vadd.f32 %v756_v39, %v684_v6  ;;  %949 = vmatmul.bf16.gmra.mxu0 %v3573_v52 }
 0x137   :  { %1022 = vmatmul.bf16.gmra.mxu1 %v3575_v55 }
 0x138   :  { %v1248_v50 = vmax.f32 %v900_v15, 0.0  ;;  %1095 = vmatmul.bf16.gmra.mxu2 %v3577_v56 }
 0x139   :  { %1168 = vmatmul.bf16.gmra.mxu3 %v3579_v58  ;;  %v3045_v58 = vor.u32 %v3211_v57, %v3044_v31 }
 0x13a   :  { %v3748_v30 = vpack.c.bf16 %v1248_v50, %v1246_v59 }
 0x13b   :  { %v829_v46 = vpop.f32.mrf.mxu2  ;;  %v685_v26 = vpop.f32.mrf.mxu0  ;;  %1494 = vmatpush.bf16.msra.mxu0 %v3045_v58 }
 0x13c   :  { %v830_v48 = vadd.f32 %v829_v46, %v757_v51  ;;  %v902_v52 = vpop.f32.mrf.mxu3  ;;  %v686_v55 = vadd.f32 %v685_v26, %v3639_v49  ;;  %v758_v54 = vpop.f32.mrf.mxu1 }
 0x13e   :  { %v903_v56 = vadd.f32 %v902_v52, %v830_v48  ;;  %v759_v12 = vadd.f32 %v758_v54, %v686_v55  ;;  %v3038_v52 = vld [vmem:[#allocation8 + $0x38] sm:$0xf0]  ;;  %v3224_v55 = vld [vmem:[#allocation8 + $0xb4] sm:$0xf] }
 0x140   :  { %v1250_v51 = vmax.f32 %v903_v56, 0.0 }
 0x143   :  { %v831_v13 = vpop.f32.mrf.mxu2  ;;  %v688_v38 = vpop.f32.mrf.mxu0 }
 0x144   :  { %v832_v37 = vadd.f32 %v831_v13, %v759_v12  ;;  %v904_v45 = vpop.f32.mrf.mxu3  ;;  %v689_v14 = vadd.f32 %v688_v38, %v3639_v49  ;;  %v761_v6 = vpop.f32.mrf.mxu1  ;;  %v3036_v13 = vld [vmem:[#allocation8 + $0x30] sm:$0xf] }
 0x145   :  { %v3100_v38 = vld [vmem:[#allocation8 + $0xb0] sm:$0xf] }
 0x146   :  { %v905_v39 = vadd.f32 %v904_v45, %v832_v37  ;;  %v762_v15 = vadd.f32 %v761_v6, %v689_v14  ;;  %954 = vmatmul.bf16.gmra.mxu0 %v3585_v16  ;;  %v3208_v16 = vld [vmem:[#allocation8 + $0x34] sm:$0xf]  ;;  %v3209_v37 = vld [vmem:[#allocation8 + $0x34] sm:$0xf0] }
 0x147   :  { %1027 = vmatmul.bf16.gmra.mxu1 %v3587_v17  ;;  %v3041_v26 = vor.u32 %v3208_v16, %v3038_v52  ;;  %v3102_v17 = vld [vmem:[#allocation8 + $0xb8] sm:$0xf0]  ;;  %v3037_v45 = vor.u32 %v3209_v37, %v3036_v13  ;;  %v3225_v14 = vld [vmem:[#allocation8 + $0xb4] sm:$0xf0]  ;;  %v3092_v13 = vld [vmem:[#allocation8 + $0xa0] sm:$0xf] }
 0x148   :  { %v1252_v59 = vmax.f32 %v905_v39, 0.0  ;;  %1100 = vmatmul.bf16.gmra.mxu2 %v3589_v18  ;;  %v3105_v54 = vor.u32 %v3224_v55, %v3102_v17  ;;  %v3101_v6 = vor.u32 %v3225_v14, %v3100_v38  ;;  %v3206_v55 = vld [vmem:[#allocation8 + $0x24] sm:$0xf]  ;;  %v3030_v17 = vld [vmem:[#allocation8 + $0x28] sm:$0xf0] }
 0x149   :  { %1173 = vmatmul.bf16.gmra.mxu3 %v3591_v19  ;;  %1641 = vmatpush.bf16.msra.mxu2 %v3041_v26 }
 0x14a   :  { %v3756_v50 = vpack.c.bf16 %v1252_v59, %v1250_v51  ;;  %1714 = vmatpush.bf16.msra.mxu3 %v3105_v54  ;;  %1495 = vmatpush.bf16.msra.mxu0 %v3037_v45  ;;  %v3033_v54 = vor.u32 %v3206_v55, %v3030_v17  ;;  %v3223_v45 = vld [vmem:[#allocation8 + $0xa4] sm:$0xf0]  ;;  %v3022_v55 = vld [vmem:[#allocation8 + $0x18] sm:$0xf0]  ;;  %v3220_v17 = vld [vmem:[#allocation8 + $0x94] sm:$0xf] }
 0x14b   :  { %v834_v24 = vpop.f32.mrf.mxu2  ;;  %v690_v9 = vpop.f32.mrf.mxu0  ;;  %1568 = vmatpush.bf16.msra.mxu1 %v3101_v6  ;;  %v3093_v14 = vor.u32 %v3223_v45, %v3092_v13 }
 0x14c   :  { %v835_v60 = vadd.f32 %v834_v24, %v762_v15  ;;  %v907_v47 = vpop.f32.mrf.mxu3  ;;  %v691_v61 = vadd.f32 %v690_v9, %v3639_v49  ;;  %v763_v10 = vpop.f32.mrf.mxu1 }
 0x14d   :  { %1642 = vmatpush.bf16.msra.mxu2 %v3033_v54  ;;  %v3086_v54 = vld [vmem:[#allocation8 + $0x98] sm:$0xf0] }
 0x14e   :  { %v908_v46 = vadd.f32 %v907_v47, %v835_v60  ;;  %v764_v48 = vadd.f32 %v763_v10, %v691_v61 }
 0x14f   :  { %1569 = vmatpush.bf16.msra.mxu1 %v3093_v14 }
 0x150   :  { %v1254_v53 = vmax.f32 %v908_v46, 0.0 }
 0x153   :  { %v836_v18 = vpop.f32.mrf.mxu2  ;;  %v693_v12 = vpop.f32.mrf.mxu0 }
 0x154   :  { %v837_v19 = vadd.f32 %v836_v18, %v764_v48  ;;  %v909_v56 = vpop.f32.mrf.mxu3  ;;  %v694_v31 = vadd.f32 %v693_v12, %v3639_v49  ;;  %v766_v57 = vpop.f32.mrf.mxu1 }
 0x156   :  { %v910_v58 = vadd.f32 %v909_v56, %v837_v19  ;;  %v767_v36 = vadd.f32 %v766_v57, %v694_v31  ;;  %959 = vmatmul.bf16.gmra.mxu0 %v3597_v41 }
 0x157   :  { %1032 = vmatmul.bf16.gmra.mxu1 %v3599_v42 }
 0x158   :  { %v1256_v25 = vmax.f32 %v910_v58, 0.0  ;;  %1105 = vmatmul.bf16.gmra.mxu2 %v3601_v43 }
 0x159   :  { %1178 = vmatmul.bf16.gmra.mxu3 %v3603_v44 }
 0x15a   :  { %v3764_v39 = vpack.c.bf16 %v1256_v25, %v1254_v53  ;;  %v3094_v53 = vld [vmem:[#allocation8 + $0xa8] sm:$0xf0]  ;;  %v3028_v25 = vld [vmem:[#allocation8 + $0x20] sm:$0xf] }
 0x15b   :  { %v839_v15 = vpop.f32.mrf.mxu2  ;;  %v695_v59 = vpop.f32.mrf.mxu0 }
 0x15c   :  { %v840_v51 = vadd.f32 %v839_v15, %v767_v36  ;;  %v912_v41 = vpop.f32.mrf.mxu3  ;;  %v696_v42 = vadd.f32 %v695_v59, %v3639_v49  ;;  %v768_v24 = vpop.f32.mrf.mxu1 }
 0x15e   :  { %v913_v43 = vadd.f32 %v912_v41, %v840_v51  ;;  %v769_v60 = vadd.f32 %v768_v24, %v696_v42 }
 0x160   :  { %v1258_v52 = vmax.f32 %v913_v43, 0.0 }
 0x163   :  { %v841_v47 = vpop.f32.mrf.mxu2  ;;  %v698_v61 = vpop.f32.mrf.mxu0 }
 0x164   :  { %v842_v9 = vadd.f32 %v841_v47, %v769_v60  ;;  %v914_v44 = vpop.f32.mrf.mxu3  ;;  %v699_v10 = vadd.f32 %v698_v61, %v3639_v49  ;;  %v771_v46 = vpop.f32.mrf.mxu1 }
 0x166   :  { %v915_v48 = vadd.f32 %v914_v44, %v842_v9  ;;  %v772_v16 = vadd.f32 %v771_v46, %v699_v10  ;;  %964 = vmatmul.bf16.gmra.mxu0 %v3609_v0 }
 0x167   :  { %1037 = vmatmul.bf16.gmra.mxu1 %v3611_v1  ;;  %v3222_v1 = vld [vmem:[#allocation8 + $0xa4] sm:$0xf] }
 0x168   :  { %v1260_v26 = vmax.f32 %v915_v48, 0.0  ;;  %1110 = vmatmul.bf16.gmra.mxu2 %v3613_v2  ;;  %v3097_v2 = vor.u32 %v3222_v1, %v3094_v53  ;;  %v3785_v48 = vperm.slane %v3636_v40, 1  ;;  %v3084_v1 = vld [vmem:[#allocation8 + $0x90] sm:$0xf]  ;;  %v3221_v53 = vld [vmem:[#allocation8 + $0x94] sm:$0xf0] }
 0x169   :  { %1183 = vmatmul.bf16.gmra.mxu3 %v3615_v3  ;;  %v3207_v3 = vld [vmem:[#allocation8 + $0x24] sm:$0xf0] }
 0x16a   :  { %v3772_v18 = vpack.c.bf16 %v1260_v26, %v1258_v52  ;;  %v3029_v37 = vor.u32 %v3207_v3, %v3028_v25  ;;  %1715 = vmatpush.bf16.msra.mxu3 %v3097_v2 }
 0x16b   :  { %v844_v19 = vpop.f32.mrf.mxu2  ;;  %v700_v31 = vpop.f32.mrf.mxu0 }
 0x16c   :  { %v845_v56 = vadd.f32 %v844_v19, %v772_v16  ;;  %v917_v12 = vpop.f32.mrf.mxu3  ;;  %v701_v0 = vadd.f32 %v700_v31, %v3639_v49  ;;  %v773_v57 = vpop.f32.mrf.mxu1  ;;  %1496 = vmatpush.bf16.msra.mxu0 %v3029_v37  ;;  %v3020_v19 = vld [vmem:[#allocation8 + $0x10] sm:$0xf] }
 0x16e   :  { %v918_v58 = vadd.f32 %v917_v12, %v845_v56  ;;  %v774_v36 = vadd.f32 %v773_v57, %v701_v0  ;;  %v3205_v56 = vld [vmem:[#allocation8 + $0x14] sm:$0xf0]  ;;  %v3089_v12 = vor.u32 %v3220_v17, %v3086_v54 }
 0x16f   :  { %v3021_v31 = vor.u32 %v3205_v56, %v3020_v19 }
 0x170   :  { %v1262_v43 = vmax.f32 %v918_v58, 0.0  ;;  %1716 = vmatpush.bf16.msra.mxu3 %v3089_v12 }
 0x171   :  { %1497 = vmatpush.bf16.msra.mxu0 %v3021_v31 }
 0x173   :  { %v846_v38 = vpop.f32.mrf.mxu2  ;;  %v703_v51 = vpop.f32.mrf.mxu0 }
 0x174   :  { %v847_v6 = vadd.f32 %v846_v38, %v774_v36  ;;  %v919_v15 = vpop.f32.mrf.mxu3  ;;  %v704_v41 = vadd.f32 %v703_v51, %v3639_v49  ;;  %v776_v59 = vpop.f32.mrf.mxu1 }
 0x176   :  { %v920_v42 = vadd.f32 %v919_v15, %v847_v6  ;;  %v777_v24 = vadd.f32 %v776_v59, %v704_v41  ;;  %969 = vmatmul.bf16.gmra.mxu0 %v3621_v32  ;;  %v4214_v15 = vld [vmem:[#allocation16_spill] sm:$0xff]  ;;  %v4215_v59 = vld [vmem:[#allocation17_spill] sm:$0xff] }
 0x177   :  { %1042 = vmatmul.bf16.gmra.mxu1 %v3623_v33 }
 0x178   :  { %v1264_v60 = vmax.f32 %v920_v42, 0.0  ;;  %1115 = vmatmul.bf16.gmra.mxu2 %v3625_v34  ;;  %v4216_v42 = vld [vmem:[#allocation18_spill] sm:$0xff] }
 0x179   :  { %1188 = vmatmul.bf16.gmra.mxu3 %v3627_v35  ;;  %v3204_v35 = vld [vmem:[#allocation8 + $0x14] sm:$0xf] }
 0x17a   :  { %v3780_v47 = vpack.c.bf16 %v1264_v60, %v1262_v43  ;;  %v3025_v40 = vor.u32 %v3204_v35, %v3022_v55 }
 0x17b   :  { %v849_v9 = vpop.f32.mrf.mxu2  ;;  %v705_v49 = vpop.f32.mrf.mxu0 }
 0x17c   :  { %v850_v44 = vadd.f32 %v849_v9, %v777_v24  ;;  %v922_v61 = vpop.f32.mrf.mxu3  ;;  %v778_v10 = vpop.f32.mrf.mxu1  ;;  %1643 = vmatpush.bf16.msra.mxu2 %v3025_v40  ;;  %v4217_v24 = vld [vmem:[#allocation19_spill] sm:$0xff] }
 0x17e   :  { %v3782_v46 = vadd.f32 %v922_v61, %v850_v44 }
 0x183   :  { %v851_v32 = vpop.f32.mrf.mxu2  ;;  %v935_v52 = vpop.f32.mrf.mxu0 }
 0x184   :  { %v924_v16 = vpop.f32.mrf.mxu3  ;;  %v936_v33 = vadd.f32 %v935_v52, %v3785_v48  ;;  %v1008_v34 = vpop.f32.mrf.mxu1  ;;  %v3014_v52 = vld [vmem:[#allocation8 + $0x8] sm:$0xf0] }
 0x185   :  { %v3202_v16 = vld [vmem:[#allocation8 + $0x4] sm:$0xf] }
 0x186   :  { %v1009_v26 = vadd.f32 %v1008_v34, %v936_v33  ;;  %974 = vmatmul.bf16.gmra.mxu0 %v3641_v62  ;;  %v3017_v33 = vor.u32 %v3202_v16, %v3014_v52  ;;  %v3218_v34 = vld [vmem:[#allocation8 + $0x84] sm:$0xf] }
 0x187   :  { %1047 = vmatmul.bf16.gmra.mxu1 %v3643_v4 }
 0x188   :  { %1120 = vmatmul.bf16.gmra.mxu2 %v3645_v5 }
 0x189   :  { %1193 = vmatmul.bf16.gmra.mxu3 %v3648_v8  ;;  %v3085_v8 = vor.u32 %v3221_v53, %v3084_v1  ;;  %1644 = vmatpush.bf16.msra.mxu2 %v3017_v33  ;;  %v3076_v53 = vld [vmem:[#allocation8 + $0x80] sm:$0xf] }
 0x18b   :  { %v1081_v0 = vpop.f32.mrf.mxu2  ;;  %v937_v62 = vpop.f32.mrf.mxu0  ;;  %1570 = vmatpush.bf16.msra.mxu1 %v3085_v8  ;;  %v3219_v8 = vld [vmem:[#allocation8 + $0x84] sm:$0xf0] }
 0x18c   :  { %v1082_v57 = vadd.f32 %v1081_v0, %v1009_v26  ;;  %v1154_v58 = vpop.f32.mrf.mxu3  ;;  %v1010_v4 = vpop.f32.mrf.mxu1  ;;  %v938_v36 = vadd.f32 %v937_v62, %v3785_v48  ;;  %v3078_v26 = vld [vmem:[#allocation8 + $0x88] sm:$0xf0] }
 0x18d   :  { %v3081_v55 = vor.u32 %v3218_v34, %v3078_v26  ;;  %v4218_v62 = vld [vmem:[#allocation21_spill] sm:$0xff] }
 0x18e   :  { %v1155_v5 = vadd.f32 %v1154_v58, %v1082_v57  ;;  %v1011_v2 = vadd.f32 %v1010_v4, %v938_v36  ;;  %v3012_v4 = vld [vmem:[#allocation8] sm:$0xf]  ;;  %v4219_v36 = vld [vmem:[#allocation22_spill] sm:$0xff] }
 0x18f   :  { %1717 = vmatpush.bf16.msra.mxu3 %v3081_v55 }
 0x190   :  { %v1219_v51 = vmax.f32 %v1155_v5, 0.0  ;;  %v3203_v5 = vld [vmem:[#allocation8 + $0x4] sm:$0xf0] }
 0x191   :  { %v3013_v1 = vor.u32 %v3203_v5, %v3012_v4 }
 0x193   :  { %v1083_v25 = vpop.f32.mrf.mxu2  ;;  %v940_v37 = vpop.f32.mrf.mxu0  ;;  %1498 = vmatpush.bf16.msra.mxu0 %v3013_v1 }
 0x194   :  { %v1084_v3 = vadd.f32 %v1083_v25, %v1011_v2  ;;  %v1156_v13 = vpop.f32.mrf.mxu3  ;;  %v941_v45 = vadd.f32 %v940_v37, %v3785_v48  ;;  %v1013_v38 = vpop.f32.mrf.mxu1  ;;  %v3077_v2 = vor.u32 %v3219_v8, %v3076_v53 }
 0x196   :  { %v1157_v14 = vadd.f32 %v1156_v13, %v1084_v3  ;;  %v1014_v6 = vadd.f32 %v1013_v38, %v941_v45  ;;  %979 = vmatmul.bf16.gmra.mxu0 %v4214_v15  ;;  %1571 = vmatpush.bf16.msra.mxu1 %v3077_v2 }
 0x197   :  { %1052 = vmatmul.bf16.gmra.mxu1 %v4215_v59 }
 0x198   :  { %v1221_v41 = vmax.f32 %v1157_v14, 0.0  ;;  %1125 = vmatmul.bf16.gmra.mxu2 %v4216_v42 }
 0x199   :  { %1198 = vmatmul.bf16.gmra.mxu3 %v4217_v24 }
 0x19a   :  { %v3798_v43 = vpack.c.bf16 %v1221_v41, %v1219_v51 }
 0x19b   :  { %v1086_v60 = vpop.f32.mrf.mxu2  ;;  %v942_v61 = vpop.f32.mrf.mxu0 }
 0x19c   :  { %v1087_v9 = vadd.f32 %v1086_v60, %v1014_v6  ;;  %v1159_v44 = vpop.f32.mrf.mxu3  ;;  %v1015_v49 = vpop.f32.mrf.mxu1  ;;  %v943_v32 = vadd.f32 %v942_v61, %v3785_v48  ;;  %v4220_v61 = vld [vmem:[#allocation24_spill] sm:$0xff] }
 0x19e   :  { %v1160_v10 = vadd.f32 %v1159_v44, %v1087_v9  ;;  %v1016_v35 = vadd.f32 %v1015_v49, %v943_v32  ;;  %v4221_v49 = vld [vmem:[#allocation25_spill] sm:$0xff] }
 0x1a0   :  { %v1223_v57 = vmax.f32 %v1160_v10, 0.0 }
 0x1a3   :  { %v1088_v17 = vpop.f32.mrf.mxu2  ;;  %v945_v19 = vpop.f32.mrf.mxu0 }
 0x1a4   :  { %v1089_v40 = vadd.f32 %v1088_v17, %v1016_v35  ;;  %v1161_v54 = vpop.f32.mrf.mxu3  ;;  %v946_v56 = vadd.f32 %v945_v19, %v3785_v48  ;;  %v1018_v12 = vpop.f32.mrf.mxu1 }
 0x1a6   :  { %v1162_v31 = vadd.f32 %v1161_v54, %v1089_v40  ;;  %v1019_v0 = vadd.f32 %v1018_v12, %v946_v56  ;;  %984 = vmatmul.bf16.gmra.mxu0 %v3671_v29 }
 0x1a7   :  { %1057 = vmatmul.bf16.gmra.mxu1 %v3673_v63 }
 0x1a8   :  { %v1225_v58 = vmax.f32 %v1162_v31, 0.0  ;;  %1130 = vmatmul.bf16.gmra.mxu2 %v4218_v62 }
 0x1a9   :  { %1203 = vmatmul.bf16.gmra.mxu3 %v4219_v36 }
 0x1aa   :  { %v3806_v25 = vpack.c.bf16 %v1225_v58, %v1223_v57  ;;  %v4222_v57 = vld [vmem:[#allocation27_spill] sm:$0xff] }
 0x1ab   :  { %v1091_v3 = vpop.f32.mrf.mxu2  ;;  %v947_v37 = vpop.f32.mrf.mxu0 }
 0x1ac   :  { %v1092_v13 = vadd.f32 %v1091_v3, %v1019_v0  ;;  %v1164_v29 = vpop.f32.mrf.mxu3  ;;  %v1020_v45 = vpop.f32.mrf.mxu1  ;;  %v948_v38 = vadd.f32 %v947_v37, %v3785_v48 }
 0x1ae   :  { %v1165_v63 = vadd.f32 %v1164_v29, %v1092_v13  ;;  %v1021_v14 = vadd.f32 %v1020_v45, %v948_v38 }
 0x1b0   :  { %v1227_v9 = vmax.f32 %v1165_v63, 0.0  ;;  %v4223_v63 = vld [vmem:[#allocation20_spill] sm:$0xff] }
 0x1b3   :  { %v1093_v6 = vpop.f32.mrf.mxu2  ;;  %v950_v41 = vpop.f32.mrf.mxu0 }
 0x1b4   :  { %v1094_v15 = vadd.f32 %v1093_v6, %v1021_v14  ;;  %v1166_v51 = vpop.f32.mrf.mxu3  ;;  %v951_v59 = vadd.f32 %v950_v41, %v3785_v48  ;;  %v1023_v42 = vpop.f32.mrf.mxu1 }
 0x1b6   :  { %v1167_v24 = vadd.f32 %v1166_v51, %v1094_v15  ;;  %v1024_v60 = vadd.f32 %v1023_v42, %v951_v59  ;;  %989 = vmatmul.bf16.gmra.mxu0 %v3687_v22 }
 0x1b7   :  { %1062 = vmatmul.bf16.gmra.mxu1 %v3689_v27 }
 0x1b8   :  { %v1229_v44 = vmax.f32 %v1167_v24, 0.0  ;;  %1135 = vmatmul.bf16.gmra.mxu2 %v4220_v61 }
 0x1b9   :  { %1208 = vmatmul.bf16.gmra.mxu3 %v4221_v49 }
 0x1ba   :  { %v3814_v10 = vpack.c.bf16 %v1229_v44, %v1227_v9 }
 0x1bb   :  { %v1096_v32 = vpop.f32.mrf.mxu2  ;;  %v952_v33 = vpop.f32.mrf.mxu0 }
 0x1bc   :  { %v1097_v16 = vadd.f32 %v1096_v32, %v1024_v60  ;;  %v1169_v52 = vpop.f32.mrf.mxu3  ;;  %v1025_v34 = vpop.f32.mrf.mxu1  ;;  %v953_v35 = vadd.f32 %v952_v33, %v3785_v48 }
 0x1be   :  { %v1170_v26 = vadd.f32 %v1169_v52, %v1097_v16  ;;  %v1026_v55 = vadd.f32 %v1025_v34, %v953_v35  ;;  %v4224_v34 = vld [vmem:[#allocation23_spill] sm:$0xff] }
 0x1c0   :  { %v1231_v31 = vmax.f32 %v1170_v26, 0.0 }
 0x1c3   :  { %v1098_v22 = vpop.f32.mrf.mxu2  ;;  %v955_v54 = vpop.f32.mrf.mxu0 }
 0x1c4   :  { %v1099_v17 = vadd.f32 %v1098_v22, %v1026_v55  ;;  %v1171_v40 = vpop.f32.mrf.mxu3  ;;  %v956_v27 = vadd.f32 %v955_v54, %v3785_v48  ;;  %v1028_v19 = vpop.f32.mrf.mxu1 }
 0x1c6   :  { %v1172_v56 = vadd.f32 %v1171_v40, %v1099_v17  ;;  %v1029_v12 = vadd.f32 %v1028_v19, %v956_v27  ;;  %994 = vmatmul.bf16.gmra.mxu0 %v3703_v23 }
 0x1c7   :  { %1067 = vmatmul.bf16.gmra.mxu1 %v3705_v20 }
 0x1c8   :  { %v1233_v0 = vmax.f32 %v1172_v56, 0.0  ;;  %1140 = vmatmul.bf16.gmra.mxu2 %v4222_v57 }
 0x1c9   :  { %1213 = vmatmul.bf16.gmra.mxu3 %v3710_v7 }
 0x1ca   :  { %v3822_v58 = vpack.c.bf16 %v1233_v0, %v1231_v31 }
 0x1cb   :  { %v1101_v62 = vpop.f32.mrf.mxu2  ;;  %v957_v36 = vpop.f32.mrf.mxu0 }
 0x1cc   :  { %v1102_v4 = vadd.f32 %v1101_v62, %v1029_v12  ;;  %v1174_v5 = vpop.f32.mrf.mxu3  ;;  %v1030_v1 = vpop.f32.mrf.mxu1  ;;  %v958_v8 = vadd.f32 %v957_v36, %v3785_v48 }
 0x1ce   :  { %v1175_v53 = vadd.f32 %v1174_v5, %v1102_v4  ;;  %v1031_v2 = vadd.f32 %v1030_v1, %v958_v8  ;;  %v4225_v1 = vld [vmem:[#allocation26_spill] sm:$0xff] }
 0x1d0   :  { %v1235_v38 = vmax.f32 %v1175_v53, 0.0 }
 0x1d3   :  { %v1103_v23 = vpop.f32.mrf.mxu2  ;;  %v960_v29 = vpop.f32.mrf.mxu0 }
 0x1d4   :  { %v1104_v3 = vadd.f32 %v1103_v23, %v1031_v2  ;;  %v1176_v13 = vpop.f32.mrf.mxu3  ;;  %v961_v20 = vadd.f32 %v960_v29, %v3785_v48  ;;  %v1033_v37 = vpop.f32.mrf.mxu1 }
 0x1d6   :  { %v1177_v45 = vadd.f32 %v1176_v13, %v1104_v3  ;;  %v1034_v7 = vadd.f32 %v1033_v37, %v961_v20  ;;  %1499 = vmatmul.bf16.vlgmr.msra.gmra.mxu0 %v4223_v63 }
 0x1d7   :  { %1572 = vmatmul.bf16.vlgmr.msra.gmra.mxu1 %v3798_v43 }
 0x1d8   :  { %v1237_v14 = vmax.f32 %v1177_v45, 0.0  ;;  %1645 = vmatmul.bf16.vlgmr.msra.gmra.mxu2 %v4223_v63 }
 0x1d9   :  { %1718 = vmatmul.bf16.vlgmr.msra.gmra.mxu3 %v3798_v43 }
 0x1da   :  { %v3830_v6 = vpack.c.bf16 %v1237_v14, %v1235_v38 }
 0x1db   :  { %v1106_v15 = vpop.f32.mrf.mxu2  ;;  %v962_v59 = vpop.f32.mrf.mxu0 }
 0x1dc   :  { %v1107_v51 = vadd.f32 %v1106_v15, %v1034_v7  ;;  %v1179_v41 = vpop.f32.mrf.mxu3  ;;  %v1035_v42 = vpop.f32.mrf.mxu1  ;;  %v963_v60 = vadd.f32 %v962_v59, %v3785_v48 }
 0x1de   :  { %v1180_v24 = vadd.f32 %v1179_v41, %v1107_v51  ;;  %v1036_v9 = vadd.f32 %v1035_v42, %v963_v60  ;;  %v4226_v42 = vld [vmem:[#allocation28_spill] sm:$0xff] }
 0x1e0   :  { %v1239_v26 = vmax.f32 %v1180_v24, 0.0 }
 0x1e3   :  { %v1108_v44 = vpop.f32.mrf.mxu2  ;;  %v965_v32 = vpop.f32.mrf.mxu0 }
 0x1e4   :  { %v1109_v61 = vadd.f32 %v1108_v44, %v1036_v9  ;;  %v1181_v49 = vpop.f32.mrf.mxu3  ;;  %v966_v16 = vadd.f32 %v965_v32, %v3785_v48  ;;  %v1038_v52 = vpop.f32.mrf.mxu1 }
 0x1e6   :  { %v1182_v33 = vadd.f32 %v1181_v49, %v1109_v61  ;;  %v1039_v43 = vadd.f32 %v1038_v52, %v966_v16  ;;  %1504 = vmatmul.bf16.gmra.mxu0 %v4224_v34 }
 0x1e7   :  { %1577 = vmatmul.bf16.gmra.mxu1 %v3806_v25 }
 0x1e8   :  { %v1241_v35 = vmax.f32 %v1182_v33, 0.0  ;;  %1650 = vmatmul.bf16.gmra.mxu2 %v4224_v34 }
 0x1e9   :  { %1723 = vmatmul.bf16.gmra.mxu3 %v3806_v25 }
 0x1ea   :  { %v3838_v55 = vpack.c.bf16 %v1241_v35, %v1239_v26 }
 0x1eb   :  { %v1111_v22 = vpop.f32.mrf.mxu2  ;;  %v967_v54 = vpop.f32.mrf.mxu0 }
 0x1ec   :  { %v1112_v17 = vadd.f32 %v1111_v22, %v1039_v43  ;;  %v1184_v40 = vpop.f32.mrf.mxu3  ;;  %v1040_v27 = vpop.f32.mrf.mxu1  ;;  %v968_v56 = vadd.f32 %v967_v54, %v3785_v48 }
 0x1ee   :  { %v1185_v19 = vadd.f32 %v1184_v40, %v1112_v17  ;;  %v1041_v12 = vadd.f32 %v1040_v27, %v968_v56 }
 0x1f0   :  { %v1243_v53 = vmax.f32 %v1185_v19, 0.0 }
 0x1f3   :  { %v1113_v31 = vpop.f32.mrf.mxu2  ;;  %v970_v62 = vpop.f32.mrf.mxu0 }
 0x1f4   :  { %v1114_v0 = vadd.f32 %v1113_v31, %v1041_v12  ;;  %v1186_v57 = vpop.f32.mrf.mxu3  ;;  %v971_v4 = vadd.f32 %v970_v62, %v3785_v48  ;;  %v1043_v5 = vpop.f32.mrf.mxu1 }
 0x1f6   :  { %v1187_v36 = vadd.f32 %v1186_v57, %v1114_v0  ;;  %v1044_v25 = vadd.f32 %v1043_v5, %v971_v4  ;;  %1509 = vmatmul.bf16.gmra.mxu0 %v4225_v1 }
 0x1f7   :  { %1582 = vmatmul.bf16.gmra.mxu1 %v3814_v10 }
 0x1f8   :  { %v1245_v8 = vmax.f32 %v1187_v36, 0.0  ;;  %1655 = vmatmul.bf16.gmra.mxu2 %v4225_v1 }
 0x1f9   :  { %1728 = vmatmul.bf16.gmra.mxu3 %v3814_v10 }
 0x1fa   :  { %v3846_v2 = vpack.c.bf16 %v1245_v8, %v1243_v53 }
 0x1fb   :  { %v1116_v23 = vpop.f32.mrf.mxu2  ;;  %v972_v29 = vpop.f32.mrf.mxu0 }
 0x1fc   :  { %v1117_v3 = vadd.f32 %v1116_v23, %v1044_v25  ;;  %v1189_v13 = vpop.f32.mrf.mxu3  ;;  %v1045_v20 = vpop.f32.mrf.mxu1  ;;  %v973_v45 = vadd.f32 %v972_v29, %v3785_v48 }
 0x1fe   :  { %v1190_v37 = vadd.f32 %v1189_v13, %v1117_v3  ;;  %v1046_v7 = vadd.f32 %v1045_v20, %v973_v45 }
 0x200   :  { %v1247_v24 = vmax.f32 %v1190_v37, 0.0 }
 0x203   :  { %v1118_v63 = vpop.f32.mrf.mxu2  ;;  %v975_v15 = vpop.f32.mrf.mxu0 }
 0x204   :  { %v1119_v38 = vadd.f32 %v1118_v63, %v1046_v7  ;;  %v1191_v14 = vpop.f32.mrf.mxu3  ;;  %v976_v51 = vadd.f32 %v975_v15, %v3785_v48  ;;  %v1048_v41 = vpop.f32.mrf.mxu1 }
 0x206   :  { %v1192_v59 = vadd.f32 %v1191_v14, %v1119_v38  ;;  %v1049_v10 = vadd.f32 %v1048_v41, %v976_v51  ;;  %1514 = vmatmul.bf16.gmra.mxu0 %v4226_v42 }
 0x207   :  { %1587 = vmatmul.bf16.gmra.mxu1 %v3822_v58 }
 0x208   :  { %v1249_v60 = vmax.f32 %v1192_v59, 0.0  ;;  %1660 = vmatmul.bf16.gmra.mxu2 %v4226_v42 }
 0x209   :  { %1733 = vmatmul.bf16.gmra.mxu3 %v3822_v58 }
 0x20a   :  { %v3854_v9 = vpack.c.bf16 %v1249_v60, %v1247_v24 }
 0x20b   :  { %v1121_v44 = vpop.f32.mrf.mxu2  ;;  %v977_v32 = vpop.f32.mrf.mxu0 }
 0x20c   :  { %v1122_v61 = vadd.f32 %v1121_v44, %v1049_v10  ;;  %v1194_v49 = vpop.f32.mrf.mxu3  ;;  %v1050_v16 = vpop.f32.mrf.mxu1  ;;  %v978_v33 = vadd.f32 %v977_v32, %v3785_v48 }
 0x20e   :  { %v1195_v52 = vadd.f32 %v1194_v49, %v1122_v61  ;;  %v1051_v43 = vadd.f32 %v1050_v16, %v978_v33 }
 0x210   :  { %v1251_v27 = vmax.f32 %v1195_v52, 0.0 }
 0x213   :  { %v1123_v34 = vpop.f32.mrf.mxu2  ;;  %v980_v22 = vpop.f32.mrf.mxu0 }
 0x214   :  { %v1124_v26 = vadd.f32 %v1123_v34, %v1051_v43  ;;  %v1196_v35 = vpop.f32.mrf.mxu3  ;;  %v981_v17 = vadd.f32 %v980_v22, %v3785_v48  ;;  %v1053_v40 = vpop.f32.mrf.mxu1 }
 0x216   :  { %v1197_v54 = vadd.f32 %v1196_v35, %v1124_v26  ;;  %v1054_v58 = vadd.f32 %v1053_v40, %v981_v17  ;;  %1519 = vmatmul.bf16.gmra.mxu0 %v3724_v21 }
 0x217   :  { %1592 = vmatmul.bf16.gmra.mxu1 %v3830_v6 }
 0x218   :  { %v1253_v19 = vmax.f32 %v1197_v54, 0.0  ;;  %1665 = vmatmul.bf16.gmra.mxu2 %v3724_v21 }
 0x219   :  { %1738 = vmatmul.bf16.gmra.mxu3 %v3830_v6 }
 0x21a   :  { %v3862_v56 = vpack.c.bf16 %v1253_v19, %v1251_v27 }
 0x21b   :  { %v1126_v12 = vpop.f32.mrf.mxu2  ;;  %v982_v57 = vpop.f32.mrf.mxu0 }
 0x21c   :  { %v1127_v31 = vadd.f32 %v1126_v12, %v1054_v58  ;;  %v1199_v0 = vpop.f32.mrf.mxu3  ;;  %v1055_v62 = vpop.f32.mrf.mxu1  ;;  %v983_v5 = vadd.f32 %v982_v57, %v3785_v48 }
 0x21e   :  { %v1200_v4 = vadd.f32 %v1199_v0, %v1127_v31  ;;  %v1056_v36 = vadd.f32 %v1055_v62, %v983_v5 }
 0x220   :  { %v1255_v13 = vmax.f32 %v1200_v4, 0.0 }
 0x223   :  { %v1128_v25 = vpop.f32.mrf.mxu2  ;;  %v985_v8 = vpop.f32.mrf.mxu0 }
 0x224   :  { %v1129_v1 = vadd.f32 %v1128_v25, %v1056_v36  ;;  %v1201_v53 = vpop.f32.mrf.mxu3  ;;  %v986_v23 = vadd.f32 %v985_v8, %v3785_v48  ;;  %v1058_v21 = vpop.f32.mrf.mxu1  ;;  %v90_v36 = vld [vmem:[#allocation9] sm:$0x3] }
 0x225   :  { %v3890_v25 = vperm.slane %v90_v36, 0 }
 0x226   :  { %v1202_v3 = vadd.f32 %v1201_v53, %v1129_v1  ;;  %v1059_v6 = vadd.f32 %v1058_v21, %v986_v23  ;;  %1524 = vmatmul.bf16.gmra.mxu0 %v3732_v11 }
 0x227   :  { %1597 = vmatmul.bf16.gmra.mxu1 %v3838_v55 }
 0x228   :  { %v1257_v29 = vmax.f32 %v1202_v3, 0.0  ;;  %1670 = vmatmul.bf16.gmra.mxu2 %v3732_v11  ;;  %v91_v3 = vld [vmem:[%s4185_s5] sm:$0x3] }
 0x229   :  { %1743 = vmatmul.bf16.gmra.mxu3 %v3838_v55 }
 0x22a   :  { %v3870_v20 = vpack.c.bf16 %v1257_v29, %v1255_v13 }
 0x22b   :  { %v1131_v37 = vpop.f32.mrf.mxu2  ;;  %v987_v63 = vpop.f32.mrf.mxu0 }
 0x22c   :  { %v1132_v45 = vadd.f32 %v1131_v37, %v1059_v6  ;;  %v1204_v7 = vpop.f32.mrf.mxu3  ;;  %v1060_v38 = vpop.f32.mrf.mxu1  ;;  %v988_v15 = vadd.f32 %v987_v63, %v3785_v48 }
 0x22e   :  { %v1205_v14 = vadd.f32 %v1204_v7, %v1132_v45  ;;  %v1061_v51 = vadd.f32 %v1060_v38, %v988_v15  ;;  %v3903_v7 = vperm.slane %v91_v3, 0 }
 0x230   :  { %v1259_v44 = vmax.f32 %v1205_v14, 0.0  ;;  %v3906_v14 = vperm.slane %v91_v3, 1 }
 0x233   :  { %v1133_v41 = vpop.f32.mrf.mxu2  ;;  %v990_v42 = vpop.f32.mrf.mxu0 }
 0x234   :  { %v1134_v59 = vadd.f32 %v1133_v41, %v1061_v51  ;;  %v1206_v10 = vpop.f32.mrf.mxu3  ;;  %v991_v24 = vadd.f32 %v990_v42, %v3785_v48  ;;  %v1063_v11 = vpop.f32.mrf.mxu1 }
 0x236   :  { %v1207_v60 = vadd.f32 %v1206_v10, %v1134_v59  ;;  %v1064_v55 = vadd.f32 %v1063_v11, %v991_v24  ;;  %1529 = vmatmul.bf16.gmra.mxu0 %v3740_v28 }
 0x237   :  { %1602 = vmatmul.bf16.gmra.mxu1 %v3846_v2 }
 0x238   :  { %v1261_v61 = vmax.f32 %v1207_v60, 0.0  ;;  %1675 = vmatmul.bf16.gmra.mxu2 %v3740_v28 }
 0x239   :  { %1748 = vmatmul.bf16.gmra.mxu3 %v3846_v2 }
 0x23a   :  { %v3878_v49 = vpack.c.bf16 %v1261_v61, %v1259_v44 }
 0x23b   :  { %v1136_v32 = vpop.f32.mrf.mxu2  ;;  %v992_v33 = vpop.f32.mrf.mxu0 }
 0x23c   :  { %v1137_v16 = vadd.f32 %v1136_v32, %v1064_v55  ;;  %v1209_v52 = vpop.f32.mrf.mxu3  ;;  %v1065_v43 = vpop.f32.mrf.mxu1  ;;  %v993_v26 = vadd.f32 %v992_v33, %v3785_v48 }
 0x23e   :  { %v1210_v34 = vadd.f32 %v1209_v52, %v1137_v16  ;;  %v1066_v35 = vadd.f32 %v1065_v43, %v993_v26 }
 0x240   :  { %v1263_v19 = vmax.f32 %v1210_v34, 0.0 }
 0x243   :  { %v1138_v22 = vpop.f32.mrf.mxu2  ;;  %v995_v54 = vpop.f32.mrf.mxu0 }
 0x244   :  { %v1139_v17 = vadd.f32 %v1138_v22, %v1066_v35  ;;  %v1211_v40 = vpop.f32.mrf.mxu3  ;;  %v996_v58 = vadd.f32 %v995_v54, %v3785_v48  ;;  %v1068_v28 = vpop.f32.mrf.mxu1 }
 0x246   :  { %v1212_v27 = vadd.f32 %v1211_v40, %v1139_v17  ;;  %v1069_v2 = vadd.f32 %v1068_v28, %v996_v58  ;;  %1534 = vmatmul.bf16.gmra.mxu0 %v3748_v30 }
 0x247   :  { %1607 = vmatmul.bf16.gmra.mxu1 %v3854_v9 }
 0x248   :  { %v1265_v12 = vmax.f32 %v1212_v27, 0.0  ;;  %1680 = vmatmul.bf16.gmra.mxu2 %v3748_v30 }
 0x249   :  { %1753 = vmatmul.bf16.gmra.mxu3 %v3854_v9  ;;  %v3896_v9 = vperm.slane %v90_v36, 1 }
 0x24a   :  { %v3886_v31 = vpack.c.bf16 %v1265_v12, %v1263_v19 }
 0x24b   :  { %v1141_v0 = vpop.f32.mrf.mxu2  ;;  %v997_v4 = vpop.f32.mrf.mxu0 }
 0x24c   :  { %v1142_v57 = vadd.f32 %v1141_v0, %v1069_v2  ;;  %v1214_v62 = vpop.f32.mrf.mxu3  ;;  %v1070_v48 = vpop.f32.mrf.mxu1 }
 0x24e   :  { %v3888_v5 = vadd.f32 %v1214_v62, %v1142_v57 }
 0x253   :  { %v1143_v1 = vpop.f32.mrf.mxu2  ;;  %v1500_v8 = vpop.f32.mrf.mxu0 }
 0x254   :  { %v1216_v53 = vpop.f32.mrf.mxu3  ;;  %v1573_v23 = vpop.f32.mrf.mxu1  ;;  %v1501_v30 = vadd.f32 %v1500_v8, %v3890_v25 }
 0x256   :  { %1539 = vmatmul.bf16.gmra.mxu0 %v3756_v50  ;;  %v1574_v21 = vadd.f32 %v1573_v23, %v1501_v30 }
 0x257   :  { %1612 = vmatmul.bf16.gmra.mxu1 %v3862_v56 }
 0x258   :  { %1685 = vmatmul.bf16.gmra.mxu2 %v3756_v50  ;;  %v1783_v63 = vmax.f32 %v1574_v21, 0.0 }
 0x259   :  { %1758 = vmatmul.bf16.gmra.mxu3 %v3862_v56 }
 0x25a   :  { %v1838_v51 = vmul.f32 %v3903_v7, %v1783_v63 }
 0x25b   :  { %v1646_v6 = vpop.f32.mrf.mxu2  ;;  %v1502_v37 = vpop.f32.mrf.mxu0 }
 0x25c   :  { %v1647_v13 = vadd.f32 %v1646_v6, %v3896_v9  ;;  %v1719_v29 = vpop.f32.mrf.mxu3  ;;  %v1575_v45 = vpop.f32.mrf.mxu1  ;;  %v1503_v50 = vadd.f32 %v1502_v37, %v3890_v25 }
 0x25e   :  { %v1720_v38 = vadd.f32 %v1719_v29, %v1647_v13  ;;  %v1576_v15 = vadd.f32 %v1575_v45, %v1503_v50 }
 0x260   :  { %v1784_v56 = vmax.f32 %v1720_v38, 0.0  ;;  %v1785_v55 = vmax.f32 %v1576_v15, 0.0 }
 0x262   :  { %v1839_v41 = vmul.f32 %v3906_v14, %v1784_v56  ;;  %v1840_v52 = vmul.f32 %v3903_v7, %v1785_v55 }
 0x263   :  { %v1648_v59 = vpop.f32.mrf.mxu2  ;;  %v1505_v24 = vpop.f32.mrf.mxu0 }
 0x264   :  { %v1649_v10 = vadd.f32 %v1648_v59, %v3896_v9  ;;  %v1721_v42 = vpop.f32.mrf.mxu3  ;;  %v1888_v11 = vadd.f32 %v1839_v41, %v1838_v51  ;;  %v1578_v60 = vpop.f32.mrf.mxu1  ;;  %v1506_v61 = vadd.f32 %v1505_v24, %v3890_v25 }
 0x266   :  { %v1722_v44 = vadd.f32 %v1721_v42, %v1649_v10  ;;  %1889 = vadd.xlane.f32.xlu0 %v1888_v11  ;;  %1544 = vmatmul.bf16.gmra.mxu0 %v3764_v39  ;;  %v1579_v16 = vadd.f32 %v1578_v60, %v1506_v61 }
 0x267   :  { %1617 = vmatmul.bf16.gmra.mxu1 %v3870_v20 }
 0x268   :  { %v1786_v32 = vmax.f32 %v1722_v44, 0.0  ;;  %1690 = vmatmul.bf16.gmra.mxu2 %v3764_v39  ;;  %v1787_v40 = vmax.f32 %v1579_v16, 0.0 }
 0x269   :  { %1763 = vmatmul.bf16.gmra.mxu3 %v3870_v20 }
 0x26a   :  { %v1841_v33 = vmul.f32 %v3906_v14, %v1786_v32  ;;  %v1842_v20 = vmul.f32 %v3903_v7, %v1787_v40 }
 0x26b   :  { %v1651_v43 = vpop.f32.mrf.mxu2  ;;  %v1507_v35 = vpop.f32.mrf.mxu0 }
 0x26c   :  { %v1652_v34 = vadd.f32 %v1651_v43, %v3896_v9  ;;  %v1724_v26 = vpop.f32.mrf.mxu3  ;;  %v1891_v22 = vadd.f32 %v1841_v33, %v1840_v52  ;;  %v1580_v17 = vpop.f32.mrf.mxu1  ;;  %v1508_v58 = vadd.f32 %v1507_v35, %v3890_v25 }
 0x26e   :  { %v1725_v54 = vadd.f32 %v1724_v26, %v1652_v34  ;;  %1892 = vadd.xlane.f32.xlu0 %v1891_v22  ;;  %v1581_v28 = vadd.f32 %v1580_v17, %v1508_v58  ;;  %v1267_v17 = vmax.f32 %v3888_v5, 0.0 }
 0x270   :  { %v1788_v39 = vmax.f32 %v1725_v54, 0.0  ;;  %v1789_v4 = vmax.f32 %v1581_v28, 0.0 }
 0x272   :  { %v1843_v27 = vmul.f32 %v3906_v14, %v1788_v39  ;;  %v1844_v53 = vmul.f32 %v3903_v7, %v1789_v4 }
 0x273   :  { %v1653_v2 = vpop.f32.mrf.mxu2  ;;  %v1510_v0 = vpop.f32.mrf.mxu0 }
 0x274   :  { %v1654_v19 = vadd.f32 %v1653_v2, %v3896_v9  ;;  %v1726_v12 = vpop.f32.mrf.mxu3  ;;  %v1894_v57 = vadd.f32 %v1843_v27, %v1842_v20  ;;  %v1583_v62 = vpop.f32.mrf.mxu1  ;;  %v1511_v36 = vadd.f32 %v1510_v0, %v3890_v25  ;;  %v1293_v0 = vpack.c.bf16 %v1267_v17, %v1267_v17 }
 0x276   :  { %v1727_v48 = vadd.f32 %v1726_v12, %v1654_v19  ;;  %1895 = vadd.xlane.f32.xlu1 %v1894_v57  ;;  %1549 = vmatmul.bf16.gmra.mxu0 %v3772_v18  ;;  %v1584_v23 = vadd.f32 %v1583_v62, %v1511_v36 }
 0x277   :  { %1622 = vmatmul.bf16.gmra.mxu1 %v3878_v49 }
 0x278   :  { %v1790_v1 = vmax.f32 %v1727_v48, 0.0  ;;  %1695 = vmatmul.bf16.gmra.mxu2 %v3772_v18  ;;  %v1791_v37 = vmax.f32 %v1584_v23, 0.0 }
 0x279   :  { %1768 = vmatmul.bf16.gmra.mxu3 %v3878_v49 }
 0x27a   :  { %v1845_v8 = vmul.f32 %v3906_v14, %v1790_v1  ;;  %v1846_v49 = vmul.f32 %v3903_v7, %v1791_v37 }
 0x27b   :  { %v1656_v30 = vpop.f32.mrf.mxu2  ;;  %v1512_v6 = vpop.f32.mrf.mxu0 }
 0x27c   :  { %v1657_v21 = vadd.f32 %v1656_v30, %v3896_v9  ;;  %v1729_v3 = vpop.f32.mrf.mxu3  ;;  %v1897_v13 = vadd.f32 %v1845_v8, %v1844_v53  ;;  %v1585_v29 = vpop.f32.mrf.mxu1  ;;  %v1513_v63 = vadd.f32 %v1512_v6, %v3890_v25 }
 0x27e   :  { %v1730_v45 = vadd.f32 %v1729_v3, %v1657_v21  ;;  %1898 = vadd.xlane.f32.xlu1 %v1897_v13  ;;  %v1586_v38 = vadd.f32 %v1585_v29, %v1513_v63 }
 0x280   :  { %v1792_v18 = vmax.f32 %v1730_v45, 0.0  ;;  %v1793_v42 = vmax.f32 %v1586_v38, 0.0 }
 0x282   :  { %v1847_v50 = vmul.f32 %v3906_v14, %v1792_v18  ;;  %v1848_v55 = vmul.f32 %v3903_v7, %v1793_v42 }
 0x283   :  { %v1658_v56 = vpop.f32.mrf.mxu2  ;;  %v1515_v41 = vpop.f32.mrf.mxu0 }
 0x284   :  { %v1659_v15 = vadd.f32 %v1658_v56, %v3896_v9  ;;  %v1731_v51 = vpop.f32.mrf.mxu3  ;;  %v1900_v59 = vadd.f32 %v1847_v50, %v1846_v49  ;;  %v1588_v10 = vpop.f32.mrf.mxu1  ;;  %v1516_v11 = vadd.f32 %v1515_v41, %v3890_v25 }
 0x286   :  { %v1732_v24 = vadd.f32 %v1731_v51, %v1659_v15  ;;  %1901 = vadd.xlane.f32.xlu2 %v1900_v59  ;;  %1554 = vmatmul.bf16.gmra.mxu0 %v3780_v47  ;;  %v1589_v61 = vadd.f32 %v1588_v10, %v1516_v11 }
 0x287   :  { %1627 = vmatmul.bf16.gmra.mxu1 %v3886_v31 }
 0x288   :  { %v1794_v60 = vmax.f32 %v1732_v24, 0.0  ;;  %1700 = vmatmul.bf16.gmra.mxu2 %v3780_v47  ;;  %v1795_v26 = vmax.f32 %v1589_v61, 0.0 }
 0x289   :  { %1773 = vmatmul.bf16.gmra.mxu3 %v3886_v31  ;;  %v1266_v31 = vmax.f32 %v3782_v46, 0.0 }
 0x28a   :  { %v1849_v44 = vmul.f32 %v3906_v14, %v1794_v60  ;;  %v1850_v40 = vmul.f32 %v3903_v7, %v1795_v26 }
 0x28b   :  { %v1661_v32 = vpop.f32.mrf.mxu2  ;;  %v1517_v33 = vpop.f32.mrf.mxu0  ;;  %v1292_v19 = vpack.c.bf16 %v1266_v31, %v1266_v31 }
 0x28c   :  { %v1662_v16 = vadd.f32 %v1661_v32, %v3896_v9  ;;  %v1734_v52 = vpop.f32.mrf.mxu3  ;;  %v1903_v43 = vadd.f32 %v1849_v44, %v1848_v55  ;;  %v1590_v34 = vpop.f32.mrf.mxu1  ;;  %v1518_v22 = vadd.f32 %v1517_v33, %v3890_v25 }
 0x28e   :  { %v1735_v35 = vadd.f32 %v1734_v52, %v1662_v16  ;;  %1904 = vadd.xlane.f32.xlu2 %v1903_v43  ;;  %v1591_v58 = vadd.f32 %v1590_v34, %v1518_v22 }
 0x290   :  { %v1796_v47 = vmax.f32 %v1735_v35, 0.0  ;;  %v1797_v57 = vmax.f32 %v1591_v58, 0.0 }
 0x292   :  { %v1851_v54 = vmul.f32 %v3906_v14, %v1796_v47  ;;  %v1852_v4 = vmul.f32 %v3903_v7, %v1797_v57 }
 0x293   :  { %v1663_v39 = vpop.f32.mrf.mxu2  ;;  %v1520_v27 = vpop.f32.mrf.mxu0 }
 0x294   :  { %v1664_v28 = vadd.f32 %v1663_v39, %v3896_v9  ;;  %v1736_v20 = vpop.f32.mrf.mxu3  ;;  %v1906_v2 = vadd.f32 %v1851_v54, %v1850_v40  ;;  %v1593_v12 = vpop.f32.mrf.mxu1  ;;  %v1521_v46 = vadd.f32 %v1520_v27, %v3890_v25 }
 0x296   :  { %v1737_v62 = vadd.f32 %v1736_v20, %v1664_v28  ;;  %1907 = vadd.xlane.f32.xlu0 %v1906_v2  ;;  %1559 = vmatmul.bf16.gmra.mxu0 %v1292_v19  ;;  %v1594_v36 = vadd.f32 %v1593_v12, %v1521_v46 }
 0x297   :  { %1632 = vmatmul.bf16.gmra.mxu1 %v1293_v0 }
 0x298   :  { %v1798_v5 = vmax.f32 %v1737_v62, 0.0  ;;  %1705 = vmatmul.bf16.gmra.mxu2 %v1292_v19  ;;  %v1799_v3 = vmax.f32 %v1594_v36, 0.0 }
 0x299   :  { %1778 = vmatmul.bf16.gmra.mxu3 %v1293_v0 }
 0x29a   :  { %v1853_v48 = vmul.f32 %v3906_v14, %v1798_v5  ;;  %v1854_v37 = vmul.f32 %v3903_v7, %v1799_v3 }
 0x29b   :  { %v1666_v1 = vpop.f32.mrf.mxu2  ;;  %v1522_v23 = vpop.f32.mrf.mxu0 }
 0x29c   :  { %v1667_v53 = vadd.f32 %v1666_v1, %v3896_v9  ;;  %v1739_v8 = vpop.f32.mrf.mxu3  ;;  %v1909_v30 = vadd.f32 %v1853_v48, %v1852_v4  ;;  %v1595_v21 = vpop.f32.mrf.mxu1  ;;  %v1523_v13 = vadd.f32 %v1522_v23, %v3890_v25 }
 0x29e   :  { %v1740_v6 = vadd.f32 %v1739_v8, %v1667_v53  ;;  %1910 = vadd.xlane.f32.xlu1 %v1909_v30  ;;  %v1596_v63 = vadd.f32 %v1595_v21, %v1523_v13 }
 0x2a0   :  { %v1800_v29 = vmax.f32 %v1740_v6, 0.0  ;;  %v1801_v51 = vmax.f32 %v1596_v63, 0.0 }
 0x2a2   :  { %v1855_v45 = vmul.f32 %v3906_v14, %v1800_v29  ;;  %v1856_v42 = vmul.f32 %v3903_v7, %v1801_v51 }
 0x2a3   :  { %v1668_v18 = vpop.f32.mrf.mxu2  ;;  %v1525_v50 = vpop.f32.mrf.mxu0 }
 0x2a4   :  { %v1669_v38 = vadd.f32 %v1668_v18, %v3896_v9  ;;  %v1741_v49 = vpop.f32.mrf.mxu3  ;;  %v1912_v56 = vadd.f32 %v1855_v45, %v1854_v37  ;;  %v1598_v15 = vpop.f32.mrf.mxu1  ;;  %v1526_v59 = vadd.f32 %v1525_v50, %v3890_v25 }
 0x2a6   :  { %v1742_v41 = vadd.f32 %v1741_v49, %v1669_v38  ;;  %1913 = vadd.xlane.f32.xlu2 %v1912_v56  ;;  %v1599_v11 = vadd.f32 %v1598_v15, %v1526_v59 }
 0x2a8   :  { %v1802_v10 = vmax.f32 %v1742_v41, 0.0  ;;  %v1803_v52 = vmax.f32 %v1599_v11, 0.0 }
 0x2aa   :  { %v1857_v24 = vmul.f32 %v3906_v14, %v1802_v10  ;;  %v1858_v26 = vmul.f32 %v3903_v7, %v1803_v52 }
 0x2ab   :  { %v1671_v60 = vpop.f32.mrf.mxu2  ;;  %v1527_v61 = vpop.f32.mrf.mxu0 }
 0x2ac   :  { %v1672_v55 = vadd.f32 %v1671_v60, %v3896_v9  ;;  %v1744_v44 = vpop.f32.mrf.mxu3  ;;  %v1915_v32 = vadd.f32 %v1857_v24, %v1856_v42  ;;  %v1600_v16 = vpop.f32.mrf.mxu1  ;;  %v1528_v43 = vadd.f32 %v1527_v61, %v3890_v25 }
 0x2ae   :  { %v1745_v33 = vadd.f32 %v1744_v44, %v1672_v55  ;;  %1916 = vadd.xlane.f32.xlu0 %v1915_v32  ;;  %v1601_v22 = vadd.f32 %v1600_v16, %v1528_v43 }
 0x2b0   :  { %v1804_v34 = vmax.f32 %v1745_v33, 0.0  ;;  %v1805_v39 = vmax.f32 %v1601_v22, 0.0 }
 0x2b2   :  { %v1859_v35 = vmul.f32 %v3906_v14, %v1804_v34  ;;  %v1860_v2 = vmul.f32 %v3903_v7, %v1805_v39 }
 0x2b3   :  { %v1673_v47 = vpop.f32.mrf.mxu2  ;;  %v1530_v40 = vpop.f32.mrf.mxu0 }
 0x2b4   :  { %v1674_v31 = vadd.f32 %v1673_v47, %v3896_v9  ;;  %v1746_v17 = vpop.f32.mrf.mxu3  ;;  %v1918_v54 = vadd.f32 %v1859_v35, %v1858_v26  ;;  %v1603_v58 = vpop.f32.mrf.mxu1  ;;  %v1531_v20 = vadd.f32 %v1530_v40, %v3890_v25 }
 0x2b6   :  { %v1747_v28 = vadd.f32 %v1746_v17, %v1674_v31  ;;  %1919 = vadd.xlane.f32.xlu1 %v1918_v54  ;;  %v1604_v12 = vadd.f32 %v1603_v58, %v1531_v20  ;;  %v3985_v31 = vstv %s4186_s6  ;;  %s3484_s6 = smov [#allocation11]  }
 0x2b7   :  { %s2740_s25 = sshll.u32 %s3484_s6, 4  ;;  %s2741_s25 = int_to_ptr.vmem [resolvable:$true] %s2740_s25 }
 0x2b8   :  { %v1806_v27 = vmax.f32 %v1747_v28, 0.0  ;;  %v1807_v48 = vmax.f32 %v1604_v12, 0.0 }
 0x2ba   :  { %v1861_v19 = vmul.f32 %v3906_v14, %v1806_v27  ;;  %v1862_v8 = vmul.f32 %v3903_v7, %v1807_v48 }
 0x2bb   :  { %v1676_v0 = vpop.f32.mrf.mxu2  ;;  %v1532_v46 = vpop.f32.mrf.mxu0 }
 0x2bc   :  { %v1677_v57 = vadd.f32 %v1676_v0, %v3896_v9  ;;  %v1749_v62 = vpop.f32.mrf.mxu3  ;;  %v1921_v5 = vadd.f32 %v1861_v19, %v1860_v2  ;;  %v1605_v4 = vpop.f32.mrf.mxu1  ;;  %v1533_v1 = vadd.f32 %v1532_v46, %v3890_v25 }
 0x2be   :  { %v1750_v36 = vadd.f32 %v1749_v62, %v1677_v57  ;;  %1922 = vadd.xlane.f32.xlu2 %v1921_v5  ;;  %v1606_v30 = vadd.f32 %v1605_v4, %v1533_v1 }
 0x2c0   :  { %v1808_v53 = vmax.f32 %v1750_v36, 0.0  ;;  %v1809_v45 = vmax.f32 %v1606_v30, 0.0 }
 0x2c2   :  { %v1863_v23 = vmul.f32 %v3906_v14, %v1808_v53  ;;  %v1864_v49 = vmul.f32 %v3903_v7, %v1809_v45 }
 0x2c3   :  { %v1678_v21 = vpop.f32.mrf.mxu2  ;;  %v1535_v13 = vpop.f32.mrf.mxu0 }
 0x2c4   :  { %v1679_v3 = vadd.f32 %v1678_v21, %v3896_v9  ;;  %v1751_v6 = vpop.f32.mrf.mxu3  ;;  %v1924_v29 = vadd.f32 %v1863_v23, %v1862_v8  ;;  %v1608_v37 = vpop.f32.mrf.mxu1  ;;  %v1536_v18 = vadd.f32 %v1535_v13, %v3890_v25 }
 0x2c6   :  { %v1752_v63 = vadd.f32 %v1751_v6, %v1679_v3  ;;  %1925 = vadd.xlane.f32.xlu0 %v1924_v29  ;;  %v1609_v56 = vadd.f32 %v1608_v37, %v1536_v18 }
 0x2c8   :  { %v1810_v38 = vmax.f32 %v1752_v63, 0.0  ;;  %v1811_v24 = vmax.f32 %v1609_v56, 0.0 }
 0x2ca   :  { %v1865_v50 = vmul.f32 %v3906_v14, %v1810_v38  ;;  %v1866_v44 = vmul.f32 %v3903_v7, %v1811_v24 }
 0x2cb   :  { %v1681_v15 = vpop.f32.mrf.mxu2  ;;  %v1537_v59 = vpop.f32.mrf.mxu0 }
 0x2cc   :  { %v1682_v51 = vadd.f32 %v1681_v15, %v3896_v9  ;;  %v1754_v41 = vpop.f32.mrf.mxu3  ;;  %v1927_v10 = vadd.f32 %v1865_v50, %v1864_v49  ;;  %v1610_v42 = vpop.f32.mrf.mxu1  ;;  %v1538_v60 = vadd.f32 %v1537_v59, %v3890_v25 }
 0x2ce   :  { %v1755_v11 = vadd.f32 %v1754_v41, %v1682_v51  ;;  %1928 = vadd.xlane.f32.xlu1 %v1927_v10  ;;  %v1611_v32 = vadd.f32 %v1610_v42, %v1538_v60 }
 0x2d0   :  { %v1812_v55 = vmax.f32 %v1755_v11, 0.0  ;;  %v1813_v26 = vmax.f32 %v1611_v32, 0.0 }
 0x2d2   :  { %v1867_v61 = vmul.f32 %v3906_v14, %v1812_v55  ;;  %v1868_v54 = vmul.f32 %v3903_v7, %v1813_v26 }
 0x2d3   :  { %v1683_v16 = vpop.f32.mrf.mxu2  ;;  %v1540_v43 = vpop.f32.mrf.mxu0 }
 0x2d4   :  { %v1684_v52 = vadd.f32 %v1683_v16, %v3896_v9  ;;  %v1756_v33 = vpop.f32.mrf.mxu3  ;;  %v1930_v34 = vadd.f32 %v1867_v61, %v1866_v44  ;;  %v1541_v22 = vadd.f32 %v1540_v43, %v3890_v25  ;;  %v1613_v47 = vpop.f32.mrf.mxu1 }
 0x2d6   :  { %v1757_v35 = vadd.f32 %v1756_v33, %v1684_v52  ;;  %1931 = vadd.xlane.f32.xlu2 %v1930_v34  ;;  %v1614_v39 = vadd.f32 %v1613_v47, %v1541_v22 }
 0x2d8   :  { %v1814_v17 = vmax.f32 %v1757_v35, 0.0  ;;  %v1815_v57 = vmax.f32 %v1614_v39, 0.0 }
 0x2d9   :  { %v1890_v40 = vpop.xlane.xlu0 %1889 }
 0x2da   :  { %v1869_v58 = vmul.f32 %v3906_v14, %v1814_v17  ;;  %v1964_v28 = vadd.f32 %v3985_v31, %v1890_v40  ;;  %v1870_v1 = vmul.f32 %v3903_v7, %v1815_v57 }
 0x2db   :  { %v1686_v20 = vpop.f32.mrf.mxu2  ;;  %v1542_v12 = vpop.f32.mrf.mxu0 }
 0x2dc   :  { %v1989_v27 = vsub.f32 0.0, %v1964_v28  ;;  %v1687_v2 = vadd.f32 %v1686_v20, %v3896_v9  ;;  %v1759_v19 = vpop.f32.mrf.mxu3  ;;  %v1933_v0 = vadd.f32 %v1869_v58, %v1868_v54  ;;  %v1543_v5 = vadd.f32 %v1542_v12, %v3890_v25  ;;  %v1615_v48 = vpop.f32.mrf.mxu1 }
 0x2de   :  { %v2014_v62 = vmul.f32 1.442695, %v1989_v27  ;;  %v1760_v46 = vadd.f32 %v1759_v19, %v1687_v2  ;;  %1934 = vadd.xlane.f32.xlu0 %v1933_v0  ;;  %v1616_v8 = vadd.f32 %v1615_v48, %v1543_v5 }
 0x2e0   :  { %3247 = vpow2.f32 %v2014_v62  ;;  %v1816_v4 = vmax.f32 %v1760_v46, 0.0  ;;  %v1817_v45 = vmax.f32 %v1616_v8, 0.0 }
 0x2e1   :  { %v1893_v36 = vpop.xlane.xlu0 %1892 }
 0x2e2   :  { %v1871_v53 = vmul.f32 %v3906_v14, %v1816_v4  ;;  %v1965_v23 = vadd.f32 %v3985_v31, %v1893_v36  ;;  %v1872_v15 = vmul.f32 %v3903_v7, %v1817_v45 }
 0x2e3   :  { %v1688_v30 = vpop.f32.mrf.mxu2  ;;  %v1545_v13 = vpop.f32.mrf.mxu0 }
 0x2e4   :  { %v1990_v21 = vsub.f32 0.0, %v1965_v23  ;;  %v1689_v3 = vadd.f32 %v1688_v30, %v3896_v9  ;;  %v1761_v6 = vpop.f32.mrf.mxu3  ;;  %v1936_v29 = vadd.f32 %v1871_v53, %v1870_v1  ;;  %v1546_v49 = vadd.f32 %v1545_v13, %v3890_v25  ;;  %v1618_v41 = vpop.f32.mrf.mxu1 }
 0x2e6   :  { %v3248_v37 = vpop.eup %3247  ;;  %v2016_v63 = vmul.f32 1.442695, %v1990_v21  ;;  %v1762_v18 = vadd.f32 %v1761_v6, %v1689_v3  ;;  %1937 = vadd.xlane.f32.xlu1 %v1936_v29  ;;  %v1619_v10 = vadd.f32 %v1618_v41, %v1546_v49 }
 0x2e7   :  { %v2064_v38 = vadd.f32 1.0, %v3248_v37 }
 0x2e8   :  { %3249 = vpow2.f32 %v2016_v63  ;;  %v1818_v50 = vmax.f32 %v1762_v18, 0.0  ;;  %v1819_v52 = vmax.f32 %v1619_v10, 0.0 }
 0x2e9   :  { %3251 = vrcp.f32 %v2064_v38  ;;  %v1896_v56 = vpop.xlane.xlu1 %1895 }
 0x2ea   :  { %v1873_v51 = vmul.f32 %v3906_v14, %v1818_v50  ;;  %v1966_v59 = vadd.f32 %v3985_v31, %v1896_v56  ;;  %v1874_v58 = vmul.f32 %v3903_v7, %v1819_v52 }
 0x2eb   :  { %v1691_v42 = vpop.f32.mrf.mxu2  ;;  %v1547_v32 = vpop.f32.mrf.mxu0 }
 0x2ec   :  { %v1692_v24 = vadd.f32 %v1691_v42, %v3896_v9  ;;  %v1764_v11 = vpop.f32.mrf.mxu3  ;;  %v1939_v60 = vadd.f32 %v1873_v51, %v1872_v15  ;;  %v1991_v44 = vsub.f32 0.0, %v1966_v59  ;;  %v1548_v22 = vadd.f32 %v1547_v32, %v3890_v25  ;;  %v1620_v27 = vpop.f32.mrf.mxu1 }
 0x2ee   :  { %v3250_v55 = vpop.eup %3249  ;;  %v1765_v61 = vadd.f32 %v1764_v11, %v1692_v24  ;;  %1940 = vadd.xlane.f32.xlu2 %v1939_v60  ;;  %v2018_v17 = vmul.f32 1.442695, %v1991_v44  ;;  %v1621_v12 = vadd.f32 %v1620_v27, %v1548_v22 }
 0x2ef   :  { %v3252_v16 = vpop.eup %3251  ;;  %v2065_v26 = vadd.f32 1.0, %v3250_v55 }
 0x2f0   :  { %v2139_v33 = vperm.slane %v3252_v16, 0  ;;  %v2140_v43 = vperm.slane %v3252_v16, 1  ;;  %v2141_v34 = vperm.slane %v3252_v16, 2  ;;  %v2142_v35 = vperm.slane %v3252_v16, 3 }
 0x2f1   :  { %v2143_v47 = vperm.slane %v3252_v16, 4  ;;  %v1820_v40 = vmax.f32 %v1765_v61, 0.0  ;;  %v2144_v54 = vperm.slane %v3252_v16, 5  ;;  %v2145_v28 = vperm.slane %v3252_v16, 6  ;;  %v1899_v57 = vpop.xlane.xlu1 %1898 }
 0x2f2   :  { %2339 = vst [vmem:[#allocation1] ss:$9 sm:$0xff] %v2139_v33  ;;  %3253 = vrcp.f32 %v2065_v26  ;;  %v2146_v19 = vperm.slane %v3252_v16, 7  ;;  %v1821_v4 = vmax.f32 %v1621_v12, 0.0  ;;  %v1967_v48 = vadd.f32 %v3985_v31, %v1899_v57 }
 0x2f3   :  { %2341 = vst [vmem:[#allocation1 + $0x1] ss:$9 sm:$0xff] %v2140_v43  ;;  %v1693_v39 = vpop.f32.mrf.mxu2  ;;  %v1875_v20 = vmul.f32 %v3906_v14, %v1820_v40  ;;  %3255 = vpow2.f32 %v2018_v17  ;;  %v4010_v45 = vpop.f32.mrf.mxu0  ;;  %v3483_v26 = vmov 0  }
 0x2f4   :  { %2343 = vst [vmem:[#allocation1 + $0x2] ss:$9 sm:$0xff] %v2141_v34  ;;  %v1694_v2 = vadd.f32 %v1693_v39, %v3896_v9  ;;  %v1766_v0 = vpop.f32.mrf.mxu3  ;;  %v1876_v23 = vmul.f32 %v3903_v7, %v1821_v4  ;;  %v1992_v30 = vsub.f32 0.0, %v1967_v48  ;;  %v4012_v50 = vpop.f32.mrf.mxu1  ;;  %3245 = vset.pattern.permute.xlu2 %v3483_v26  ;;  %3244 = vset.pattern.permute.xlu1 %v3483_v26 }
 0x2f5   :  { %2345 = vst [vmem:[#allocation1 + $0x3] ss:$9 sm:$0xff] %v2142_v35  ;;  %v1942_v46 = vadd.f32 %v1875_v20, %v1874_v58  ;;  %3246 = vset.pattern.permute.xlu0 %v3483_v26 }
 0x2f6   :  { %2347 = vst [vmem:[#allocation1 + $0x4] ss:$9 sm:$0xff] %v2143_v47  ;;  %v1767_v62 = vadd.f32 %v1766_v0, %v1694_v2  ;;  %v2020_v18 = vmul.f32 1.442695, %v1992_v30 }
 0x2f7   :  { %2349 = vst [vmem:[#allocation1 + $0x5] ss:$9 sm:$0xff] %v2144_v54  ;;  %1943 = vadd.xlane.f32.xlu0 %v1942_v46 }
 0x2f8   :  { %2351 = vst [vmem:[#allocation1 + $0x6] ss:$9 sm:$0xff] %v2145_v28  ;;  %v1822_v5 = vmax.f32 %v1767_v62, 0.0  ;;  %v3254_v36 = vpop.eup %3253 }
 0x2f9   :  { %2353 = vst [vmem:[#allocation1 + $0x7] ss:$9 sm:$0xff] %v2146_v19  ;;  %v3256_v53 = vpop.eup %3255  ;;  %v2147_v8 = vperm.slane %v3254_v36, 0  ;;  %v2148_v21 = vperm.slane %v3254_v36, 1  ;;  %v2149_v3 = vperm.slane %v3254_v36, 2  ;;  %v2150_v37 = vperm.slane %v3254_v36, 3  ;;  %v1902_v51 = vpop.xlane.xlu2 %1901 }
 0x2fa   :  { %v1877_v1 = vmul.f32 %v3906_v14, %v1822_v5  ;;  %v2066_v6 = vadd.f32 1.0, %v3256_v53  ;;  %v2151_v63 = vperm.slane %v3254_v36, 4  ;;  %v2152_v38 = vperm.slane %v3254_v36, 5 }
 0x2fb   :  { %v2153_v49 = vperm.slane %v3254_v36, 6  ;;  %v4014_v56 = vpop.f32.mrf.mxu2  ;;  %v2154_v15 = vperm.slane %v3254_v36, 7  ;;  %v1968_v59 = vadd.f32 %v3985_v31, %v1902_v51  ;;  %v1552_v42 = vpop.f32.mrf.mxu0 }
 0x2fc   :  { %v1945_v13 = vadd.f32 %v1877_v1, %v1876_v23  ;;  %3257 = vrcp.f32 %v2066_v6  ;;  %v4016_v41 = vpop.f32.mrf.mxu3  ;;  %v1625_v44 = vpop.f32.mrf.mxu1  ;;  %v1553_v34 = vadd.f32 %v1552_v42, %v3890_v25 }
 0x2fd   :  { %3259 = vpow2.f32 %v2020_v18  ;;  %v1993_v60 = vsub.f32 0.0, %v1968_v59 }
 0x2fe   :  { %1946 = vadd.xlane.f32.xlu1 %v1945_v13  ;;  %v1626_v39 = vadd.f32 %v1625_v44, %v1553_v34 }
 0x2ff   :  { %v2022_v22 = vmul.f32 1.442695, %v1993_v60 }
 0x300   :  { %v4008_v29 = vld [vmem:[#allocation1] sm:$0xff]  ;;  %v1825_v2 = vmax.f32 %v1626_v39, 0.0 }
 0x301   :  { %2355 = vst [vmem:[#allocation1] ss:$9 sm:$0xff] %v2147_v8  ;;  %v1905_v28 = vpop.xlane.xlu2 %1904 }
 0x302   :  { %2356 = vst [vmem:[#allocation1 + $0x1] ss:$9 sm:$0xff] %v2148_v21  ;;  %v3258_v10 = vpop.eup %3257  ;;  %v1969_v19 = vadd.f32 %v3985_v31, %v1905_v28  ;;  %v1880_v5 = vmul.f32 %v3903_v7, %v1825_v2 }
 0x303   :  { %2357 = vst [vmem:[#allocation1 + $0x2] ss:$9 sm:$0xff] %v2149_v3  ;;  %v3260_v24 = vpop.eup %3259  ;;  %v2155_v11 = vperm.slane %v3258_v10, 0  ;;  %v2156_v55 = vperm.slane %v3258_v10, 1  ;;  %v1698_v61 = vpop.f32.mrf.mxu2  ;;  %v2157_v32 = vperm.slane %v3258_v10, 2  ;;  %v2158_v43 = vperm.slane %v3258_v10, 3 }
 0x304   :  { %2358 = vst [vmem:[#allocation1 + $0x3] ss:$9 sm:$0xff] %v2150_v37  ;;  %v2067_v16 = vadd.f32 1.0, %v3260_v24  ;;  %v1699_v52 = vadd.f32 %v1698_v61, %v3896_v9  ;;  %v2159_v35 = vperm.slane %v3258_v10, 4  ;;  %v1771_v47 = vpop.f32.mrf.mxu3  ;;  %v2160_v17 = vperm.slane %v3258_v10, 5  ;;  %v4021_v20 = vpop.f32.mrf.mxu0 }
 0x305   :  { %2359 = vst [vmem:[#allocation1 + $0x4] ss:$9 sm:$0xff] %v2151_v63  ;;  %v2161_v54 = vperm.slane %v3258_v10, 6  ;;  %v2162_v58 = vperm.slane %v3258_v10, 7  ;;  %v4024_v12 = vpop.f32.mrf.mxu1  ;;  %v1994_v4 = vsub.f32 0.0, %v1969_v19  ;;  %v1697_v10 = vadd.f32 %v4014_v56, %v3896_v9 }
 0x306   :  { %2360 = vst [vmem:[#allocation1 + $0x5] ss:$9 sm:$0xff] %v2152_v38  ;;  %v1772_v40 = vadd.f32 %v1771_v47, %v1699_v52  ;;  %3261 = vrcp.f32 %v2067_v16  ;;  %v1551_v24 = vadd.f32 %v4010_v45, %v3890_v25 }
 0x307   :  { %2361 = vst [vmem:[#allocation1 + $0x6] ss:$9 sm:$0xff] %v2153_v49  ;;  %3263 = vpow2.f32 %v2022_v22  ;;  %v2024_v3 = vmul.f32 1.442695, %v1994_v4  ;;  %v1770_v44 = vadd.f32 %v4016_v41, %v1697_v10 }
 0x308   :  { %2362 = vst [vmem:[#allocation1 + $0x7] ss:$9 sm:$0xff] %v2154_v15  ;;  %v1826_v27 = vmax.f32 %v1772_v40, 0.0 }
 0x309   :  { %v1908_v49 = vpop.xlane.xlu0 %1907  ;;  %v1824_v41 = vmax.f32 %v1770_v44, 0.0 }
 0x30a   :  { %v1881_v57 = vmul.f32 %v3906_v14, %v1826_v27  ;;  %v1970_v51 = vadd.f32 %v3985_v31, %v1908_v49 }
 0x30b   :  { %v4030_v37 = vpop.f32.mrf.mxu2  ;;  %v1879_v39 = vmul.f32 %v3906_v14, %v1824_v41 }
 0x30c   :  { %v3262_v0 = vpop.eup %3261  ;;  %v1951_v53 = vadd.f32 %v1881_v57, %v1880_v5  ;;  %v1557_v30 = vpop.f32.mrf.mxu0  ;;  %v1995_v60 = vsub.f32 0.0, %v1970_v51 }
 0x30d   :  { %v3264_v62 = vpop.eup %3263  ;;  %v2163_v46 = vperm.slane %v3262_v0, 0  ;;  %v2164_v48 = vperm.slane %v3262_v0, 1  ;;  %v2165_v36 = vperm.slane %v3262_v0, 2  ;;  %v2166_v23 = vperm.slane %v3262_v0, 3  ;;  %v1630_v63 = vpop.f32.mrf.mxu1 }
 0x30e   :  { %v2068_v1 = vadd.f32 1.0, %v3264_v62  ;;  %v2167_v21 = vperm.slane %v3262_v0, 4  ;;  %1952 = vadd.xlane.f32.xlu0 %v1951_v53  ;;  %v2168_v6 = vperm.slane %v3262_v0, 5  ;;  %v1558_v13 = vadd.f32 %v1557_v30, %v3890_v25  ;;  %v4034_v15 = vpop.f32.mrf.mxu3 }
 0x30f   :  { %v2363_v33 = vld [vmem:[#allocation1] sm:$0xff]  ;;  %v2170_v18 = vperm.slane %v3262_v0, 7 }
 0x310   :  { %2364 = vst [vmem:[#allocation1] ss:$9 sm:$0xff] %v2155_v11  ;;  %2575 = vperm.xlu2 %3245, %v2363_v33   ;;  %3265 = vrcp.f32 %v2068_v1  ;;  %v4032_v38 = vadd.f32 %v1630_v63, %v1558_v13  ;;  %v1624_v33 = vadd.f32 %v4012_v50, %v1551_v24 }
 0x311   :  { %2365 = vst [vmem:[#allocation1 + $0x1] ss:$9 sm:$0xff] %v2156_v55  ;;  %3267 = vpow2.f32 %v2024_v3 }
 0x312   :  { %2366 = vst [vmem:[#allocation1 + $0x2] ss:$9 sm:$0xff] %v2157_v32  ;;  %v1823_v50 = vmax.f32 %v1624_v33, 0.0 }
 0x313   :  { %2367 = vst [vmem:[#allocation1 + $0x3] ss:$9 sm:$0xff] %v2158_v43  ;;  %v1703_v61 = vpop.f32.mrf.mxu2 }
 0x314   :  { %2368 = vst [vmem:[#allocation1 + $0x4] ss:$9 sm:$0xff] %v2159_v35  ;;  %v1704_v34 = vadd.f32 %v1703_v61, %v3896_v9  ;;  %v4046_v56 = vpop.f32.mrf.mxu0  ;;  %v2026_v35 = vmul.f32 1.442695, %v1995_v60  ;;  %v1878_v28 = vmul.f32 %v3903_v7, %v1823_v50 }
 0x315   :  { %2369 = vst [vmem:[#allocation1 + $0x5] ss:$9 sm:$0xff] %v2160_v17  ;;  %v4048_v26 = vpop.f32.mrf.mxu1 }
 0x316   :  { %2370 = vst [vmem:[#allocation1 + $0x6] ss:$9 sm:$0xff] %v2161_v54  ;;  %v3266_v59 = vpop.eup %3265  ;;  %v1776_v22 = vpop.f32.mrf.mxu3  ;;  %v1948_v57 = vadd.f32 %v1879_v39, %v1878_v28 }
 0x317   :  { %2371 = vst [vmem:[#allocation1 + $0x7] ss:$9 sm:$0xff] %v2162_v58  ;;  %2572 = vperm.xlu1 %3244, %v4008_v29   ;;  %v2169_v29 = vperm.slane %v3262_v0, 6  ;;  %v3268_v42 = vpop.eup %3267  ;;  %v2171_v11 = vperm.slane %v3266_v59, 0  ;;  %v2172_v55 = vperm.slane %v3266_v59, 1  ;;  %v2173_v32 = vperm.slane %v3266_v59, 2  ;;  %v1911_v58 = vpop.xlane.xlu1 %1910 }
 0x318   :  { %v2069_v16 = vadd.f32 1.0, %v3268_v42  ;;  %v2174_v43 = vperm.slane %v3266_v59, 3  ;;  %v2175_v45 = vperm.slane %v3266_v59, 4  ;;  %v2176_v47 = vperm.slane %v3266_v59, 5 }
 0x319   :  { %v4050_v17 = vadd.f32 %v1776_v22, %v1704_v34  ;;  %v2177_v40 = vperm.slane %v3266_v59, 6  ;;  %v2178_v54 = vperm.slane %v3266_v59, 7  ;;  %v1971_v27 = vadd.f32 %v3985_v31, %v1911_v58 }
 0x31a   :  { %3269 = vrcp.f32 %v2069_v16  ;;  %v1702_v59 = vadd.f32 %v4030_v37, %v3896_v9  ;;  %v1556_v42 = vadd.f32 %v4021_v20, %v3890_v25 }
 0x31b   :  { %3271 = vpow2.f32 %v2026_v35  ;;  %v1996_v5 = vsub.f32 0.0, %v1971_v27 }
 0x31c   :  { %v1562_v2 = vpop.f32.mrf.mxu0  ;;  %v1775_v44 = vadd.f32 %v4034_v15, %v1702_v59  ;;  %v1629_v33 = vadd.f32 %v4024_v12, %v1556_v42 }
 0x31d   :  { %v1635_v19 = vpop.f32.mrf.mxu1 }
 0x31e   :  { %v2372_v8 = vld [vmem:[#allocation1] sm:$0xff]  ;;  %v1828_v20 = vmax.f32 %v1775_v44, 0.0  ;;  %v1827_v22 = vmax.f32 %v1629_v33, 0.0 }
 0x31f   :  { %2373 = vst [vmem:[#allocation1] ss:$9 sm:$0xff] %v2163_v46 }
 0x320   :  { %2374 = vst [vmem:[#allocation1 + $0x1] ss:$9 sm:$0xff] %v2164_v48  ;;  %v3270_v0 = vpop.eup %3269  ;;  %v4055_v48 = vpop.f32.mrf.mxu2  ;;  %v1883_v12 = vmul.f32 %v3906_v14, %v1828_v20 }
 0x321   :  { %2375 = vst [vmem:[#allocation1 + $0x2] ss:$9 sm:$0xff] %v2165_v36  ;;  %v3272_v62 = vpop.eup %3271  ;;  %v2179_v46 = vperm.slane %v3270_v0, 0  ;;  %v2180_v4 = vperm.slane %v3270_v0, 1  ;;  %v4057_v36 = vpop.f32.mrf.mxu3  ;;  %v2181_v1 = vperm.slane %v3270_v0, 2  ;;  %v2183_v30 = vperm.slane %v3270_v0, 4 }
 0x322   :  { %2376 = vst [vmem:[#allocation1 + $0x3] ss:$9 sm:$0xff] %v2166_v23  ;;  %2578 = vperm.xlu0 %3246, %v2372_v8   ;;  %v2070_v53 = vadd.f32 1.0, %v3272_v62  ;;  %v2182_v23 = vperm.slane %v3270_v0, 3  ;;  %v2184_v3 = vperm.slane %v3270_v0, 5  ;;  %v2186_v13 = vperm.slane %v3270_v0, 7  ;;  %v1917_v15 = vpop.xlane.xlu0 %1916 }
 0x323   :  { %2377 = vst [vmem:[#allocation1 + $0x4] ss:$9 sm:$0xff] %v2167_v21  ;;  %v2028_v21 = vmul.f32 1.442695, %v1996_v5  ;;  %v1707_v5 = vadd.f32 %v4055_v48, %v3896_v9 }
 0x324   :  { %2378 = vst [vmem:[#allocation1 + $0x5] ss:$9 sm:$0xff] %v2168_v6  ;;  %v2185_v6 = vperm.slane %v3270_v0, 6  ;;  %3273 = vrcp.f32 %v2070_v53 }
 0x325   :  { %2379 = vst [vmem:[#allocation1 + $0x6] ss:$9 sm:$0xff] %v2169_v29  ;;  %3275 = vpow2.f32 %v2028_v21  ;;  %v1914_v29 = vpop.xlane.xlu2 %1913 }
 0x326   :  { %2380 = vst [vmem:[#allocation1 + $0x7] ss:$9 sm:$0xff] %v2170_v18  ;;  %v1972_v49 = vadd.f32 %v3985_v31, %v1914_v29 }
 0x328   :  { %v1708_v63 = vpop.f32.mrf.mxu2 }
 0x329   :  { %v1781_v18 = vpop.f32.mrf.mxu3  ;;  %v1920_v53 = vpop.xlane.xlu1 %1919 }
 0x32a   :  { %v3274_v51 = vpop.eup %3273 }
 0x32b   :  { %v3276_v10 = vpop.eup %3275  ;;  %v2187_v24 = vperm.slane %v3274_v51, 0  ;;  %v2188_v60 = vperm.slane %v3274_v51, 1  ;;  %v2190_v16 = vperm.slane %v3274_v51, 3  ;;  %v2192_v37 = vperm.slane %v3274_v51, 5 }
 0x32c   :  { %v2071_v61 = vadd.f32 1.0, %v3276_v10  ;;  %v2194_v35 = vperm.slane %v3274_v51, 7 }
 0x32d   :  { %v4042_v52 = vld [vmem:[#allocation1] sm:$0xff] }
 0x32e   :  { %2382 = vst [vmem:[#allocation1] ss:$9 sm:$0xff] %v2171_v11  ;;  %v1997_v11 = vsub.f32 0.0, %v1972_v49  ;;  %3277 = vrcp.f32 %v2071_v61 }
 0x32f   :  { %2383 = vst [vmem:[#allocation1 + $0x1] ss:$9 sm:$0xff] %v2172_v55  ;;  %v2189_v55 = vperm.slane %v3274_v51, 2 }
 0x330   :  { %2384 = vst [vmem:[#allocation1 + $0x2] ss:$9 sm:$0xff] %v2173_v32  ;;  %v2030_v34 = vmul.f32 1.442695, %v1997_v11 }
 0x331   :  { %2385 = vst [vmem:[#allocation1 + $0x3] ss:$9 sm:$0xff] %v2174_v43  ;;  %v2191_v43 = vperm.slane %v3274_v51, 4 }
 0x332   :  { %2386 = vst [vmem:[#allocation1 + $0x4] ss:$9 sm:$0xff] %v2175_v45  ;;  %v2193_v45 = vperm.slane %v3274_v51, 6  ;;  %3279 = vpow2.f32 %v2030_v34 }
 0x333   :  { %2387 = vst [vmem:[#allocation1 + $0x5] ss:$9 sm:$0xff] %v2176_v47  ;;  %v1973_v47 = vadd.f32 %v3985_v31, %v1917_v15 }
 0x334   :  { %2388 = vst [vmem:[#allocation1 + $0x6] ss:$9 sm:$0xff] %v2177_v40  ;;  %v3278_v41 = vpop.eup %3277  ;;  %v1882_v40 = vmul.f32 %v3903_v7, %v1827_v22 }
 0x335   :  { %2389 = vst [vmem:[#allocation1 + $0x7] ss:$9 sm:$0xff] %v2178_v54  ;;  %v2195_v58 = vperm.slane %v3278_v41, 0  ;;  %v1998_v39 = vsub.f32 0.0, %v1973_v47  ;;  %v2196_v28 = vperm.slane %v3278_v41, 1  ;;  %v2197_v27 = vperm.slane %v3278_v41, 2 }
 0x336   :  { %v1954_v54 = vadd.f32 %v1883_v12, %v1882_v40  ;;  %v2199_v0 = vperm.slane %v3278_v41, 4  ;;  %v2200_v62 = vperm.slane %v3278_v41, 5 }
 0x338   :  { %v3280_v50 = vpop.eup %3279 }
 0x339   :  { %1949 = vadd.xlane.f32.xlu2 %v1948_v57  ;;  %v2072_v2 = vadd.f32 1.0, %v3280_v50  ;;  %v2032_v57 = vmul.f32 1.442695, %v1998_v39  ;;  %v1926_v50 = vpop.xlane.xlu0 %1925 }
 0x33b   :  { %3281 = vrcp.f32 %v2072_v2 }
 0x33c   :  { %v4059_v8 = vld [vmem:[#allocation1] sm:$0xff]  ;;  %3283 = vpow2.f32 %v2032_v57 }
 0x33d   :  { %2391 = vst [vmem:[#allocation1] ss:$9 sm:$0xff] %v2179_v46  ;;  %v2201_v46 = vperm.slane %v3278_v41, 6 }
 0x33e   :  { %2392 = vst [vmem:[#allocation1 + $0x1] ss:$9 sm:$0xff] %v2180_v4  ;;  %v2202_v4 = vperm.slane %v3278_v41, 7 }
 0x33f   :  { %2393 = vst [vmem:[#allocation1 + $0x2] ss:$9 sm:$0xff] %v2181_v1  ;;  %v1561_v1 = vadd.f32 %v4046_v56, %v3890_v25 }
 0x340   :  { %2394 = vst [vmem:[#allocation1 + $0x3] ss:$9 sm:$0xff] %v2182_v23  ;;  %v1780_v23 = vadd.f32 %v4057_v36, %v1707_v5 }
 0x341   :  { %2395 = vst [vmem:[#allocation1 + $0x4] ss:$9 sm:$0xff] %v2183_v30  ;;  %1955 = vadd.xlane.f32.xlu1 %v1954_v54  ;;  %v1974_v30 = vadd.f32 %v3985_v31, %v1920_v53  ;;  %v3282_v21 = vpop.eup %3281  ;;  %v1976_v54 = vadd.f32 %v3985_v31, %v1926_v50 }
 0x342   :  { %2396 = vst [vmem:[#allocation1 + $0x5] ss:$9 sm:$0xff] %v2184_v3  ;;  %v1634_v3 = vadd.f32 %v4048_v26, %v1561_v1  ;;  %v1832_v9 = vmax.f32 %v1780_v23, 0.0  ;;  %v2203_v48 = vperm.slane %v3282_v21, 0  ;;  %v2204_v63 = vperm.slane %v3282_v21, 1 }
 0x343   :  { %2397 = vst [vmem:[#allocation1 + $0x6] ss:$9 sm:$0xff] %v2185_v6  ;;  %v3284_v6 = vpop.eup %3283  ;;  %v2205_v18 = vperm.slane %v3282_v21, 2  ;;  %v2206_v49 = vperm.slane %v3282_v21, 3  ;;  %v2207_v36 = vperm.slane %v3282_v21, 4  ;;  %v2208_v42 = vperm.slane %v3282_v21, 5 }
 0x344   :  { %2398 = vst [vmem:[#allocation1 + $0x7] ss:$9 sm:$0xff] %v2186_v13  ;;  %v1999_v13 = vsub.f32 0.0, %v1974_v30  ;;  %v1831_v29 = vmax.f32 %v1634_v3, 0.0  ;;  %v2073_v25 = vadd.f32 1.0, %v3284_v6  ;;  %v1887_v51 = vmul.f32 %v3906_v14, %v1832_v9 }
 0x345   :  { %v2209_v26 = vperm.slane %v3282_v21, 6 }
 0x346   :  { %v2034_v59 = vmul.f32 1.442695, %v1999_v13  ;;  %v1886_v10 = vmul.f32 %v3903_v7, %v1831_v29  ;;  %3285 = vrcp.f32 %v2073_v25 }
 0x348   :  { %v1960_v11 = vadd.f32 %v1887_v51, %v1886_v10  ;;  %3287 = vpow2.f32 %v2034_v59 }
 0x34b   :  { %v4067_v32 = vld [vmem:[#allocation1] sm:$0xff] }
 0x34c   :  { %2400 = vst [vmem:[#allocation1] ss:$9 sm:$0xff] %v2187_v24  ;;  %v2210_v24 = vperm.slane %v3282_v21, 7  ;;  %1961 = vadd.xlane.f32.xlu0 %v1960_v11  ;;  %v3286_v44 = vpop.eup %3285 }
 0x34d   :  { %2401 = vst [vmem:[#allocation1 + $0x1] ss:$9 sm:$0xff] %v2188_v60  ;;  %v1923_v60 = vpop.xlane.xlu2 %1922  ;;  %v2213_v34 = vperm.slane %v3286_v44, 2  ;;  %v2214_v20 = vperm.slane %v3286_v44, 3  ;;  %v2215_v22 = vperm.slane %v3286_v44, 4  ;;  %v2216_v12 = vperm.slane %v3286_v44, 5 }
 0x34e   :  { %2402 = vst [vmem:[#allocation1 + $0x2] ss:$9 sm:$0xff] %v2189_v55  ;;  %v1975_v55 = vadd.f32 %v3985_v31, %v1923_v60  ;;  %v3288_v61 = vpop.eup %3287  ;;  %v2217_v47 = vperm.slane %v3286_v44, 6 }
 0x34f   :  { %2403 = vst [vmem:[#allocation1 + $0x3] ss:$9 sm:$0xff] %v2190_v16  ;;  %v2211_v16 = vperm.slane %v3286_v44, 0 }
 0x350   :  { %2404 = vst [vmem:[#allocation1 + $0x4] ss:$9 sm:$0xff] %v2191_v43  ;;  %v2000_v33 = vsub.f32 0.0, %v1975_v55  ;;  %v2212_v43 = vperm.slane %v3286_v44, 1 }
 0x351   :  { %2405 = vst [vmem:[#allocation1 + $0x5] ss:$9 sm:$0xff] %v2192_v37  ;;  %2581 = vperm.xlu2 %3245, %v4042_v52   ;;  %v2198_v52 = vperm.slane %v3278_v41, 3  ;;  %v2074_v37 = vadd.f32 1.0, %v3288_v61  ;;  %v2218_v41 = vperm.slane %v3286_v44, 7 }
 0x352   :  { %2406 = vst [vmem:[#allocation1 + $0x6] ss:$9 sm:$0xff] %v2193_v45  ;;  %v2036_v15 = vmul.f32 1.442695, %v2000_v33 }
 0x353   :  { %2407 = vst [vmem:[#allocation1 + $0x7] ss:$9 sm:$0xff] %v2194_v35  ;;  %v1830_v35 = vmax.f32 %v4050_v17, 0.0  ;;  %3289 = vrcp.f32 %v2074_v37 }
 0x354   :  { %3291 = vpow2.f32 %v2036_v15 }
 0x355   :  { %v1885_v40 = vmul.f32 %v3906_v14, %v1830_v35  ;;  %v1932_v51 = vpop.xlane.xlu2 %1931 }
 0x35a   :  { %v4074_v19 = vld [vmem:[#allocation1] sm:$0xff]  ;;  %2584 = vperm.xlu1 %3244, %v4059_v8   ;;  %v1829_v8 = vmax.f32 %v4032_v38, 0.0 }
 0x35b   :  { %2409 = vst [vmem:[#allocation1] ss:$9 sm:$0xff] %v2195_v58  ;;  %v3290_v58 = vpop.eup %3289 }
 0x35c   :  { %2410 = vst [vmem:[#allocation1 + $0x1] ss:$9 sm:$0xff] %v2196_v28  ;;  %v1884_v17 = vmul.f32 %v3903_v7, %v1829_v8  ;;  %v3292_v39 = vpop.eup %3291  ;;  %v2219_v28 = vperm.slane %v3290_v58, 0  ;;  %v2220_v2 = vperm.slane %v3290_v58, 1  ;;  %v2223_v57 = vperm.slane %v3290_v58, 4 }
 0x35d   :  { %2411 = vst [vmem:[#allocation1 + $0x2] ss:$9 sm:$0xff] %v2197_v27  ;;  %v2001_v27 = vsub.f32 0.0, %v1976_v54  ;;  %v2075_v14 = vadd.f32 1.0, %v3292_v39  ;;  %v2224_v7 = vperm.slane %v3290_v58, 5  ;;  %v2226_v5 = vperm.slane %v3290_v58, 7 }
 0x35e   :  { %2412 = vst [vmem:[#allocation1 + $0x3] ss:$9 sm:$0xff] %v2198_v52  ;;  %v1957_v38 = vadd.f32 %v1885_v40, %v1884_v17 }
 0x35f   :  { %2413 = vst [vmem:[#allocation1 + $0x4] ss:$9 sm:$0xff] %v2199_v0  ;;  %v2222_v0 = vperm.slane %v3290_v58, 3  ;;  %3293 = vrcp.f32 %v2075_v14 }
 0x360   :  { %2414 = vst [vmem:[#allocation1 + $0x5] ss:$9 sm:$0xff] %v2200_v62  ;;  %v2038_v62 = vmul.f32 1.442695, %v2001_v27 }
 0x361   :  { %2415 = vst [vmem:[#allocation1 + $0x6] ss:$9 sm:$0xff] %v2201_v46  ;;  %v2225_v46 = vperm.slane %v3290_v58, 6 }
 0x362   :  { %2416 = vst [vmem:[#allocation1 + $0x7] ss:$9 sm:$0xff] %v2202_v4  ;;  %2590 = vperm.xlu1 %3244, %v4074_v19   ;;  %v2221_v19 = vperm.slane %v3290_v58, 2  ;;  %3295 = vpow2.f32 %v2038_v62  ;;  %v1929_v4 = vpop.xlane.xlu1 %1928 }
 0x363   :  { %v1977_v1 = vadd.f32 %v3985_v31, %v1929_v4 }
 0x365   :  { %v3294_v53 = vpop.eup %3293  ;;  %v2002_v21 = vsub.f32 0.0, %v1977_v1  ;;  %v1941_v1 = vpop.xlane.xlu2 %1940 }
 0x366   :  { %v2227_v30 = vperm.slane %v3294_v53, 0  ;;  %v2228_v3 = vperm.slane %v3294_v53, 1  ;;  %v2229_v6 = vperm.slane %v3294_v53, 2  ;;  %v2230_v13 = vperm.slane %v3294_v53, 3 }
 0x367   :  { %v2231_v29 = vperm.slane %v3294_v53, 4  ;;  %v2233_v25 = vperm.slane %v3294_v53, 6 }
 0x368   :  { %v3296_v23 = vpop.eup %3295 }
 0x369   :  { %v4083_v56 = vld [vmem:[#allocation1] sm:$0xff]  ;;  %v2076_v9 = vadd.f32 1.0, %v3296_v23 }
 0x36a   :  { %2418 = vst [vmem:[#allocation1] ss:$9 sm:$0xff] %v2203_v48  ;;  %v1938_v58 = vpop.xlane.xlu1 %1937 }
 0x36b   :  { %2419 = vst [vmem:[#allocation1 + $0x1] ss:$9 sm:$0xff] %v2204_v63  ;;  %v2040_v63 = vmul.f32 1.442695, %v2002_v21  ;;  %3297 = vrcp.f32 %v2076_v9 }
 0x36c   :  { %2420 = vst [vmem:[#allocation1 + $0x2] ss:$9 sm:$0xff] %v2205_v18  ;;  %v2232_v18 = vperm.slane %v3294_v53, 5 }
 0x36d   :  { %2421 = vst [vmem:[#allocation1 + $0x3] ss:$9 sm:$0xff] %v2206_v49  ;;  %v2234_v49 = vperm.slane %v3294_v53, 7  ;;  %3299 = vpow2.f32 %v2040_v63  ;;  %v1981_v53 = vadd.f32 %v3985_v31, %v1941_v1 }
 0x36e   :  { %2422 = vst [vmem:[#allocation1 + $0x4] ss:$9 sm:$0xff] %v2207_v36  ;;  %v1978_v36 = vadd.f32 %v3985_v31, %v1932_v51 }
 0x36f   :  { %2423 = vst [vmem:[#allocation1 + $0x5] ss:$9 sm:$0xff] %v2208_v42 }
 0x370   :  { %2424 = vst [vmem:[#allocation1 + $0x6] ss:$9 sm:$0xff] %v2209_v26  ;;  %v2003_v26 = vsub.f32 0.0, %v1978_v36 }
 0x371   :  { %2425 = vst [vmem:[#allocation1 + $0x7] ss:$9 sm:$0xff] %v2210_v24  ;;  %v3298_v59 = vpop.eup %3297 }
 0x372   :  { %v2235_v42 = vperm.slane %v3298_v59, 0  ;;  %v2236_v24 = vperm.slane %v3298_v59, 1  ;;  %v2237_v11 = vperm.slane %v3298_v59, 2  ;;  %v2238_v44 = vperm.slane %v3298_v59, 3 }
 0x373   :  { %v3300_v10 = vpop.eup %3299  ;;  %v2239_v61 = vperm.slane %v3298_v59, 4  ;;  %v2241_v33 = vperm.slane %v3298_v59, 6 }
 0x374   :  { %v2077_v60 = vadd.f32 1.0, %v3300_v10 }
 0x376   :  { %3301 = vrcp.f32 %v2077_v60 }
 0x378   :  { %v2426_v45 = vld [vmem:[#allocation1] sm:$0xff] }
 0x379   :  { %2427 = vst [vmem:[#allocation1] ss:$9 sm:$0xff] %v2211_v16  ;;  %2596 = vperm.xlu1 %3244, %v2426_v45   ;;  %v2042_v16 = vmul.f32 1.442695, %v2003_v26 }
 0x37a   :  { %2428 = vst [vmem:[#allocation1 + $0x1] ss:$9 sm:$0xff] %v2212_v43  ;;  %1958 = vadd.xlane.f32.xlu2 %v1957_v38  ;;  %v2242_v43 = vperm.slane %v3298_v59, 7  ;;  %v1980_v38 = vadd.f32 %v3985_v31, %v1938_v58 }
 0x37b   :  { %2429 = vst [vmem:[#allocation1 + $0x2] ss:$9 sm:$0xff] %v2213_v34  ;;  %3303 = vpow2.f32 %v2042_v16  ;;  %v1935_v34 = vpop.xlane.xlu0 %1934 }
 0x37c   :  { %2430 = vst [vmem:[#allocation1 + $0x3] ss:$9 sm:$0xff] %v2214_v20  ;;  %v3302_v37 = vpop.eup %3301 }
 0x37d   :  { %2431 = vst [vmem:[#allocation1 + $0x4] ss:$9 sm:$0xff] %v2215_v22  ;;  %v2243_v20 = vperm.slane %v3302_v37, 0  ;;  %v2244_v22 = vperm.slane %v3302_v37, 1  ;;  %v2245_v15 = vperm.slane %v3302_v37, 2  ;;  %v2248_v50 = vperm.slane %v3302_v37, 5 }
 0x37e   :  { %2432 = vst [vmem:[#allocation1 + $0x5] ss:$9 sm:$0xff] %v2216_v12  ;;  %v2249_v17 = vperm.slane %v3302_v37, 6  ;;  %v2250_v54 = vperm.slane %v3302_v37, 7 }
 0x37f   :  { %2433 = vst [vmem:[#allocation1 + $0x6] ss:$9 sm:$0xff] %v2217_v47  ;;  %v2246_v47 = vperm.slane %v3302_v37, 3 }
 0x380   :  { %2434 = vst [vmem:[#allocation1 + $0x7] ss:$9 sm:$0xff] %v2218_v41  ;;  %v2247_v41 = vperm.slane %v3302_v37, 4 }
 0x381   :  { %v3304_v45 = vpop.eup %3303 }
 0x382   :  { %v2078_v12 = vadd.f32 1.0, %v3304_v45 }
 0x383   :  { %v1944_v36 = vpop.xlane.xlu0 %1943 }
 0x384   :  { %3305 = vrcp.f32 %v2078_v12 }
 0x387   :  { %v2435_v52 = vld [vmem:[#allocation1] sm:$0xff] }
 0x388   :  { %2436 = vst [vmem:[#allocation1] ss:$9 sm:$0xff] %v2219_v28  ;;  %2599 = vperm.xlu0 %3246, %v2435_v52  }
 0x389   :  { %2437 = vst [vmem:[#allocation1 + $0x1] ss:$9 sm:$0xff] %v2220_v2  ;;  %v2005_v2 = vsub.f32 0.0, %v1980_v38 }
 0x38a   :  { %2438 = vst [vmem:[#allocation1 + $0x2] ss:$9 sm:$0xff] %v2221_v19  ;;  %v3306_v39 = vpop.eup %3305 }
 0x38b   :  { %2439 = vst [vmem:[#allocation1 + $0x3] ss:$9 sm:$0xff] %v2222_v0  ;;  %v2251_v27 = vperm.slane %v3306_v39, 0  ;;  %v2252_v19 = vperm.slane %v3306_v39, 1  ;;  %v2253_v14 = vperm.slane %v3306_v39, 2  ;;  %v2255_v62 = vperm.slane %v3306_v39, 4 }
 0x38c   :  { %2440 = vst [vmem:[#allocation1 + $0x4] ss:$9 sm:$0xff] %v2223_v57  ;;  %v2254_v57 = vperm.slane %v3306_v39, 3  ;;  %v2258_v4 = vperm.slane %v3306_v39, 7 }
 0x38d   :  { %2441 = vst [vmem:[#allocation1 + $0x5] ss:$9 sm:$0xff] %v2224_v7  ;;  %v2046_v7 = vmul.f32 1.442695, %v2005_v2  ;;  %v1953_v2 = vpop.xlane.xlu0 %1952 }
 0x38e   :  { %2442 = vst [vmem:[#allocation1 + $0x6] ss:$9 sm:$0xff] %v2225_v46  ;;  %v2256_v46 = vperm.slane %v3306_v39, 5 }
 0x38f   :  { %2443 = vst [vmem:[#allocation1 + $0x7] ss:$9 sm:$0xff] %v2226_v5  ;;  %v2257_v5 = vperm.slane %v3306_v39, 6 }
 0x392   :  { %2587 = vperm.xlu2 %3245, %v4067_v32   ;;  %v2240_v32 = vperm.slane %v3298_v59, 5  ;;  %v1982_v59 = vadd.f32 %v3985_v31, %v1944_v36 }
 0x396   :  { %v2444_v48 = vld [vmem:[#allocation1] sm:$0xff] }
 0x397   :  { %2445 = vst [vmem:[#allocation1] ss:$9 sm:$0xff] %v2227_v30 }
 0x398   :  { %2446 = vst [vmem:[#allocation1 + $0x1] ss:$9 sm:$0xff] %v2228_v3  ;;  %v2006_v3 = vsub.f32 0.0, %v1981_v53 }
 0x399   :  { %2447 = vst [vmem:[#allocation1 + $0x2] ss:$9 sm:$0xff] %v2229_v6 }
 0x39a   :  { %2448 = vst [vmem:[#allocation1 + $0x3] ss:$9 sm:$0xff] %v2230_v13  ;;  %2593 = vperm.xlu2 %3245, %v4083_v56   ;;  %v1979_v56 = vadd.f32 %v3985_v31, %v1935_v34 }
 0x39b   :  { %2449 = vst [vmem:[#allocation1 + $0x4] ss:$9 sm:$0xff] %v2231_v29 }
 0x39c   :  { %2450 = vst [vmem:[#allocation1 + $0x5] ss:$9 sm:$0xff] %v2232_v18  ;;  %v2004_v35 = vsub.f32 0.0, %v1979_v56  ;;  %v2048_v18 = vmul.f32 1.442695, %v2006_v3  ;;  %v1947_v56 = vpop.xlane.xlu1 %1946 }
 0x39d   :  { %2451 = vst [vmem:[#allocation1 + $0x6] ss:$9 sm:$0xff] %v2233_v25  ;;  %v1983_v37 = vadd.f32 %v3985_v31, %v1947_v56 }
 0x39e   :  { %2452 = vst [vmem:[#allocation1 + $0x7] ss:$9 sm:$0xff] %v2234_v49  ;;  %v2044_v40 = vmul.f32 1.442695, %v2004_v35 }
 0x3a0   :  { %3307 = vpow2.f32 %v2044_v40 }
 0x3a2   :  { %2602 = vperm.xlu2 %3245, %v2444_v48  }
 0x3a5   :  { %v2453_v55 = vld [vmem:[#allocation1] sm:$0xff] }
 0x3a6   :  { %2454 = vst [vmem:[#allocation1] ss:$9 sm:$0xff] %v2235_v42  ;;  %2605 = vperm.xlu1 %3244, %v2453_v55   ;;  %v3308_v28 = vpop.eup %3307 }
 0x3a7   :  { %2455 = vst [vmem:[#allocation1 + $0x1] ss:$9 sm:$0xff] %v2236_v24  ;;  %v2079_v52 = vadd.f32 1.0, %v3308_v28  ;;  %v2007_v24 = vsub.f32 0.0, %v1982_v59  ;;  %v2576_v28 = vpop.permute.xlu2 %2575  ;;  %v1985_v59 = vadd.f32 %v3985_v31, %v1953_v2 }
 0x3a8   :  { %2456 = vst [vmem:[#allocation1 + $0x2] ss:$9 sm:$0xff] %v2237_v11 }
 0x3a9   :  { %2457 = vst [vmem:[#allocation1 + $0x3] ss:$9 sm:$0xff] %v2238_v44  ;;  %3309 = vrcp.f32 %v2079_v52 }
 0x3aa   :  { %2458 = vst [vmem:[#allocation1 + $0x4] ss:$9 sm:$0xff] %v2239_v61  ;;  %3311 = vpow2.f32 %v2046_v7 }
 0x3ab   :  { %2459 = vst [vmem:[#allocation1 + $0x5] ss:$9 sm:$0xff] %v2240_v32  ;;  %v2050_v32 = vmul.f32 1.442695, %v2007_v24 }
 0x3ac   :  { %2460 = vst [vmem:[#allocation1 + $0x6] ss:$9 sm:$0xff] %v2241_v33 }
 0x3ad   :  { %2461 = vst [vmem:[#allocation1 + $0x7] ss:$9 sm:$0xff] %v2242_v43 }
 0x3af   :  { %v3310_v23 = vpop.eup %3309  ;;  %v1950_v1 = vpop.xlane.xlu2 %1949 }
 0x3b0   :  { %v3312_v30 = vpop.eup %3311  ;;  %v2259_v21 = vperm.slane %v3310_v23, 0  ;;  %v2260_v6 = vperm.slane %v3310_v23, 1  ;;  %v2261_v9 = vperm.slane %v3310_v23, 2  ;;  %v2262_v29 = vperm.slane %v3310_v23, 3 }
 0x3b1   :  { %v2080_v48 = vadd.f32 1.0, %v3312_v30  ;;  %v2263_v63 = vperm.slane %v3310_v23, 4  ;;  %v2264_v25 = vperm.slane %v3310_v23, 5  ;;  %v2265_v49 = vperm.slane %v3310_v23, 6 }
 0x3b2   :  { %v2266_v51 = vperm.slane %v3310_v23, 7  ;;  %v1984_v30 = vadd.f32 %v3985_v31, %v1950_v1 }
 0x3b3   :  { %3313 = vrcp.f32 %v2080_v48 }
 0x3b4   :  { %v2462_v8 = vld [vmem:[#allocation1] sm:$0xff]  ;;  %3315 = vpow2.f32 %v2048_v18  ;;  %v2009_v48 = vsub.f32 0.0, %v1984_v30 }
 0x3b5   :  { %2463 = vst [vmem:[#allocation1] ss:$9 sm:$0xff] %v2243_v20  ;;  %2608 = vperm.xlu0 %3246, %v2462_v8   ;;  %v2646_v20 = vlaneseq }
 0x3b6   :  { %2464 = vst [vmem:[#allocation1 + $0x1] ss:$9 sm:$0xff] %v2244_v22  ;;  %v2054_v18 = vmul.f32 1.442695, %v2009_v48 }
 0x3b7   :  { %2465 = vst [vmem:[#allocation1 + $0x2] ss:$9 sm:$0xff] %v2245_v15  ;;  %v2008_v15 = vsub.f32 0.0, %v1983_v37  ;;  %v4105_v8 = vand.u32 127, %v2646_v20 }
 0x3b8   :  { %2466 = vst [vmem:[#allocation1 + $0x3] ss:$9 sm:$0xff] %v2246_v47 }
 0x3b9   :  { %2467 = vst [vmem:[#allocation1 + $0x4] ss:$9 sm:$0xff] %v2247_v41  ;;  %v3314_v10 = vpop.eup %3313  ;;  %v4108_v38 = vadd.s32 4294967288, %v4105_v8 }
 0x3ba   :  { %2468 = vst [vmem:[#allocation1 + $0x5] ss:$9 sm:$0xff] %v2248_v50  ;;  %v3316_v42 = vpop.eup %3315  ;;  %v2267_v26 = vperm.slane %v3314_v10, 0  ;;  %v2268_v11 = vperm.slane %v3314_v10, 1  ;;  %v2269_v60 = vperm.slane %v3314_v10, 2  ;;  %v2270_v61 = vperm.slane %v3314_v10, 3 }
 0x3bb   :  { %2469 = vst [vmem:[#allocation1 + $0x6] ss:$9 sm:$0xff] %v2249_v17  ;;  %v2081_v55 = vadd.f32 1.0, %v3316_v42  ;;  %v2271_v16 = vperm.slane %v3314_v10, 4  ;;  %v2272_v33 = vperm.slane %v3314_v10, 5  ;;  %v2273_v43 = vperm.slane %v3314_v10, 6 }
 0x3bc   :  { %2470 = vst [vmem:[#allocation1 + $0x7] ss:$9 sm:$0xff] %v2250_v54  ;;  %v2274_v34 = vperm.slane %v3314_v10, 7  ;;  %v2052_v54 = vmul.f32 1.442695, %v2008_v15 }
 0x3bd   :  { %3317 = vrcp.f32 %v2081_v55 }
 0x3be   :  { %3319 = vpow2.f32 %v2050_v32 }
 0x3c3   :  { %v2471_v0 = vld [vmem:[#allocation1] sm:$0xff]  ;;  %v3318_v45 = vpop.eup %3317 }
 0x3c4   :  { %2472 = vst [vmem:[#allocation1] ss:$9 sm:$0xff] %v2251_v27  ;;  %2611 = vperm.xlu2 %3245, %v2471_v0   ;;  %v3320_v35 = vpop.eup %3319  ;;  %v2275_v22 = vperm.slane %v3318_v45, 0  ;;  %v2276_v12 = vperm.slane %v3318_v45, 1  ;;  %v2277_v47 = vperm.slane %v3318_v45, 2  ;;  %v2278_v50 = vperm.slane %v3318_v45, 3 }
 0x3c5   :  { %2473 = vst [vmem:[#allocation1 + $0x1] ss:$9 sm:$0xff] %v2252_v19  ;;  %v2082_v41 = vadd.f32 1.0, %v3320_v35  ;;  %v2279_v17 = vperm.slane %v3318_v45, 4  ;;  %v2280_v58 = vperm.slane %v3318_v45, 5  ;;  %v2281_v39 = vperm.slane %v3318_v45, 6  ;;  %v2573_v19 = vpop.permute.xlu1 %2572 }
 0x3c6   :  { %2474 = vst [vmem:[#allocation1 + $0x2] ss:$9 sm:$0xff] %v2253_v14  ;;  %v2282_v27 = vperm.slane %v3318_v45, 7  ;;  %v2650_v14 = vperm.slane %v2576_v28, %v4108_v38  ;;  %v2648_v52 = vperm.slane %v2573_v19, %v4105_v8 }
 0x3c7   :  { %2475 = vst [vmem:[#allocation1 + $0x3] ss:$9 sm:$0xff] %v2254_v57  ;;  %3321 = vrcp.f32 %v2082_v41 }
 0x3c8   :  { %2476 = vst [vmem:[#allocation1 + $0x4] ss:$9 sm:$0xff] %v2255_v62  ;;  %3323 = vpow2.f32 %v2052_v54  ;;  %v2652_v0 = vsel %vm2651_vm0, %v2650_v14, %v2648_v52 }
 0x3c9   :  { %2477 = vst [vmem:[#allocation1 + $0x5] ss:$9 sm:$0xff] %v2256_v46 }
 0x3ca   :  { %2478 = vst [vmem:[#allocation1 + $0x6] ss:$9 sm:$0xff] %v2257_v5  ;;  %v4114_v5 = vadd.s32 4294967280, %v4105_v8 }
 0x3cb   :  { %2479 = vst [vmem:[#allocation1 + $0x7] ss:$9 sm:$0xff] %v2258_v4  ;;  %v2579_v4 = vpop.permute.xlu0 %2578 }
 0x3cd   :  { %v3322_v57 = vpop.eup %3321  ;;  %v1956_v37 = vpop.xlane.xlu1 %1955 }
 0x3ce   :  { %v3324_v62 = vpop.eup %3323  ;;  %v2283_v7 = vperm.slane %v3322_v57, 0  ;;  %v2284_v46 = vperm.slane %v3322_v57, 1  ;;  %v2285_v53 = vperm.slane %v3322_v57, 2  ;;  %v2286_v3 = vperm.slane %v3322_v57, 3 }
 0x3cf   :  { %v2083_v23 = vadd.f32 1.0, %v3324_v62  ;;  %v1986_v45 = vadd.f32 %v3985_v31, %v1956_v37 }
 0x3d1   :  { %3325 = vrcp.f32 %v2083_v23 }
 0x3d2   :  { %v2480_v13 = vld [vmem:[#allocation1] sm:$0xff]  ;;  %3327 = vpow2.f32 %v2054_v18 }
 0x3d3   :  { %2481 = vst [vmem:[#allocation1] ss:$9 sm:$0xff] %v2259_v21  ;;  %2614 = vperm.xlu1 %3244, %v2480_v13   ;;  %v2288_v13 = vperm.slane %v3322_v57, 5 }
 0x3d4   :  { %2482 = vst [vmem:[#allocation1 + $0x1] ss:$9 sm:$0xff] %v2260_v6  ;;  %v2654_v6 = vperm.slane %v2579_v4, %v4114_v5 }
 0x3d5   :  { %2483 = vst [vmem:[#allocation1 + $0x2] ss:$9 sm:$0xff] %v2261_v9  ;;  %v2287_v9 = vperm.slane %v3322_v57, 4 }
 0x3d6   :  { %2484 = vst [vmem:[#allocation1 + $0x3] ss:$9 sm:$0xff] %v2262_v29  ;;  %v2656_v29 = vsel %vm2655_vm1, %v2654_v6, %v2652_v0 }
 0x3d7   :  { %2485 = vst [vmem:[#allocation1 + $0x4] ss:$9 sm:$0xff] %v2263_v63  ;;  %v2289_v63 = vperm.slane %v3322_v57, 6  ;;  %v3326_v36 = vpop.eup %3325 }
 0x3d8   :  { %2486 = vst [vmem:[#allocation1 + $0x5] ss:$9 sm:$0xff] %v2264_v25  ;;  %v2290_v25 = vperm.slane %v3322_v57, 7  ;;  %v3328_v42 = vpop.eup %3327  ;;  %v2293_v55 = vperm.slane %v3326_v36, 2  ;;  %v2295_v32 = vperm.slane %v3326_v36, 4  ;;  %v2298_v56 = vperm.slane %v3326_v36, 7 }
 0x3d9   :  { %2487 = vst [vmem:[#allocation1 + $0x6] ss:$9 sm:$0xff] %v2265_v49  ;;  %v2582_v49 = vpop.permute.xlu2 %2581 }
 0x3da   :  { %2488 = vst [vmem:[#allocation1 + $0x7] ss:$9 sm:$0xff] %v2266_v51  ;;  %v4120_v51 = vadd.s32 4294967272, %v4105_v8 }
 0x3dc   :  { %v2658_v10 = vperm.slane %v2582_v49, %v4120_v51 }
 0x3de   :  { %v4125_v24 = vsel %vm2659_vm2, %v2658_v10, %v2656_v29 }
 0x3e1   :  { %v2489_v44 = vld [vmem:[#allocation1] sm:$0xff] }
 0x3e2   :  { %2490 = vst [vmem:[#allocation1] ss:$9 sm:$0xff] %v2267_v26  ;;  %2617 = vperm.xlu0 %3246, %v2489_v44   ;;  %v2291_v26 = vperm.slane %v3326_v36, 0  ;;  %v2084_v44 = vadd.f32 1.0, %v3328_v42 }
 0x3e3   :  { %2491 = vst [vmem:[#allocation1 + $0x1] ss:$9 sm:$0xff] %v2268_v11  ;;  %v2292_v11 = vperm.slane %v3326_v36, 1 }
 0x3e4   :  { %2492 = vst [vmem:[#allocation1 + $0x2] ss:$9 sm:$0xff] %v2269_v60  ;;  %v2010_v60 = vsub.f32 0.0, %v1985_v59  ;;  %3329 = vrcp.f32 %v2084_v44 }
 0x3e5   :  { %2493 = vst [vmem:[#allocation1 + $0x3] ss:$9 sm:$0xff] %v2270_v61 }
 0x3e6   :  { %2494 = vst [vmem:[#allocation1 + $0x4] ss:$9 sm:$0xff] %v2271_v16  ;;  %v2294_v16 = vperm.slane %v3326_v36, 3 }
 0x3e7   :  { %2495 = vst [vmem:[#allocation1 + $0x5] ss:$9 sm:$0xff] %v2272_v33  ;;  %v2296_v33 = vperm.slane %v3326_v36, 5 }
 0x3e8   :  { %2496 = vst [vmem:[#allocation1 + $0x6] ss:$9 sm:$0xff] %v2273_v43  ;;  %v2056_v43 = vmul.f32 1.442695, %v2010_v60 }
 0x3e9   :  { %2497 = vst [vmem:[#allocation1 + $0x7] ss:$9 sm:$0xff] %v2274_v34  ;;  %v2297_v34 = vperm.slane %v3326_v36, 6  ;;  %v1962_v36 = vpop.xlane.xlu0 %1961 }
 0x3ea   :  { %3331 = vpow2.f32 %v2056_v43  ;;  %v3330_v35 = vpop.eup %3329 }
 0x3eb   :  { %v2299_v15 = vperm.slane %v3330_v35, 0  ;;  %v2301_v41 = vperm.slane %v3330_v35, 2  ;;  %v2303_v54 = vperm.slane %v3330_v35, 4  ;;  %v2305_v28 = vperm.slane %v3330_v35, 6 }
 0x3ed   :  { %v1959_v62 = vpop.xlane.xlu2 %1958 }
 0x3f0   :  { %v2498_v40 = vld [vmem:[#allocation1] sm:$0xff] }
 0x3f1   :  { %2499 = vst [vmem:[#allocation1] ss:$9 sm:$0xff] %v2275_v22  ;;  %2620 = vperm.xlu2 %3245, %v2498_v40   ;;  %v3332_v22 = vpop.eup %3331 }
 0x3f2   :  { %2500 = vst [vmem:[#allocation1 + $0x1] ss:$9 sm:$0xff] %v2276_v12  ;;  %v2011_v12 = vsub.f32 0.0, %v1986_v45 }
 0x3f3   :  { %2501 = vst [vmem:[#allocation1 + $0x2] ss:$9 sm:$0xff] %v2277_v47  ;;  %v2300_v47 = vperm.slane %v3330_v35, 1 }
 0x3f4   :  { %2502 = vst [vmem:[#allocation1 + $0x3] ss:$9 sm:$0xff] %v2278_v50  ;;  %v2085_v50 = vadd.f32 1.0, %v3332_v22 }
 0x3f5   :  { %2503 = vst [vmem:[#allocation1 + $0x4] ss:$9 sm:$0xff] %v2279_v17  ;;  %v2302_v17 = vperm.slane %v3330_v35, 3 }
 0x3f6   :  { %2504 = vst [vmem:[#allocation1 + $0x5] ss:$9 sm:$0xff] %v2280_v58  ;;  %v2058_v58 = vmul.f32 1.442695, %v2011_v12  ;;  %3333 = vrcp.f32 %v2085_v50 }
 0x3f7   :  { %2505 = vst [vmem:[#allocation1 + $0x6] ss:$9 sm:$0xff] %v2281_v39  ;;  %v2304_v39 = vperm.slane %v3330_v35, 5 }
 0x3f8   :  { %2506 = vst [vmem:[#allocation1 + $0x7] ss:$9 sm:$0xff] %v2282_v27  ;;  %v2306_v27 = vperm.slane %v3330_v35, 7  ;;  %3335 = vpow2.f32 %v2058_v58 }
 0x3fc   :  { %v3334_v2 = vpop.eup %3333 }
 0x3fd   :  { %v2307_v14 = vperm.slane %v3334_v2, 0  ;;  %v2308_v0 = vperm.slane %v3334_v2, 1  ;;  %v2310_v4 = vperm.slane %v3334_v2, 3  ;;  %v2311_v1 = vperm.slane %v3334_v2, 4 }
 0x3fe   :  { %v3336_v19 = vpop.eup %3335  ;;  %v2312_v23 = vperm.slane %v3334_v2, 5  ;;  %v2313_v30 = vperm.slane %v3334_v2, 6 }
 0x3ff   :  { %v2507_v21 = vld [vmem:[#allocation1] sm:$0xff]  ;;  %v2086_v52 = vadd.f32 1.0, %v3336_v19 }
 0x400   :  { %2508 = vst [vmem:[#allocation1] ss:$9 sm:$0xff] %v2283_v7  ;;  %2623 = vperm.xlu1 %3244, %v2507_v21   ;;  %v2309_v7 = vperm.slane %v3334_v2, 2 }
 0x401   :  { %2509 = vst [vmem:[#allocation1 + $0x1] ss:$9 sm:$0xff] %v2284_v46  ;;  %v1987_v46 = vadd.f32 %v3985_v31, %v1959_v62  ;;  %3337 = vrcp.f32 %v2086_v52 }
 0x402   :  { %2510 = vst [vmem:[#allocation1 + $0x2] ss:$9 sm:$0xff] %v2285_v53 }
 0x403   :  { %2511 = vst [vmem:[#allocation1 + $0x3] ss:$9 sm:$0xff] %v2286_v3  ;;  %v2012_v53 = vsub.f32 0.0, %v1987_v46  ;;  %v2314_v3 = vperm.slane %v3334_v2, 7  ;;  %v2661_v46 = vadd.s32 4294967264, %v4105_v8 }
 0x404   :  { %2512 = vst [vmem:[#allocation1 + $0x4] ss:$9 sm:$0xff] %v2287_v9 }
 0x405   :  { %2513 = vst [vmem:[#allocation1 + $0x5] ss:$9 sm:$0xff] %v2288_v13  ;;  %v2060_v21 = vmul.f32 1.442695, %v2012_v53 }
 0x406   :  { %2514 = vst [vmem:[#allocation1 + $0x6] ss:$9 sm:$0xff] %v2289_v63 }
 0x407   :  { %2515 = vst [vmem:[#allocation1 + $0x7] ss:$9 sm:$0xff] %v2290_v25  ;;  %3339 = vpow2.f32 %v2060_v21  ;;  %v3338_v6 = vpop.eup %3337  ;;  %v2669_v21 = vadd.s32 4294967248, %v4105_v8 }
 0x408   :  { %v2315_v9 = vperm.slane %v3338_v6, 0  ;;  %v2316_v13 = vperm.slane %v3338_v6, 1  ;;  %v2317_v29 = vperm.slane %v3338_v6, 2  ;;  %v2318_v18 = vperm.slane %v3338_v6, 3 }
 0x409   :  { %v2319_v49 = vperm.slane %v3338_v6, 4  ;;  %v2320_v59 = vperm.slane %v3338_v6, 5  ;;  %v2321_v10 = vperm.slane %v3338_v6, 6  ;;  %v2322_v42 = vperm.slane %v3338_v6, 7 }
 0x40d   :  { %v3340_v48 = vpop.eup %3339 }
 0x40e   :  { %v2516_v61 = vld [vmem:[#allocation1] sm:$0xff]  ;;  %v2087_v63 = vadd.f32 1.0, %v3340_v48 }
 0x40f   :  { %2517 = vst [vmem:[#allocation1] ss:$9 sm:$0xff] %v2291_v26  ;;  %2626 = vperm.xlu0 %3246, %v2516_v61   ;;  %v1988_v26 = vadd.f32 %v3985_v31, %v1962_v36  ;;  %v2681_v36 = vadd.s32 4294967224, %v4105_v8 }
 0x410   :  { %2518 = vst [vmem:[#allocation1 + $0x1] ss:$9 sm:$0xff] %v2292_v11  ;;  %3341 = vrcp.f32 %v2087_v63  ;;  %v2677_v63 = vadd.s32 4294967232, %v4105_v8 }
 0x411   :  { %2519 = vst [vmem:[#allocation1 + $0x2] ss:$9 sm:$0xff] %v2293_v55  ;;  %v2013_v11 = vsub.f32 0.0, %v1988_v26 }
 0x412   :  { %2520 = vst [vmem:[#allocation1 + $0x3] ss:$9 sm:$0xff] %v2294_v16 }
 0x413   :  { %2521 = vst [vmem:[#allocation1 + $0x4] ss:$9 sm:$0xff] %v2295_v32  ;;  %v2062_v55 = vmul.f32 1.442695, %v2013_v11 }
 0x414   :  { %2522 = vst [vmem:[#allocation1 + $0x5] ss:$9 sm:$0xff] %v2296_v33 }
 0x415   :  { %2523 = vst [vmem:[#allocation1 + $0x6] ss:$9 sm:$0xff] %v2297_v34  ;;  %3343 = vpow2.f32 %v2062_v55 }
 0x416   :  { %2524 = vst [vmem:[#allocation1 + $0x7] ss:$9 sm:$0xff] %v2298_v56  ;;  %v3342_v60 = vpop.eup %3341 }
 0x417   :  { %v2323_v44 = vperm.slane %v3342_v60, 0  ;;  %v2324_v61 = vperm.slane %v3342_v60, 1  ;;  %v2325_v16 = vperm.slane %v3342_v60, 2  ;;  %v2326_v33 = vperm.slane %v3342_v60, 3 }
 0x418   :  { %v2327_v43 = vperm.slane %v3342_v60, 4  ;;  %v2328_v34 = vperm.slane %v3342_v60, 5  ;;  %v2329_v31 = vperm.slane %v3342_v60, 6  ;;  %v2330_v56 = vperm.slane %v3342_v60, 7 }
 0x41b   :  { %v3344_v37 = vpop.eup %3343 }
 0x41c   :  { %v2088_v45 = vadd.f32 1.0, %v3344_v37 }
 0x41d   :  { %v2525_v40 = vld [vmem:[#allocation1] sm:$0xff] }
 0x41e   :  { %2526 = vst [vmem:[#allocation1] ss:$9 sm:$0xff] %v2299_v15  ;;  %2629 = vperm.xlu2 %3245, %v2525_v40   ;;  %3345 = vrcp.f32 %v2088_v45 }
 0x41f   :  { %2527 = vst [vmem:[#allocation1 + $0x1] ss:$9 sm:$0xff] %v2300_v47 }
 0x420   :  { %2528 = vst [vmem:[#allocation1 + $0x2] ss:$9 sm:$0xff] %v2301_v41 }
 0x421   :  { %2529 = vst [vmem:[#allocation1 + $0x3] ss:$9 sm:$0xff] %v2302_v17 }
 0x422   :  { %2530 = vst [vmem:[#allocation1 + $0x4] ss:$9 sm:$0xff] %v2303_v54 }
 0x423   :  { %2531 = vst [vmem:[#allocation1 + $0x5] ss:$9 sm:$0xff] %v2304_v39  ;;  %v2585_v39 = vpop.permute.xlu1 %2584 }
 0x424   :  { %2532 = vst [vmem:[#allocation1 + $0x6] ss:$9 sm:$0xff] %v2305_v28  ;;  %v3346_v35 = vpop.eup %3345  ;;  %v2588_v28 = vpop.permute.xlu2 %2587  ;;  %v2662_v53 = vperm.slane %v2585_v39, %v2661_v46  ;;  %v2705_v39 = vadd.s32 4294967176, %v4105_v8 }
 0x425   :  { %2533 = vst [vmem:[#allocation1 + $0x7] ss:$9 sm:$0xff] %v2306_v27  ;;  %v2331_v22 = vperm.slane %v3346_v35, 0  ;;  %v2332_v15 = vperm.slane %v3346_v35, 1  ;;  %v2333_v47 = vperm.slane %v3346_v35, 2  ;;  %v2334_v41 = vperm.slane %v3346_v35, 3 }
 0x426   :  { %v2335_v40 = vperm.slane %v3346_v35, 4  ;;  %v2336_v50 = vperm.slane %v3346_v35, 5  ;;  %v2337_v17 = vperm.slane %v3346_v35, 6  ;;  %v2338_v54 = vperm.slane %v3346_v35, 7 }
 0x42b   :  { %v2591_v27 = vpop.permute.xlu1 %2590 }
 0x42c   :  { %v2534_v57 = vld [vmem:[#allocation1] sm:$0xff]  ;;  %v2594_v2 = vpop.permute.xlu2 %2593 }
 0x42d   :  { %2632 = vperm.xlu1 %3244, %v2534_v57   ;;  %2535 = vst [vmem:[#allocation1] ss:$9 sm:$0xff] %v2307_v14  ;;  %v2600_v14 = vpop.permute.xlu0 %2599 }
 0x42e   :  { %2536 = vst [vmem:[#allocation1 + $0x1] ss:$9 sm:$0xff] %v2308_v0  ;;  %v2682_v55 = vperm.slane %v2600_v14, %v2681_v36 }
 0x42f   :  { %2537 = vst [vmem:[#allocation1 + $0x2] ss:$9 sm:$0xff] %v2309_v7 }
 0x430   :  { %2538 = vst [vmem:[#allocation1 + $0x3] ss:$9 sm:$0xff] %v2310_v4  ;;  %v2665_v4 = vadd.s32 4294967256, %v4105_v8 }
 0x431   :  { %2539 = vst [vmem:[#allocation1 + $0x4] ss:$9 sm:$0xff] %v2311_v1 }
 0x432   :  { %2540 = vst [vmem:[#allocation1 + $0x5] ss:$9 sm:$0xff] %v2312_v23  ;;  %v2666_v23 = vperm.slane %v2588_v28, %v2665_v4 }
 0x433   :  { %2541 = vst [vmem:[#allocation1 + $0x6] ss:$9 sm:$0xff] %v2313_v30  ;;  %v2597_v19 = vpop.permute.xlu1 %2596  ;;  %v4141_v30 = vadd.s32 4294967240, %v4105_v8 }
 0x434   :  { %2542 = vst [vmem:[#allocation1 + $0x7] ss:$9 sm:$0xff] %v2314_v3  ;;  %v2603_v52 = vpop.permute.xlu2 %2602 }
 0x435   :  { %v4130_v57 = vpop.permute.xlu0 %2608 }
 0x43b   :  { %v2543_v25 = vld [vmem:[#allocation1] sm:$0xff]  ;;  %v2606_v0 = vpop.permute.xlu1 %2605 }
 0x43c   :  { %2635 = vperm.xlu0 %3246, %v2543_v25   ;;  %2544 = vst [vmem:[#allocation1] ss:$9 sm:$0xff] %v2315_v9  ;;  %v4132_v62 = vpop.permute.xlu2 %2611  ;;  %v2664_v9 = vsel %vm2663_vm3, %v2662_v53, %v4125_v24  ;;  %v2678_v24 = vperm.slane %v2597_v19, %v2677_v63 }
 0x43d   :  { %2545 = vst [vmem:[#allocation1 + $0x1] ss:$9 sm:$0xff] %v2316_v13  ;;  %v2668_v48 = vsel %vm2667_vm4, %v2666_v23, %v2664_v9  ;;  %v2674_v13 = vperm.slane %v2594_v2, %v4141_v30 }
 0x43e   :  { %2546 = vst [vmem:[#allocation1 + $0x2] ss:$9 sm:$0xff] %v2317_v29  ;;  %v2670_v29 = vperm.slane %v2591_v27, %v2669_v21 }
 0x43f   :  { %2547 = vst [vmem:[#allocation1 + $0x3] ss:$9 sm:$0xff] %v2318_v18 }
 0x440   :  { %2548 = vst [vmem:[#allocation1 + $0x4] ss:$9 sm:$0xff] %v2319_v49  ;;  %v2672_v25 = vsel %vm2671_vm5, %v2670_v29, %v2668_v48  ;;  %v2685_v49 = vadd.s32 4294967216, %v4105_v8 }
 0x441   :  { %2549 = vst [vmem:[#allocation1 + $0x5] ss:$9 sm:$0xff] %v2320_v59  ;;  %v2676_v59 = vsel %vm2675_vm6, %v2674_v13, %v2672_v25 }
 0x442   :  { %2550 = vst [vmem:[#allocation1 + $0x6] ss:$9 sm:$0xff] %v2321_v10  ;;  %v2686_v26 = vperm.slane %v2603_v52, %v2685_v49 }
 0x443   :  { %2551 = vst [vmem:[#allocation1 + $0x7] ss:$9 sm:$0xff] %v2322_v42  ;;  %v2680_v42 = vsel %vm2679_vm7, %v2678_v24, %v2676_v59 }
 0x445   :  { %v4134_v7 = vpop.permute.xlu1 %2614 }
 0x44a   :  { %v2552_v32 = vld [vmem:[#allocation1] sm:$0xff] }
 0x44b   :  { %2638 = vperm.xlu2 %3245, %v2552_v32   ;;  %2553 = vst [vmem:[#allocation1] ss:$9 sm:$0xff] %v2323_v44  ;;  %v2621_v3 = vpop.permute.xlu2 %2620  ;;  %v2689_v44 = vadd.s32 4294967208, %v4105_v8  ;;  %v2684_v32 = vsel %vm2683_vm8, %v2682_v55, %v2680_v42 }
 0x44c   :  { %2554 = vst [vmem:[#allocation1 + $0x1] ss:$9 sm:$0xff] %v2324_v61  ;;  %v2709_v11 = vperm.slane %v2621_v3, %v4105_v8 }
 0x44d   :  { %2555 = vst [vmem:[#allocation1 + $0x2] ss:$9 sm:$0xff] %v2325_v16  ;;  %v2693_v16 = vadd.s32 4294967200, %v4105_v8  ;;  %v2690_v37 = vperm.slane %v2606_v0, %v2689_v44 }
 0x44e   :  { %2556 = vst [vmem:[#allocation1 + $0x3] ss:$9 sm:$0xff] %v2326_v33  ;;  %v2697_v33 = vadd.s32 4294967192, %v4105_v8 }
 0x44f   :  { %2557 = vst [vmem:[#allocation1 + $0x4] ss:$9 sm:$0xff] %v2327_v43 }
 0x450   :  { %2558 = vst [vmem:[#allocation1 + $0x5] ss:$9 sm:$0xff] %v2328_v34  ;;  %v2688_v34 = vsel %vm2687_vm9, %v2686_v26, %v2684_v32 }
 0x451   :  { %2559 = vst [vmem:[#allocation1 + $0x6] ss:$9 sm:$0xff] %v2329_v31 }
 0x452   :  { %2560 = vst [vmem:[#allocation1 + $0x7] ss:$9 sm:$0xff] %v2330_v56 }
 0x454   :  { %v4138_v1 = vpop.permute.xlu0 %2617 }
 0x459   :  { %v2561_v12 = vld [vmem:[#allocation1] sm:$0xff] }
 0x45a   :  { %2641 = vperm.xlu1 %3244, %v2561_v12   ;;  %2562 = vst [vmem:[#allocation1] ss:$9 sm:$0xff] %v2331_v22 }
 0x45b   :  { %2563 = vst [vmem:[#allocation1 + $0x1] ss:$9 sm:$0xff] %v2332_v15  ;;  %v2692_v15 = vsel %vm2691_vm10, %v2690_v37, %v2688_v34 }
 0x45c   :  { %2564 = vst [vmem:[#allocation1 + $0x2] ss:$9 sm:$0xff] %v2333_v47 }
 0x45d   :  { %2565 = vst [vmem:[#allocation1 + $0x3] ss:$9 sm:$0xff] %v2334_v41  ;;  %v2694_v41 = vperm.slane %v4130_v57, %v2693_v16 }
 0x45e   :  { %2566 = vst [vmem:[#allocation1 + $0x4] ss:$9 sm:$0xff] %v2335_v40  ;;  %v2701_v40 = vadd.s32 4294967184, %v4105_v8  ;;  %v2706_v8 = vperm.slane %v4138_v1, %v2705_v39 }
 0x45f   :  { %2567 = vst [vmem:[#allocation1 + $0x5] ss:$9 sm:$0xff] %v2336_v50 }
 0x460   :  { %2568 = vst [vmem:[#allocation1 + $0x6] ss:$9 sm:$0xff] %v2337_v17  ;;  %v2702_v2 = vperm.slane %v4134_v7, %v2701_v40 }
 0x461   :  { %2569 = vst [vmem:[#allocation1 + $0x7] ss:$9 sm:$0xff] %v2338_v54 }
 0x468   :  { %v2570_v58 = vld [vmem:[#allocation1] sm:$0xff] }
 0x469   :  { %2644 = vperm.xlu0 %3246, %v2570_v58  }
 0x472   :  { %v2624_v6 = vpop.permute.xlu1 %2623 }
 0x473   :  { %v2710_v61 = vperm.slane %v2624_v6, %v4108_v38  ;;  %v2698_v38 = vperm.slane %v4132_v62, %v2697_v33 }
 0x475   :  { %v2711_v31 = vsel %vm2651_vm0, %v2710_v61, %v2709_v11  ;;  %vm2732_vm0 = vcmp.lt.s32.totalorder %v2646_v20, 200 }
 0x478   :  { %v2630_v60 = vpop.permute.xlu2 %2629 }
 0x479   :  { %v2714_v56 = vperm.slane %v2630_v60, %v4120_v51 }
 0x481   :  { %v2627_v18 = vpop.permute.xlu0 %2626 }
 0x482   :  { %v2712_v45 = vperm.slane %v2627_v18, %v4114_v5  ;;  %v2696_v5 = vsel %vm2695_vm11, %v2694_v41, %v2692_v15 }
 0x483   :  { %v2700_v28 = vsel %vm2699_vm12, %v2698_v38, %v2696_v5 }
 0x484   :  { %v2713_v12 = vsel %vm2655_vm1, %v2712_v45, %v2711_v31  ;;  %v2704_v0 = vsel %vm2703_vm13, %v2702_v2, %v2700_v28 }
 0x485   :  { %v2715_v50 = vsel %vm2659_vm2, %v2714_v56, %v2713_v12 }
 0x49f   :  { %v2633_v10 = vpop.permute.xlu1 %2632 }
 0x4a0   :  { %v2716_v35 = vperm.slane %v2633_v10, %v2661_v46  ;;  %v2708_v46 = vsel %vm2707_vm14, %v2706_v8, %v2704_v0 }
 0x4a2   :  { %v2717_v17 = vsel %vm2663_vm3, %v2716_v35, %v2715_v50 }
 0x4a5   :  { %v2639_v51 = vpop.permute.xlu2 %2638 }
 0x4a6   :  { %v2720_v27 = vperm.slane %v2639_v51, %v2669_v21 }
 0x4ae   :  { %v2636_v43 = vpop.permute.xlu0 %2635 }
 0x4af   :  { %v2718_v22 = vperm.slane %v2636_v43, %v2665_v4 }
 0x4b1   :  { %v2719_v54 = vsel %vm2667_vm4, %v2718_v22, %v2717_v17 }
 0x4b2   :  { %v2721_v14 = vsel %vm2671_vm5, %v2720_v27, %v2719_v54 }
 0x4cc   :  { %v2642_v47 = vpop.permute.xlu1 %2641 }
 0x4cd   :  { %v2722_v58 = vperm.slane %v2642_v47, %v4141_v30 }
 0x4cf   :  { %v2723_v57 = vsel %vm2675_vm6, %v2722_v58, %v2721_v14 }
 0x4db   :  { %v2645_v19 = vpop.permute.xlu0 %2644 }
 0x4dc   :  { %v2724_v52 = vperm.slane %v2645_v19, %v2677_v63 }
 0x4de   :  { %v2725_v62 = vsel %vm2679_vm7, %v2724_v52, %v2723_v57 }
 0x4df   :  { %v2726_v7 = vrot.slane %v2725_v62, 7 }
 0x4e1   :  { %v2728_v4 = vsel %vm2727_vm15, %v2708_v46, %v2726_v7 }
 0x4e2   :  { %2734 = vst.msk [vmem:[#allocation11] sm:$0x3] %vm2732_vm0, %v2728_v4 }
 0x4e3   :  { %2745 = dma.vmem_to_hbm [thread:$0]  %s2741_s25, 32, %s2743_s28, [#allocation5]  }
 0x4e4   :  { %3473 = dma.done.wait [#allocation5], 32  }
 0x4e5   :  { %3474 = vsyncadd [#allocation5], 4294967264 }
 0x4e6   :  { %2750 = vsyncpa [#allocation4], 1 }
 0x4e7   :  { %2751 = vsyncpa [#allocation7], 1 }
 0x4e8   :  { %2752 = vsyncpa [#allocation10], 1 }
 0x4e9   :  { %2753 = vsyncpa [#allocation5], 1 }

</bundles_post_ra>
